<compile_context>
chip_gen: v5e
topology: v5e:2x2
jax: 0.10.0
libtpu: 0.0.40
codegen_flags: <defaults>
</compile_context>

<pallas_src>
import functools
import math

import jax
import jax.numpy as jnp
from jax.experimental import pallas as pl
from jax.experimental.pallas import tpu as pltpu


def _attention_block_kernel(num_heads, ffn_chunk,
                            x_ref,
                            wq_ref, wk_ref, wv_ref, bq_ref, bk_ref, bv_ref,
                            wo_ref, bo_ref,
                            w1_ref, b1_ref, w2_ref, b2_ref,
                            ln1w_ref, ln1b_ref, ln2w_ref, ln2b_ref,
                            o_ref):
    x3 = x_ref[...]                                   # (Bb, S, E) f32
    Bb, S, E = x3.shape
    H = num_heads
    d = E // H
    T = Bb * S

    x2d = x3.reshape(T, E)                            # leading-dim merge (layout-free)
    xb = x2d.astype(jnp.bfloat16)

    # ---- Q/K/V projections (bf16 x bf16, f32 accumulate).
    # 1/sqrt(d) is already folded into the Q weights/bias.
    q = jnp.dot(xb, wq_ref[...], preferred_element_type=jnp.float32) + bq_ref[...]
    k = jnp.dot(xb, wk_ref[...], preferred_element_type=jnp.float32) + bk_ref[...]
    v = jnp.dot(xb, wv_ref[...], preferred_element_type=jnp.float32) + bv_ref[...]

    # ---- multi-head attention with the out-projection folded per head.
    # Each head contributes a lane-dense (S, E) update to the accumulator, so
    # no lane-sparse per-head outputs are ever stored.  K^T is built once per
    # batch element instead of per head.
    attn_rows = []
    for bi in range(Bb):                              # static loop (Bb known at trace)
        r0 = bi * S
        qb = q[r0:r0 + S, :].astype(jnp.bfloat16)     # (S, E)
        ktb = k[r0:r0 + S, :].T.astype(jnp.bfloat16)  # (E, S)  hoisted K^T
        vb = v[r0:r0 + S, :].astype(jnp.bfloat16)     # (S, E)
        acc = jnp.zeros((S, E), jnp.float32)
        for h in range(H):
            c0 = h * d
            s = jnp.dot(qb[:, c0:c0 + d], ktb[c0:c0 + d, :],
                        preferred_element_type=jnp.float32)          # (S, S)
            s = s - jnp.max(s, axis=-1, keepdims=True)
            p = jnp.exp(s)
            p = p * pl.reciprocal(jnp.sum(p, axis=-1, keepdims=True), approx=True)
            oh = jnp.dot(p.astype(jnp.bfloat16), vb[:, c0:c0 + d],
                         preferred_element_type=jnp.float32)         # (S, d)
            acc = acc + jnp.dot(oh.astype(jnp.bfloat16), wo_ref[h],
                                preferred_element_type=jnp.float32)  # (S, E) lane-dense
        attn_rows.append(acc)
    attn2 = attn_rows[0] if Bb == 1 else jnp.concatenate(attn_rows, axis=0)  # (T, E)

    # ---- residual 1 ----
    x1 = (x2d + attn2 + bo_ref[...]).reshape(Bb, S, E)

    # ---- LayerNorm over [S, E] per batch element, vectorized over Bb ----
    def layernorm(y3, w_ref, b_ref):
        w = w_ref[...].astype(jnp.float32)            # bf16 params, f32 math
        b = b_ref[...].astype(jnp.float32)
        mu = jnp.mean(jnp.mean(y3, axis=2, keepdims=True), axis=1, keepdims=True)
        dy = y3 - mu
        var = jnp.mean(jnp.mean(dy * dy, axis=2, keepdims=True), axis=1, keepdims=True)
        return dy * jax.lax.rsqrt(var + 1e-5) * w + b

    xn1 = layernorm(x1, ln1w_ref, ln1b_ref)           # (Bb, S, E) f32

    # ---- FFN, tiled over the 4E hidden dimension ----
    xn1b = xn1.reshape(T, E).astype(jnp.bfloat16)
    F = w1_ref.shape[1]                               # 4E
    ffn = jnp.zeros((T, E), jnp.float32)
    for c0 in range(0, F, ffn_chunk):
        c1 = min(c0 + ffn_chunk, F)
        hblk = jnp.maximum(
            jnp.dot(xn1b, w1_ref[:, c0:c1], preferred_element_type=jnp.float32)
            + b1_ref[:, c0:c1], 0.0)                  # fused bias + ReLU
        # Dropout(p=0.2) in eval mode == identity (see TODO at top of file).
        ffn = ffn + jnp.dot(hblk.astype(jnp.bfloat16), w2_ref[c0:c1, :],
                            preferred_element_type=jnp.float32)
    ffn = ffn + b2_ref[...]

    # ---- residual 2 + LayerNorm 2; single lane-dense store ----
    xr2 = xn1 + ffn.reshape(Bb, S, E)
    o_ref[...] = layernorm(xr2, ln2w_ref, ln2b_ref).astype(o_ref.dtype)


def _tpu_kind():
    try:
        return jax.devices()[0].device_kind.lower()
    except Exception:
        return ""


def _is_two_core_chip(kind):
    # v7x has two TensorCores per chip (and only 64 MiB VMEM); v5e/v6e have one.
    return ("v7" in kind) or ("7x" in kind)


def _default_block_b(B, S, kind):
    # Single-TC chips (v5e/v6e): one fat batch block (amortizes ~0.35us/step,
    # fills the MXU M dimension).  v7x: two "parallel" grid blocks (one per
    # TensorCore) as long as each block still has Bb*S >= 256 rows.
    if _is_two_core_chip(kind) and B % 2 == 0 and (B // 2) * S >= 256:
        return B // 2
    return B


def _vmem_limit_bytes(operands, out_bytes, kind):
    footprint = sum(int(o.size) * o.dtype.itemsize for o in operands) + out_bytes
    want = max(32 << 20, 4 * footprint)               # constants + I/O buffers + headroom
    cap = (48 << 20) if _is_two_core_chip(kind) else (100 << 20)   # 64 vs 128 MiB physical
    return int(min(cap, want))


def attention_block_forward(x, params, num_heads, block_b=None, ffn_chunk=None):
    B, S, E = x.shape
    (wqkv, bqkv, wo, bo, w1, b1, w2, b2, ln1w, ln1b, ln2w, ln2b) = params
    d = E // num_heads
    scale = 1.0 / math.sqrt(d)

    # Host-side one-time weight prep:
    #  * pre-transpose so the kernel never transposes weights,
    #  * fold 1/sqrt(d) into the Q projection weights and bias,
    #  * reshape Wo^T to (H, d, E) so the out-projection folds per head,
    #  * matmul weights + LN params in bf16; biases stay f32.
    wq_t = (wqkv[:E].T * scale).astype(jnp.bfloat16)          # (E, E)
    wk_t = wqkv[E:2 * E].T.astype(jnp.bfloat16)               # (E, E)
    wv_t = wqkv[2 * E:].T.astype(jnp.bfloat16)                # (E, E)
    bq2 = (bqkv[:E] * scale).reshape(1, E)
    bk2 = bqkv[E:2 * E].reshape(1, E)
    bv2 = bqkv[2 * E:].reshape(1, E)
    wo3 = wo.T.reshape(num_heads, d, E).astype(jnp.bfloat16)  # (H, d, E)
    bo2 = bo.reshape(1, E)
    w1_t = w1.T.astype(jnp.bfloat16)                          # (E, 4E)
    b12 = b1.reshape(1, 4 * E)
    w2_t = w2.T.astype(jnp.bfloat16)                          # (4E, E)
    b22 = b2.reshape(1, E)
    ln1w_h = ln1w.astype(jnp.bfloat16)
    ln1b_h = ln1b.astype(jnp.bfloat16)
    ln2w_h = ln2w.astype(jnp.bfloat16)
    ln2b_h = ln2b.astype(jnp.bfloat16)

    kind = _tpu_kind()
    if block_b is None:
        block_b = _default_block_b(B, S, kind)
    assert B % block_b == 0
    num_blocks = B // block_b
    if ffn_chunk is None:
        ffn_chunk = min(512, 4 * E)

    consts = (wq_t, wk_t, wv_t, bq2, bk2, bv2, wo3, bo2,
              w1_t, b12, w2_t, b22, ln1w_h, ln1b_h, ln2w_h, ln2b_h)
    vmem_limit = _vmem_limit_bytes((x,) + consts, B * S * E * 4, kind)

    kernel = functools.partial(_attention_block_kernel, num_heads, ffn_chunk)

    def build(single_buffer_consts):
        def const_spec(shape):
            imap = (lambda b: (0, 0, 0)) if len(shape) == 3 else (lambda b: (0, 0))
            if single_buffer_consts:
                # Grid-invariant operands: no double buffering (v7x VMEM headroom).
                return pl.BlockSpec(shape, imap, pipeline_mode=pl.Buffered(1))
            return pl.BlockSpec(shape, imap)

        return pl.pallas_call(
            kernel,
            out_shape=jax.ShapeDtypeStruct((B, S, E), jnp.float32),
            grid=(num_blocks,),
            in_specs=[pl.BlockSpec((block_b, S, E), lambda b: (b, 0, 0))]
                     + [const_spec(c.shape) for c in consts],
            out_specs=pl.BlockSpec((block_b, S, E), lambda b: (b, 0, 0)),
            compiler_params=pltpu.CompilerParams(
                dimension_semantics=("parallel",),
                vmem_limit_bytes=vmem_limit),
        )

    try:
        return build(True)(x, *consts)
    except Exception:
        # pipeline_mode=pl.Buffered(1) unsupported on this jax version:
        # fall back to default double-buffered constant operands.
        return build(False)(x, *consts)


def _reference_forward(x, params, num_heads):
    """Pure-JAX f32 reference matching nn.MultiheadAttention / LayerNorm / FFN."""
    (wqkv, bqkv, wo, bo, w1, b1, w2, b2, ln1w, ln1b, ln2w, ln2b) = params
    B, S, E = x.shape
    H = num_heads
    d = E // H

    qkv = jnp.einsum("bse,fe->bsf", x, wqkv) + bqkv
    q, k, v = jnp.split(qkv, 3, axis=-1)
    q = q.reshape(B, S, H, d).transpose(0, 2, 1, 3)
    k = k.reshape(B, S, H, d).transpose(0, 2, 1, 3)
    v = v.reshape(B, S, H, d).transpose(0, 2, 1, 3)
    s = jnp.einsum("bhqd,bhkd->bhqk", q, k) / math.sqrt(d)
    p = jax.nn.softmax(s, axis=-1)
    attn = jnp.einsum("bhqk,bhkd->bhqd", p, v)
    attn = attn.transpose(0, 2, 1, 3).reshape(B, S, E)
    attn = jnp.einsum("bse,fe->bsf", attn, wo) + bo

    x1 = x + attn

    def layernorm_2d(y, w, b):
        mu = jnp.mean(y, axis=(1, 2), keepdims=True)
        var = jnp.mean((y - mu) ** 2, axis=(1, 2), keepdims=True)
        return (y - mu) / jnp.sqrt(var + 1e-5) * w + b

    xn1 = layernorm_2d(x1, ln1w, ln1b)
    h = jax.nn.relu(jnp.einsum("bse,fe->bsf", xn1, w1) + b1)
    ffn = jnp.einsum("bsf,ef->bse", h, w2) + b2
    x2 = xn1 + ffn
    return layernorm_2d(x2, ln2w, ln2b)


def init_params(key, embedding_dim, max_len):
    E, S = embedding_dim, max_len
    ks = jax.random.split(key, 8)
    scale = 0.05
    wqkv = scale * jax.random.normal(ks[0], (3 * E, E), jnp.float32)
    bqkv = scale * jax.random.normal(ks[1], (3 * E,), jnp.float32)
    wo = scale * jax.random.normal(ks[2], (E, E), jnp.float32)
    bo = scale * jax.random.normal(ks[3], (E,), jnp.float32)
    w1 = scale * jax.random.normal(ks[4], (4 * E, E), jnp.float32)
    b1 = scale * jax.random.normal(ks[5], (4 * E,), jnp.float32)
    w2 = scale * jax.random.normal(ks[6], (E, 4 * E), jnp.float32)
    b2 = scale * jax.random.normal(ks[7], (E,), jnp.float32)
    # nn.LayerNorm default init: weight = 1, bias = 0.
    ln1w = jnp.ones((S, E), jnp.float32)
    ln1b = jnp.zeros((S, E), jnp.float32)
    ln2w = jnp.ones((S, E), jnp.float32)
    ln2b = jnp.zeros((S, E), jnp.float32)
    return (wqkv, bqkv, wo, bo, w1, b1, w2, b2, ln1w, ln1b, ln2w, ln2b)


if __name__ == "__main__":
    B, S, E, H = 2, 8, 32, 4   # batch, max_len, embedding_dim, num_heads

    key = jax.random.PRNGKey(0)
    k_x, k_p = jax.random.split(key)
    x = jax.random.normal(k_x, (B, S, E), jnp.float32)
    params = init_params(k_p, E, S)

    out = attention_block_forward(x, params, H)
    out = jax.block_until_ready(out)

    ref = _reference_forward(x, params, H)
    assert out.shape == (B, S, E)
    # bf16 matmul inputs (f32 accumulation) + approx reciprocal vs. a pure-f32
    # reference: worst-element error is O(1e-2), so compare at a
    # bf16-appropriate tolerance.
    assert jnp.allclose(out, ref, atol=2e-2, rtol=2e-2), "mismatch vs reference"

    print("KERNEL_OK")
</pallas_src>

<mosaic_0001>
module attributes {stable_mosaic.version = 11 : i64} {
  func.func @_attention_block_kernel(%arg0: i32, %arg1: memref<2x8x32xf32, #tpu.memory_space<vmem>>, %arg2: memref<32x32xbf16, #tpu.memory_space<vmem>>, %arg3: memref<32x32xbf16, #tpu.memory_space<vmem>>, %arg4: memref<32x32xbf16, #tpu.memory_space<vmem>>, %arg5: memref<1x32xf32, #tpu.memory_space<vmem>>, %arg6: memref<1x32xf32, #tpu.memory_space<vmem>>, %arg7: memref<1x32xf32, #tpu.memory_space<vmem>>, %arg8: memref<4x8x32xbf16, #tpu.memory_space<vmem>>, %arg9: memref<1x32xf32, #tpu.memory_space<vmem>>, %arg10: memref<32x128xbf16, #tpu.memory_space<vmem>>, %arg11: memref<1x128xf32, #tpu.memory_space<vmem>>, %arg12: memref<128x32xbf16, #tpu.memory_space<vmem>>, %arg13: memref<1x32xf32, #tpu.memory_space<vmem>>, %arg14: memref<8x32xbf16, #tpu.memory_space<vmem>>, %arg15: memref<8x32xbf16, #tpu.memory_space<vmem>>, %arg16: memref<8x32xbf16, #tpu.memory_space<vmem>>, %arg17: memref<8x32xbf16, #tpu.memory_space<vmem>>, %arg18: memref<2x8x32xf32, #tpu.memory_space<vmem>>) attributes {dimension_semantics = [#tpu.dimension_semantics<parallel>], iteration_bounds = array<i64: 1>, scalar_prefetch = 0 : i64, scratch_operands = 0 : i64, tpu.core_type = #tpu.core_type<tc>, window_params = [{transform_indices = @transform_0, window_bounds = array<i64: 2, 8, 32>}, {pipeline_mode = #tpu.pipeline_mode<synchronous>, transform_indices = @transform_1, window_bounds = array<i64: 32, 32>}, {pipeline_mode = #tpu.pipeline_mode<synchronous>, transform_indices = @transform_2, window_bounds = array<i64: 32, 32>}, {pipeline_mode = #tpu.pipeline_mode<synchronous>, transform_indices = @transform_3, window_bounds = array<i64: 32, 32>}, {pipeline_mode = #tpu.pipeline_mode<synchronous>, transform_indices = @transform_4, window_bounds = array<i64: 1, 32>}, {pipeline_mode = #tpu.pipeline_mode<synchronous>, transform_indices = @transform_5, window_bounds = array<i64: 1, 32>}, {pipeline_mode = #tpu.pipeline_mode<synchronous>, transform_indices = @transform_6, window_bounds = array<i64: 1, 32>}, {pipeline_mode = #tpu.pipeline_mode<synchronous>, transform_indices = @transform_7, window_bounds = array<i64: 4, 8, 32>}, {pipeline_mode = #tpu.pipeline_mode<synchronous>, transform_indices = @transform_8, window_bounds = array<i64: 1, 32>}, {pipeline_mode = #tpu.pipeline_mode<synchronous>, transform_indices = @transform_9, window_bounds = array<i64: 32, 128>}, {pipeline_mode = #tpu.pipeline_mode<synchronous>, transform_indices = @transform_10, window_bounds = array<i64: 1, 128>}, {pipeline_mode = #tpu.pipeline_mode<synchronous>, transform_indices = @transform_11, window_bounds = array<i64: 128, 32>}, {pipeline_mode = #tpu.pipeline_mode<synchronous>, transform_indices = @transform_12, window_bounds = array<i64: 1, 32>}, {pipeline_mode = #tpu.pipeline_mode<synchronous>, transform_indices = @transform_13, window_bounds = array<i64: 8, 32>}, {pipeline_mode = #tpu.pipeline_mode<synchronous>, transform_indices = @transform_14, window_bounds = array<i64: 8, 32>}, {pipeline_mode = #tpu.pipeline_mode<synchronous>, transform_indices = @transform_15, window_bounds = array<i64: 8, 32>}, {pipeline_mode = #tpu.pipeline_mode<synchronous>, transform_indices = @transform_16, window_bounds = array<i64: 8, 32>}, {transform_indices = @transform_17, window_bounds = array<i64: 2, 8, 32>}]} {
    %c0 = arith.constant 0 : index
    %c0_0 = arith.constant 0 : index
    %c0_1 = arith.constant 0 : index
    %0 = vector.load %arg1[%c0, %c0_0, %c0_1] : memref<2x8x32xf32, #tpu.memory_space<vmem>>, vector<2x8x32xf32>
    %1 = vector.shape_cast %0 : vector<2x8x32xf32> to vector<16x32xf32>
    %2 = arith.truncf %1 : vector<16x32xf32> to vector<16x32xbf16>
    %c0_2 = arith.constant 0 : index
    %c0_3 = arith.constant 0 : index
    %3 = vector.load %arg2[%c0_2, %c0_3] : memref<32x32xbf16, #tpu.memory_space<vmem>>, vector<32x32xbf16>
    %cst = arith.constant dense<0.000000e+00> : vector<16x32xf32>
    %4 = tpu.matmul %2, %3, %cst {dimension_numbers = #tpu.dot_dimension_numbers<[1], [0], [0], [1], [0, 0, 1, 1], [], []>} : vector<16x32xbf16>, vector<32x32xbf16>, vector<16x32xf32> -> vector<16x32xf32>
    %c0_4 = arith.constant 0 : index
    %c0_5 = arith.constant 0 : index
    %5 = vector.load %arg5[%c0_4, %c0_5] : memref<1x32xf32, #tpu.memory_space<vmem>>, vector<1x32xf32>
    %6 = vector.broadcast %5 : vector<1x32xf32> to vector<16x32xf32>
    %7 = arith.addf %4, %6 : vector<16x32xf32>
    %c0_6 = arith.constant 0 : index
    %c0_7 = arith.constant 0 : index
    %8 = vector.load %arg3[%c0_6, %c0_7] : memref<32x32xbf16, #tpu.memory_space<vmem>>, vector<32x32xbf16>
    %cst_8 = arith.constant dense<0.000000e+00> : vector<16x32xf32>
    %9 = tpu.matmul %2, %8, %cst_8 {dimension_numbers = #tpu.dot_dimension_numbers<[1], [0], [0], [1], [0, 0, 1, 1], [], []>} : vector<16x32xbf16>, vector<32x32xbf16>, vector<16x32xf32> -> vector<16x32xf32>
    %c0_9 = arith.constant 0 : index
    %c0_10 = arith.constant 0 : index
    %10 = vector.load %arg6[%c0_9, %c0_10] : memref<1x32xf32, #tpu.memory_space<vmem>>, vector<1x32xf32>
    %11 = vector.broadcast %10 : vector<1x32xf32> to vector<16x32xf32>
    %12 = arith.addf %9, %11 : vector<16x32xf32>
    %c0_11 = arith.constant 0 : index
    %c0_12 = arith.constant 0 : index
    %13 = vector.load %arg4[%c0_11, %c0_12] : memref<32x32xbf16, #tpu.memory_space<vmem>>, vector<32x32xbf16>
    %cst_13 = arith.constant dense<0.000000e+00> : vector<16x32xf32>
    %14 = tpu.matmul %2, %13, %cst_13 {dimension_numbers = #tpu.dot_dimension_numbers<[1], [0], [0], [1], [0, 0, 1, 1], [], []>} : vector<16x32xbf16>, vector<32x32xbf16>, vector<16x32xf32> -> vector<16x32xf32>
    %c0_14 = arith.constant 0 : index
    %c0_15 = arith.constant 0 : index
    %15 = vector.load %arg7[%c0_14, %c0_15] : memref<1x32xf32, #tpu.memory_space<vmem>>, vector<1x32xf32>
    %16 = vector.broadcast %15 : vector<1x32xf32> to vector<16x32xf32>
    %17 = arith.addf %14, %16 : vector<16x32xf32>
    %18 = vector.extract_strided_slice %7 {offsets = [0, 0], sizes = [8, 32], strides = [1, 1]} : vector<16x32xf32> to vector<8x32xf32>
    %19 = arith.truncf %18 : vector<8x32xf32> to vector<8x32xbf16>
    %20 = vector.extract_strided_slice %12 {offsets = [0, 0], sizes = [8, 32], strides = [1, 1]} : vector<16x32xf32> to vector<8x32xf32>
    %21 = tpu.transpose %20, [1, 0] : vector<8x32xf32> -> vector<32x8xf32>
    %22 = arith.truncf %21 : vector<32x8xf32> to vector<32x8xbf16>
    %23 = vector.extract_strided_slice %17 {offsets = [0, 0], sizes = [8, 32], strides = [1, 1]} : vector<16x32xf32> to vector<8x32xf32>
    %24 = arith.truncf %23 : vector<8x32xf32> to vector<8x32xbf16>
    %cst_16 = arith.constant 0.000000e+00 : f32
    %25 = vector.broadcast %cst_16 : f32 to vector<8x32xf32>
    %26 = vector.extract_strided_slice %19 {offsets = [0, 0], sizes = [8, 8], strides = [1, 1]} : vector<8x32xbf16> to vector<8x8xbf16>
    %27 = vector.extract_strided_slice %22 {offsets = [0, 0], sizes = [8, 8], strides = [1, 1]} : vector<32x8xbf16> to vector<8x8xbf16>
    %cst_17 = arith.constant dense<0.000000e+00> : vector<8x8xf32>
    %28 = tpu.matmul %26, %27, %cst_17 {dimension_numbers = #tpu.dot_dimension_numbers<[1], [0], [0], [1], [0, 0, 1, 1], [], []>} : vector<8x8xbf16>, vector<8x8xbf16>, vector<8x8xf32> -> vector<8x8xf32>
    %cst_18 = arith.constant dense<0xFF800000> : vector<8xf32>
    %29 = vector.multi_reduction <maximumf>, %28, %cst_18 [1] : vector<8x8xf32> to vector<8xf32>
    %30 = vector.shape_cast %29 : vector<8xf32> to vector<8x1xf32>
    %31 = vector.broadcast %30 : vector<8x1xf32> to vector<8x8xf32>
    %32 = arith.subf %28, %31 : vector<8x8xf32>
    %33 = math.exp %32 : vector<8x8xf32>
    %cst_19 = arith.constant dense<0.000000e+00> : vector<8xf32>
    %34 = vector.multi_reduction <add>, %33, %cst_19 [1] : vector<8x8xf32> to vector<8xf32>
    %35 = vector.shape_cast %34 : vector<8xf32> to vector<8x1xf32>
    %36 = tpu.reciprocal %35 {approx = true} : vector<8x1xf32> -> vector<8x1xf32>
    %37 = vector.broadcast %36 : vector<8x1xf32> to vector<8x8xf32>
    %38 = arith.mulf %33, %37 : vector<8x8xf32>
    %39 = arith.truncf %38 : vector<8x8xf32> to vector<8x8xbf16>
    %40 = vector.extract_strided_slice %24 {offsets = [0, 0], sizes = [8, 8], strides = [1, 1]} : vector<8x32xbf16> to vector<8x8xbf16>
    %cst_20 = arith.constant dense<0.000000e+00> : vector<8x8xf32>
    %41 = tpu.matmul %39, %40, %cst_20 {dimension_numbers = #tpu.dot_dimension_numbers<[1], [0], [0], [1], [0, 0, 1, 1], [], []>} : vector<8x8xbf16>, vector<8x8xbf16>, vector<8x8xf32> -> vector<8x8xf32>
    %42 = arith.truncf %41 : vector<8x8xf32> to vector<8x8xbf16>
    %c0_21 = arith.constant 0 : index
    %c0_22 = arith.constant 0 : index
    %c0_23 = arith.constant 0 : index
    %43 = vector.load %arg8[%c0_21, %c0_22, %c0_23] : memref<4x8x32xbf16, #tpu.memory_space<vmem>>, vector<1x8x32xbf16>
    %44 = vector.shape_cast %43 : vector<1x8x32xbf16> to vector<8x32xbf16>
    %cst_24 = arith.constant dense<0.000000e+00> : vector<8x32xf32>
    %45 = tpu.matmul %42, %44, %cst_24 {dimension_numbers = #tpu.dot_dimension_numbers<[1], [0], [0], [1], [0, 0, 1, 1], [], []>} : vector<8x8xbf16>, vector<8x32xbf16>, vector<8x32xf32> -> vector<8x32xf32>
    %46 = arith.addf %25, %45 : vector<8x32xf32>
    %47 = vector.extract_strided_slice %19 {offsets = [0, 8], sizes = [8, 8], strides = [1, 1]} : vector<8x32xbf16> to vector<8x8xbf16>
    %48 = vector.extract_strided_slice %22 {offsets = [8, 0], sizes = [8, 8], strides = [1, 1]} : vector<32x8xbf16> to vector<8x8xbf16>
    %cst_25 = arith.constant dense<0.000000e+00> : vector<8x8xf32>
    %49 = tpu.matmul %47, %48, %cst_25 {dimension_numbers = #tpu.dot_dimension_numbers<[1], [0], [0], [1], [0, 0, 1, 1], [], []>} : vector<8x8xbf16>, vector<8x8xbf16>, vector<8x8xf32> -> vector<8x8xf32>
    %cst_26 = arith.constant dense<0xFF800000> : vector<8xf32>
    %50 = vector.multi_reduction <maximumf>, %49, %cst_26 [1] : vector<8x8xf32> to vector<8xf32>
    %51 = vector.shape_cast %50 : vector<8xf32> to vector<8x1xf32>
    %52 = vector.broadcast %51 : vector<8x1xf32> to vector<8x8xf32>
    %53 = arith.subf %49, %52 : vector<8x8xf32>
    %54 = math.exp %53 : vector<8x8xf32>
    %cst_27 = arith.constant dense<0.000000e+00> : vector<8xf32>
    %55 = vector.multi_reduction <add>, %54, %cst_27 [1] : vector<8x8xf32> to vector<8xf32>
    %56 = vector.shape_cast %55 : vector<8xf32> to vector<8x1xf32>
    %57 = tpu.reciprocal %56 {approx = true} : vector<8x1xf32> -> vector<8x1xf32>
    %58 = vector.broadcast %57 : vector<8x1xf32> to vector<8x8xf32>
    %59 = arith.mulf %54, %58 : vector<8x8xf32>
    %60 = arith.truncf %59 : vector<8x8xf32> to vector<8x8xbf16>
    %61 = vector.extract_strided_slice %24 {offsets = [0, 8], sizes = [8, 8], strides = [1, 1]} : vector<8x32xbf16> to vector<8x8xbf16>
    %cst_28 = arith.constant dense<0.000000e+00> : vector<8x8xf32>
    %62 = tpu.matmul %60, %61, %cst_28 {dimension_numbers = #tpu.dot_dimension_numbers<[1], [0], [0], [1], [0, 0, 1, 1], [], []>} : vector<8x8xbf16>, vector<8x8xbf16>, vector<8x8xf32> -> vector<8x8xf32>
    %63 = arith.truncf %62 : vector<8x8xf32> to vector<8x8xbf16>
    %c1 = arith.constant 1 : index
    %c0_29 = arith.constant 0 : index
    %c0_30 = arith.constant 0 : index
    %64 = vector.load %arg8[%c1, %c0_29, %c0_30] : memref<4x8x32xbf16, #tpu.memory_space<vmem>>, vector<1x8x32xbf16>
    %65 = vector.shape_cast %64 : vector<1x8x32xbf16> to vector<8x32xbf16>
    %cst_31 = arith.constant dense<0.000000e+00> : vector<8x32xf32>
    %66 = tpu.matmul %63, %65, %cst_31 {dimension_numbers = #tpu.dot_dimension_numbers<[1], [0], [0], [1], [0, 0, 1, 1], [], []>} : vector<8x8xbf16>, vector<8x32xbf16>, vector<8x32xf32> -> vector<8x32xf32>
    %67 = arith.addf %46, %66 : vector<8x32xf32>
    %68 = vector.extract_strided_slice %19 {offsets = [0, 16], sizes = [8, 8], strides = [1, 1]} : vector<8x32xbf16> to vector<8x8xbf16>
    %69 = vector.extract_strided_slice %22 {offsets = [16, 0], sizes = [8, 8], strides = [1, 1]} : vector<32x8xbf16> to vector<8x8xbf16>
    %cst_32 = arith.constant dense<0.000000e+00> : vector<8x8xf32>
    %70 = tpu.matmul %68, %69, %cst_32 {dimension_numbers = #tpu.dot_dimension_numbers<[1], [0], [0], [1], [0, 0, 1, 1], [], []>} : vector<8x8xbf16>, vector<8x8xbf16>, vector<8x8xf32> -> vector<8x8xf32>
    %cst_33 = arith.constant dense<0xFF800000> : vector<8xf32>
    %71 = vector.multi_reduction <maximumf>, %70, %cst_33 [1] : vector<8x8xf32> to vector<8xf32>
    %72 = vector.shape_cast %71 : vector<8xf32> to vector<8x1xf32>
    %73 = vector.broadcast %72 : vector<8x1xf32> to vector<8x8xf32>
    %74 = arith.subf %70, %73 : vector<8x8xf32>
    %75 = math.exp %74 : vector<8x8xf32>
    %cst_34 = arith.constant dense<0.000000e+00> : vector<8xf32>
    %76 = vector.multi_reduction <add>, %75, %cst_34 [1] : vector<8x8xf32> to vector<8xf32>
    %77 = vector.shape_cast %76 : vector<8xf32> to vector<8x1xf32>
    %78 = tpu.reciprocal %77 {approx = true} : vector<8x1xf32> -> vector<8x1xf32>
    %79 = vector.broadcast %78 : vector<8x1xf32> to vector<8x8xf32>
    %80 = arith.mulf %75, %79 : vector<8x8xf32>
    %81 = arith.truncf %80 : vector<8x8xf32> to vector<8x8xbf16>
    %82 = vector.extract_strided_slice %24 {offsets = [0, 16], sizes = [8, 8], strides = [1, 1]} : vector<8x32xbf16> to vector<8x8xbf16>
    %cst_35 = arith.constant dense<0.000000e+00> : vector<8x8xf32>
    %83 = tpu.matmul %81, %82, %cst_35 {dimension_numbers = #tpu.dot_dimension_numbers<[1], [0], [0], [1], [0, 0, 1, 1], [], []>} : vector<8x8xbf16>, vector<8x8xbf16>, vector<8x8xf32> -> vector<8x8xf32>
    %84 = arith.truncf %83 : vector<8x8xf32> to vector<8x8xbf16>
    %c2 = arith.constant 2 : index
    %c0_36 = arith.constant 0 : index
    %c0_37 = arith.constant 0 : index
    %85 = vector.load %arg8[%c2, %c0_36, %c0_37] : memref<4x8x32xbf16, #tpu.memory_space<vmem>>, vector<1x8x32xbf16>
    %86 = vector.shape_cast %85 : vector<1x8x32xbf16> to vector<8x32xbf16>
    %cst_38 = arith.constant dense<0.000000e+00> : vector<8x32xf32>
    %87 = tpu.matmul %84, %86, %cst_38 {dimension_numbers = #tpu.dot_dimension_numbers<[1], [0], [0], [1], [0, 0, 1, 1], [], []>} : vector<8x8xbf16>, vector<8x32xbf16>, vector<8x32xf32> -> vector<8x32xf32>
    %88 = arith.addf %67, %87 : vector<8x32xf32>
    %89 = vector.extract_strided_slice %19 {offsets = [0, 24], sizes = [8, 8], strides = [1, 1]} : vector<8x32xbf16> to vector<8x8xbf16>
    %90 = vector.extract_strided_slice %22 {offsets = [24, 0], sizes = [8, 8], strides = [1, 1]} : vector<32x8xbf16> to vector<8x8xbf16>
    %cst_39 = arith.constant dense<0.000000e+00> : vector<8x8xf32>
    %91 = tpu.matmul %89, %90, %cst_39 {dimension_numbers = #tpu.dot_dimension_numbers<[1], [0], [0], [1], [0, 0, 1, 1], [], []>} : vector<8x8xbf16>, vector<8x8xbf16>, vector<8x8xf32> -> vector<8x8xf32>
    %cst_40 = arith.constant dense<0xFF800000> : vector<8xf32>
    %92 = vector.multi_reduction <maximumf>, %91, %cst_40 [1] : vector<8x8xf32> to vector<8xf32>
    %93 = vector.shape_cast %92 : vector<8xf32> to vector<8x1xf32>
    %94 = vector.broadcast %93 : vector<8x1xf32> to vector<8x8xf32>
    %95 = arith.subf %91, %94 : vector<8x8xf32>
    %96 = math.exp %95 : vector<8x8xf32>
    %cst_41 = arith.constant dense<0.000000e+00> : vector<8xf32>
    %97 = vector.multi_reduction <add>, %96, %cst_41 [1] : vector<8x8xf32> to vector<8xf32>
    %98 = vector.shape_cast %97 : vector<8xf32> to vector<8x1xf32>
    %99 = tpu.reciprocal %98 {approx = true} : vector<8x1xf32> -> vector<8x1xf32>
    %100 = vector.broadcast %99 : vector<8x1xf32> to vector<8x8xf32>
    %101 = arith.mulf %96, %100 : vector<8x8xf32>
    %102 = arith.truncf %101 : vector<8x8xf32> to vector<8x8xbf16>
    %103 = vector.extract_strided_slice %24 {offsets = [0, 24], sizes = [8, 8], strides = [1, 1]} : vector<8x32xbf16> to vector<8x8xbf16>
    %cst_42 = arith.constant dense<0.000000e+00> : vector<8x8xf32>
    %104 = tpu.matmul %102, %103, %cst_42 {dimension_numbers = #tpu.dot_dimension_numbers<[1], [0], [0], [1], [0, 0, 1, 1], [], []>} : vector<8x8xbf16>, vector<8x8xbf16>, vector<8x8xf32> -> vector<8x8xf32>
    %105 = arith.truncf %104 : vector<8x8xf32> to vector<8x8xbf16>
    %c3 = arith.constant 3 : index
    %c0_43 = arith.constant 0 : index
    %c0_44 = arith.constant 0 : index
    %106 = vector.load %arg8[%c3, %c0_43, %c0_44] : memref<4x8x32xbf16, #tpu.memory_space<vmem>>, vector<1x8x32xbf16>
    %107 = vector.shape_cast %106 : vector<1x8x32xbf16> to vector<8x32xbf16>
    %cst_45 = arith.constant dense<0.000000e+00> : vector<8x32xf32>
    %108 = tpu.matmul %105, %107, %cst_45 {dimension_numbers = #tpu.dot_dimension_numbers<[1], [0], [0], [1], [0, 0, 1, 1], [], []>} : vector<8x8xbf16>, vector<8x32xbf16>, vector<8x32xf32> -> vector<8x32xf32>
    %109 = arith.addf %88, %108 : vector<8x32xf32>
    %110 = vector.extract_strided_slice %7 {offsets = [8, 0], sizes = [8, 32], strides = [1, 1]} : vector<16x32xf32> to vector<8x32xf32>
    %111 = arith.truncf %110 : vector<8x32xf32> to vector<8x32xbf16>
    %112 = vector.extract_strided_slice %12 {offsets = [8, 0], sizes = [8, 32], strides = [1, 1]} : vector<16x32xf32> to vector<8x32xf32>
    %113 = tpu.transpose %112, [1, 0] : vector<8x32xf32> -> vector<32x8xf32>
    %114 = arith.truncf %113 : vector<32x8xf32> to vector<32x8xbf16>
    %115 = vector.extract_strided_slice %17 {offsets = [8, 0], sizes = [8, 32], strides = [1, 1]} : vector<16x32xf32> to vector<8x32xf32>
    %116 = arith.truncf %115 : vector<8x32xf32> to vector<8x32xbf16>
    %cst_46 = arith.constant 0.000000e+00 : f32
    %117 = vector.broadcast %cst_46 : f32 to vector<8x32xf32>
    %118 = vector.extract_strided_slice %111 {offsets = [0, 0], sizes = [8, 8], strides = [1, 1]} : vector<8x32xbf16> to vector<8x8xbf16>
    %119 = vector.extract_strided_slice %114 {offsets = [0, 0], sizes = [8, 8], strides = [1, 1]} : vector<32x8xbf16> to vector<8x8xbf16>
    %cst_47 = arith.constant dense<0.000000e+00> : vector<8x8xf32>
    %120 = tpu.matmul %118, %119, %cst_47 {dimension_numbers = #tpu.dot_dimension_numbers<[1], [0], [0], [1], [0, 0, 1, 1], [], []>} : vector<8x8xbf16>, vector<8x8xbf16>, vector<8x8xf32> -> vector<8x8xf32>
    %cst_48 = arith.constant dense<0xFF800000> : vector<8xf32>
    %121 = vector.multi_reduction <maximumf>, %120, %cst_48 [1] : vector<8x8xf32> to vector<8xf32>
    %122 = vector.shape_cast %121 : vector<8xf32> to vector<8x1xf32>
    %123 = vector.broadcast %122 : vector<8x1xf32> to vector<8x8xf32>
    %124 = arith.subf %120, %123 : vector<8x8xf32>
    %125 = math.exp %124 : vector<8x8xf32>
    %cst_49 = arith.constant dense<0.000000e+00> : vector<8xf32>
    %126 = vector.multi_reduction <add>, %125, %cst_49 [1] : vector<8x8xf32> to vector<8xf32>
    %127 = vector.shape_cast %126 : vector<8xf32> to vector<8x1xf32>
    %128 = tpu.reciprocal %127 {approx = true} : vector<8x1xf32> -> vector<8x1xf32>
    %129 = vector.broadcast %128 : vector<8x1xf32> to vector<8x8xf32>
    %130 = arith.mulf %125, %129 : vector<8x8xf32>
    %131 = arith.truncf %130 : vector<8x8xf32> to vector<8x8xbf16>
    %132 = vector.extract_strided_slice %116 {offsets = [0, 0], sizes = [8, 8], strides = [1, 1]} : vector<8x32xbf16> to vector<8x8xbf16>
    %cst_50 = arith.constant dense<0.000000e+00> : vector<8x8xf32>
    %133 = tpu.matmul %131, %132, %cst_50 {dimension_numbers = #tpu.dot_dimension_numbers<[1], [0], [0], [1], [0, 0, 1, 1], [], []>} : vector<8x8xbf16>, vector<8x8xbf16>, vector<8x8xf32> -> vector<8x8xf32>
    %134 = arith.truncf %133 : vector<8x8xf32> to vector<8x8xbf16>
    %c0_51 = arith.constant 0 : index
    %c0_52 = arith.constant 0 : index
    %c0_53 = arith.constant 0 : index
    %135 = vector.load %arg8[%c0_51, %c0_52, %c0_53] : memref<4x8x32xbf16, #tpu.memory_space<vmem>>, vector<1x8x32xbf16>
    %136 = vector.shape_cast %135 : vector<1x8x32xbf16> to vector<8x32xbf16>
    %cst_54 = arith.constant dense<0.000000e+00> : vector<8x32xf32>
    %137 = tpu.matmul %134, %136, %cst_54 {dimension_numbers = #tpu.dot_dimension_numbers<[1], [0], [0], [1], [0, 0, 1, 1], [], []>} : vector<8x8xbf16>, vector<8x32xbf16>, vector<8x32xf32> -> vector<8x32xf32>
    %138 = arith.addf %117, %137 : vector<8x32xf32>
    %139 = vector.extract_strided_slice %111 {offsets = [0, 8], sizes = [8, 8], strides = [1, 1]} : vector<8x32xbf16> to vector<8x8xbf16>
    %140 = vector.extract_strided_slice %114 {offsets = [8, 0], sizes = [8, 8], strides = [1, 1]} : vector<32x8xbf16> to vector<8x8xbf16>
    %cst_55 = arith.constant dense<0.000000e+00> : vector<8x8xf32>
    %141 = tpu.matmul %139, %140, %cst_55 {dimension_numbers = #tpu.dot_dimension_numbers<[1], [0], [0], [1], [0, 0, 1, 1], [], []>} : vector<8x8xbf16>, vector<8x8xbf16>, vector<8x8xf32> -> vector<8x8xf32>
    %cst_56 = arith.constant dense<0xFF800000> : vector<8xf32>
    %142 = vector.multi_reduction <maximumf>, %141, %cst_56 [1] : vector<8x8xf32> to vector<8xf32>
    %143 = vector.shape_cast %142 : vector<8xf32> to vector<8x1xf32>
    %144 = vector.broadcast %143 : vector<8x1xf32> to vector<8x8xf32>
    %145 = arith.subf %141, %144 : vector<8x8xf32>
    %146 = math.exp %145 : vector<8x8xf32>
    %cst_57 = arith.constant dense<0.000000e+00> : vector<8xf32>
    %147 = vector.multi_reduction <add>, %146, %cst_57 [1] : vector<8x8xf32> to vector<8xf32>
    %148 = vector.shape_cast %147 : vector<8xf32> to vector<8x1xf32>
    %149 = tpu.reciprocal %148 {approx = true} : vector<8x1xf32> -> vector<8x1xf32>
    %150 = vector.broadcast %149 : vector<8x1xf32> to vector<8x8xf32>
    %151 = arith.mulf %146, %150 : vector<8x8xf32>
    %152 = arith.truncf %151 : vector<8x8xf32> to vector<8x8xbf16>
    %153 = vector.extract_strided_slice %116 {offsets = [0, 8], sizes = [8, 8], strides = [1, 1]} : vector<8x32xbf16> to vector<8x8xbf16>
    %cst_58 = arith.constant dense<0.000000e+00> : vector<8x8xf32>
    %154 = tpu.matmul %152, %153, %cst_58 {dimension_numbers = #tpu.dot_dimension_numbers<[1], [0], [0], [1], [0, 0, 1, 1], [], []>} : vector<8x8xbf16>, vector<8x8xbf16>, vector<8x8xf32> -> vector<8x8xf32>
    %155 = arith.truncf %154 : vector<8x8xf32> to vector<8x8xbf16>
    %c1_59 = arith.constant 1 : index
    %c0_60 = arith.constant 0 : index
    %c0_61 = arith.constant 0 : index
    %156 = vector.load %arg8[%c1_59, %c0_60, %c0_61] : memref<4x8x32xbf16, #tpu.memory_space<vmem>>, vector<1x8x32xbf16>
    %157 = vector.shape_cast %156 : vector<1x8x32xbf16> to vector<8x32xbf16>
    %cst_62 = arith.constant dense<0.000000e+00> : vector<8x32xf32>
    %158 = tpu.matmul %155, %157, %cst_62 {dimension_numbers = #tpu.dot_dimension_numbers<[1], [0], [0], [1], [0, 0, 1, 1], [], []>} : vector<8x8xbf16>, vector<8x32xbf16>, vector<8x32xf32> -> vector<8x32xf32>
    %159 = arith.addf %138, %158 : vector<8x32xf32>
    %160 = vector.extract_strided_slice %111 {offsets = [0, 16], sizes = [8, 8], strides = [1, 1]} : vector<8x32xbf16> to vector<8x8xbf16>
    %161 = vector.extract_strided_slice %114 {offsets = [16, 0], sizes = [8, 8], strides = [1, 1]} : vector<32x8xbf16> to vector<8x8xbf16>
    %cst_63 = arith.constant dense<0.000000e+00> : vector<8x8xf32>
    %162 = tpu.matmul %160, %161, %cst_63 {dimension_numbers = #tpu.dot_dimension_numbers<[1], [0], [0], [1], [0, 0, 1, 1], [], []>} : vector<8x8xbf16>, vector<8x8xbf16>, vector<8x8xf32> -> vector<8x8xf32>
    %cst_64 = arith.constant dense<0xFF800000> : vector<8xf32>
    %163 = vector.multi_reduction <maximumf>, %162, %cst_64 [1] : vector<8x8xf32> to vector<8xf32>
    %164 = vector.shape_cast %163 : vector<8xf32> to vector<8x1xf32>
    %165 = vector.broadcast %164 : vector<8x1xf32> to vector<8x8xf32>
    %166 = arith.subf %162, %165 : vector<8x8xf32>
    %167 = math.exp %166 : vector<8x8xf32>
    %cst_65 = arith.constant dense<0.000000e+00> : vector<8xf32>
    %168 = vector.multi_reduction <add>, %167, %cst_65 [1] : vector<8x8xf32> to vector<8xf32>
    %169 = vector.shape_cast %168 : vector<8xf32> to vector<8x1xf32>
    %170 = tpu.reciprocal %169 {approx = true} : vector<8x1xf32> -> vector<8x1xf32>
    %171 = vector.broadcast %170 : vector<8x1xf32> to vector<8x8xf32>
    %172 = arith.mulf %167, %171 : vector<8x8xf32>
    %173 = arith.truncf %172 : vector<8x8xf32> to vector<8x8xbf16>
    %174 = vector.extract_strided_slice %116 {offsets = [0, 16], sizes = [8, 8], strides = [1, 1]} : vector<8x32xbf16> to vector<8x8xbf16>
    %cst_66 = arith.constant dense<0.000000e+00> : vector<8x8xf32>
    %175 = tpu.matmul %173, %174, %cst_66 {dimension_numbers = #tpu.dot_dimension_numbers<[1], [0], [0], [1], [0, 0, 1, 1], [], []>} : vector<8x8xbf16>, vector<8x8xbf16>, vector<8x8xf32> -> vector<8x8xf32>
    %176 = arith.truncf %175 : vector<8x8xf32> to vector<8x8xbf16>
    %c2_67 = arith.constant 2 : index
    %c0_68 = arith.constant 0 : index
    %c0_69 = arith.constant 0 : index
    %177 = vector.load %arg8[%c2_67, %c0_68, %c0_69] : memref<4x8x32xbf16, #tpu.memory_space<vmem>>, vector<1x8x32xbf16>
    %178 = vector.shape_cast %177 : vector<1x8x32xbf16> to vector<8x32xbf16>
    %cst_70 = arith.constant dense<0.000000e+00> : vector<8x32xf32>
    %179 = tpu.matmul %176, %178, %cst_70 {dimension_numbers = #tpu.dot_dimension_numbers<[1], [0], [0], [1], [0, 0, 1, 1], [], []>} : vector<8x8xbf16>, vector<8x32xbf16>, vector<8x32xf32> -> vector<8x32xf32>
    %180 = arith.addf %159, %179 : vector<8x32xf32>
    %181 = vector.extract_strided_slice %111 {offsets = [0, 24], sizes = [8, 8], strides = [1, 1]} : vector<8x32xbf16> to vector<8x8xbf16>
    %182 = vector.extract_strided_slice %114 {offsets = [24, 0], sizes = [8, 8], strides = [1, 1]} : vector<32x8xbf16> to vector<8x8xbf16>
    %cst_71 = arith.constant dense<0.000000e+00> : vector<8x8xf32>
    %183 = tpu.matmul %181, %182, %cst_71 {dimension_numbers = #tpu.dot_dimension_numbers<[1], [0], [0], [1], [0, 0, 1, 1], [], []>} : vector<8x8xbf16>, vector<8x8xbf16>, vector<8x8xf32> -> vector<8x8xf32>
    %cst_72 = arith.constant dense<0xFF800000> : vector<8xf32>
    %184 = vector.multi_reduction <maximumf>, %183, %cst_72 [1] : vector<8x8xf32> to vector<8xf32>
    %185 = vector.shape_cast %184 : vector<8xf32> to vector<8x1xf32>
    %186 = vector.broadcast %185 : vector<8x1xf32> to vector<8x8xf32>
    %187 = arith.subf %183, %186 : vector<8x8xf32>
    %188 = math.exp %187 : vector<8x8xf32>
    %cst_73 = arith.constant dense<0.000000e+00> : vector<8xf32>
    %189 = vector.multi_reduction <add>, %188, %cst_73 [1] : vector<8x8xf32> to vector<8xf32>
    %190 = vector.shape_cast %189 : vector<8xf32> to vector<8x1xf32>
    %191 = tpu.reciprocal %190 {approx = true} : vector<8x1xf32> -> vector<8x1xf32>
    %192 = vector.broadcast %191 : vector<8x1xf32> to vector<8x8xf32>
    %193 = arith.mulf %188, %192 : vector<8x8xf32>
    %194 = arith.truncf %193 : vector<8x8xf32> to vector<8x8xbf16>
    %195 = vector.extract_strided_slice %116 {offsets = [0, 24], sizes = [8, 8], strides = [1, 1]} : vector<8x32xbf16> to vector<8x8xbf16>
    %cst_74 = arith.constant dense<0.000000e+00> : vector<8x8xf32>
    %196 = tpu.matmul %194, %195, %cst_74 {dimension_numbers = #tpu.dot_dimension_numbers<[1], [0], [0], [1], [0, 0, 1, 1], [], []>} : vector<8x8xbf16>, vector<8x8xbf16>, vector<8x8xf32> -> vector<8x8xf32>
    %197 = arith.truncf %196 : vector<8x8xf32> to vector<8x8xbf16>
    %c3_75 = arith.constant 3 : index
    %c0_76 = arith.constant 0 : index
    %c0_77 = arith.constant 0 : index
    %198 = vector.load %arg8[%c3_75, %c0_76, %c0_77] : memref<4x8x32xbf16, #tpu.memory_space<vmem>>, vector<1x8x32xbf16>
    %199 = vector.shape_cast %198 : vector<1x8x32xbf16> to vector<8x32xbf16>
    %cst_78 = arith.constant dense<0.000000e+00> : vector<8x32xf32>
    %200 = tpu.matmul %197, %199, %cst_78 {dimension_numbers = #tpu.dot_dimension_numbers<[1], [0], [0], [1], [0, 0, 1, 1], [], []>} : vector<8x8xbf16>, vector<8x32xbf16>, vector<8x32xf32> -> vector<8x32xf32>
    %201 = arith.addf %180, %200 : vector<8x32xf32>
    %202 = tpu.concatenate %109, %201 in 0 : vector<8x32xf32>, vector<8x32xf32> -> vector<16x32xf32>
    %203 = arith.addf %1, %202 : vector<16x32xf32>
    %c0_79 = arith.constant 0 : index
    %c0_80 = arith.constant 0 : index
    %204 = vector.load %arg9[%c0_79, %c0_80] : memref<1x32xf32, #tpu.memory_space<vmem>>, vector<1x32xf32>
    %205 = vector.broadcast %204 : vector<1x32xf32> to vector<16x32xf32>
    %206 = arith.addf %203, %205 : vector<16x32xf32>
    %207 = vector.shape_cast %206 : vector<16x32xf32> to vector<2x8x32xf32>
    %c0_81 = arith.constant 0 : index
    %c0_82 = arith.constant 0 : index
    %208 = vector.load %arg14[%c0_81, %c0_82] : memref<8x32xbf16, #tpu.memory_space<vmem>>, vector<8x32xbf16>
    %209 = arith.extf %208 : vector<8x32xbf16> to vector<8x32xf32>
    %c0_83 = arith.constant 0 : index
    %c0_84 = arith.constant 0 : index
    %210 = vector.load %arg15[%c0_83, %c0_84] : memref<8x32xbf16, #tpu.memory_space<vmem>>, vector<8x32xbf16>
    %211 = arith.extf %210 : vector<8x32xbf16> to vector<8x32xf32>
    %cst_85 = arith.constant dense<0.000000e+00> : vector<2x8xf32>
    %212 = vector.multi_reduction <add>, %207, %cst_85 [2] : vector<2x8x32xf32> to vector<2x8xf32>
    %213 = vector.shape_cast %212 : vector<2x8xf32> to vector<2x8x1xf32>
    %cst_86 = arith.constant 3.200000e+01 : f32
    %214 = vector.broadcast %cst_86 : f32 to vector<2x8x1xf32>
    %215 = arith.divf %213, %214 : vector<2x8x1xf32>
    %cst_87 = arith.constant dense<0.000000e+00> : vector<2x1xf32>
    %216 = vector.multi_reduction <add>, %215, %cst_87 [1] : vector<2x8x1xf32> to vector<2x1xf32>
    %217 = vector.shape_cast %216 : vector<2x1xf32> to vector<2x1x1xf32>
    %cst_88 = arith.constant 8.000000e+00 : f32
    %218 = vector.broadcast %cst_88 : f32 to vector<2x1x1xf32>
    %219 = arith.divf %217, %218 : vector<2x1x1xf32>
    %220 = vector.broadcast %219 : vector<2x1x1xf32> to vector<2x8x32xf32>
    %221 = arith.subf %207, %220 : vector<2x8x32xf32>
    %222 = arith.mulf %221, %221 : vector<2x8x32xf32>
    %cst_89 = arith.constant dense<0.000000e+00> : vector<2x8xf32>
    %223 = vector.multi_reduction <add>, %222, %cst_89 [2] : vector<2x8x32xf32> to vector<2x8xf32>
    %224 = vector.shape_cast %223 : vector<2x8xf32> to vector<2x8x1xf32>
    %cst_90 = arith.constant 3.200000e+01 : f32
    %225 = vector.broadcast %cst_90 : f32 to vector<2x8x1xf32>
    %226 = arith.divf %224, %225 : vector<2x8x1xf32>
    %cst_91 = arith.constant dense<0.000000e+00> : vector<2x1xf32>
    %227 = vector.multi_reduction <add>, %226, %cst_91 [1] : vector<2x8x1xf32> to vector<2x1xf32>
    %228 = vector.shape_cast %227 : vector<2x1xf32> to vector<2x1x1xf32>
    %cst_92 = arith.constant 8.000000e+00 : f32
    %229 = vector.broadcast %cst_92 : f32 to vector<2x1x1xf32>
    %230 = arith.divf %228, %229 : vector<2x1x1xf32>
    %cst_93 = arith.constant 9.99999974E-6 : f32
    %231 = vector.broadcast %cst_93 : f32 to vector<2x1x1xf32>
    %232 = arith.addf %230, %231 : vector<2x1x1xf32>
    %233 = math.rsqrt %232 : vector<2x1x1xf32>
    %234 = vector.broadcast %233 : vector<2x1x1xf32> to vector<2x8x32xf32>
    %235 = arith.mulf %221, %234 : vector<2x8x32xf32>
    %236 = vector.shape_cast %209 : vector<8x32xf32> to vector<1x8x32xf32>
    %237 = vector.broadcast %236 : vector<1x8x32xf32> to vector<2x8x32xf32>
    %238 = arith.mulf %235, %237 : vector<2x8x32xf32>
    %239 = vector.shape_cast %211 : vector<8x32xf32> to vector<1x8x32xf32>
    %240 = vector.broadcast %239 : vector<1x8x32xf32> to vector<2x8x32xf32>
    %241 = arith.addf %238, %240 : vector<2x8x32xf32>
    %242 = vector.shape_cast %241 : vector<2x8x32xf32> to vector<16x32xf32>
    %243 = arith.truncf %242 : vector<16x32xf32> to vector<16x32xbf16>
    %cst_94 = arith.constant 0.000000e+00 : f32
    %244 = vector.broadcast %cst_94 : f32 to vector<16x32xf32>
    %c0_95 = arith.constant 0 : index
    %c0_96 = arith.constant 0 : index
    %245 = vector.load %arg10[%c0_95, %c0_96] : memref<32x128xbf16, #tpu.memory_space<vmem>>, vector<32x128xbf16>
    %cst_97 = arith.constant dense<0.000000e+00> : vector<16x128xf32>
    %246 = tpu.matmul %243, %245, %cst_97 {dimension_numbers = #tpu.dot_dimension_numbers<[1], [0], [0], [1], [0, 0, 1, 1], [], []>} : vector<16x32xbf16>, vector<32x128xbf16>, vector<16x128xf32> -> vector<16x128xf32>
    %c0_98 = arith.constant 0 : index
    %c0_99 = arith.constant 0 : index
    %247 = vector.load %arg11[%c0_98, %c0_99] : memref<1x128xf32, #tpu.memory_space<vmem>>, vector<1x128xf32>
    %248 = vector.broadcast %247 : vector<1x128xf32> to vector<16x128xf32>
    %249 = arith.addf %246, %248 : vector<16x128xf32>
    %cst_100 = arith.constant 0.000000e+00 : f32
    %250 = vector.broadcast %cst_100 : f32 to vector<16x128xf32>
    %251 = arith.maximumf %249, %250 : vector<16x128xf32>
    %252 = arith.truncf %251 : vector<16x128xf32> to vector<16x128xbf16>
    %c0_101 = arith.constant 0 : index
    %c0_102 = arith.constant 0 : index
    %253 = vector.load %arg12[%c0_101, %c0_102] : memref<128x32xbf16, #tpu.memory_space<vmem>>, vector<128x32xbf16>
    %cst_103 = arith.constant dense<0.000000e+00> : vector<16x32xf32>
    %254 = tpu.matmul %252, %253, %cst_103 {dimension_numbers = #tpu.dot_dimension_numbers<[1], [0], [0], [1], [0, 0, 1, 1], [], []>} : vector<16x128xbf16>, vector<128x32xbf16>, vector<16x32xf32> -> vector<16x32xf32>
    %255 = arith.addf %244, %254 : vector<16x32xf32>
    %c0_104 = arith.constant 0 : index
    %c0_105 = arith.constant 0 : index
    %256 = vector.load %arg13[%c0_104, %c0_105] : memref<1x32xf32, #tpu.memory_space<vmem>>, vector<1x32xf32>
    %257 = vector.broadcast %256 : vector<1x32xf32> to vector<16x32xf32>
    %258 = arith.addf %255, %257 : vector<16x32xf32>
    %259 = vector.shape_cast %258 : vector<16x32xf32> to vector<2x8x32xf32>
    %260 = arith.addf %241, %259 : vector<2x8x32xf32>
    %c0_106 = arith.constant 0 : index
    %c0_107 = arith.constant 0 : index
    %261 = vector.load %arg16[%c0_106, %c0_107] : memref<8x32xbf16, #tpu.memory_space<vmem>>, vector<8x32xbf16>
    %262 = arith.extf %261 : vector<8x32xbf16> to vector<8x32xf32>
    %c0_108 = arith.constant 0 : index
    %c0_109 = arith.constant 0 : index
    %263 = vector.load %arg17[%c0_108, %c0_109] : memref<8x32xbf16, #tpu.memory_space<vmem>>, vector<8x32xbf16>
    %264 = arith.extf %263 : vector<8x32xbf16> to vector<8x32xf32>
    %cst_110 = arith.constant dense<0.000000e+00> : vector<2x8xf32>
    %265 = vector.multi_reduction <add>, %260, %cst_110 [2] : vector<2x8x32xf32> to vector<2x8xf32>
    %266 = vector.shape_cast %265 : vector<2x8xf32> to vector<2x8x1xf32>
    %cst_111 = arith.constant 3.200000e+01 : f32
    %267 = vector.broadcast %cst_111 : f32 to vector<2x8x1xf32>
    %268 = arith.divf %266, %267 : vector<2x8x1xf32>
    %cst_112 = arith.constant dense<0.000000e+00> : vector<2x1xf32>
    %269 = vector.multi_reduction <add>, %268, %cst_112 [1] : vector<2x8x1xf32> to vector<2x1xf32>
    %270 = vector.shape_cast %269 : vector<2x1xf32> to vector<2x1x1xf32>
    %cst_113 = arith.constant 8.000000e+00 : f32
    %271 = vector.broadcast %cst_113 : f32 to vector<2x1x1xf32>
    %272 = arith.divf %270, %271 : vector<2x1x1xf32>
    %273 = vector.broadcast %272 : vector<2x1x1xf32> to vector<2x8x32xf32>
    %274 = arith.subf %260, %273 : vector<2x8x32xf32>
    %275 = arith.mulf %274, %274 : vector<2x8x32xf32>
    %cst_114 = arith.constant dense<0.000000e+00> : vector<2x8xf32>
    %276 = vector.multi_reduction <add>, %275, %cst_114 [2] : vector<2x8x32xf32> to vector<2x8xf32>
    %277 = vector.shape_cast %276 : vector<2x8xf32> to vector<2x8x1xf32>
    %cst_115 = arith.constant 3.200000e+01 : f32
    %278 = vector.broadcast %cst_115 : f32 to vector<2x8x1xf32>
    %279 = arith.divf %277, %278 : vector<2x8x1xf32>
    %cst_116 = arith.constant dense<0.000000e+00> : vector<2x1xf32>
    %280 = vector.multi_reduction <add>, %279, %cst_116 [1] : vector<2x8x1xf32> to vector<2x1xf32>
    %281 = vector.shape_cast %280 : vector<2x1xf32> to vector<2x1x1xf32>
    %cst_117 = arith.constant 8.000000e+00 : f32
    %282 = vector.broadcast %cst_117 : f32 to vector<2x1x1xf32>
    %283 = arith.divf %281, %282 : vector<2x1x1xf32>
    %cst_118 = arith.constant 9.99999974E-6 : f32
    %284 = vector.broadcast %cst_118 : f32 to vector<2x1x1xf32>
    %285 = arith.addf %283, %284 : vector<2x1x1xf32>
    %286 = math.rsqrt %285 : vector<2x1x1xf32>
    %287 = vector.broadcast %286 : vector<2x1x1xf32> to vector<2x8x32xf32>
    %288 = arith.mulf %274, %287 : vector<2x8x32xf32>
    %289 = vector.shape_cast %262 : vector<8x32xf32> to vector<1x8x32xf32>
    %290 = vector.broadcast %289 : vector<1x8x32xf32> to vector<2x8x32xf32>
    %291 = arith.mulf %288, %290 : vector<2x8x32xf32>
    %292 = vector.shape_cast %264 : vector<8x32xf32> to vector<1x8x32xf32>
    %293 = vector.broadcast %292 : vector<1x8x32xf32> to vector<2x8x32xf32>
    %294 = arith.addf %291, %293 : vector<2x8x32xf32>
    %c0_119 = arith.constant 0 : index
    %c0_120 = arith.constant 0 : index
    %c0_121 = arith.constant 0 : index
    %295 = vector.load %arg18[%c0_119, %c0_120, %c0_121] : memref<2x8x32xf32, #tpu.memory_space<vmem>>, vector<2x8x32xf32>
    tpu.vector_store %arg18[%c0_119, %c0_120, %c0_121], %294 {strides = array<i32>} : memref<2x8x32xf32, #tpu.memory_space<vmem>>, vector<2x8x32xf32>,
    return
  }
  func.func @transform_0(%arg0: i32) -> (i32, i32, i32) {
    %c0_i32 = arith.constant 0 : i32
    %c0_i32_0 = arith.constant 0 : i32
    %c0_i32_1 = arith.constant 0 : i32
    return %arg0, %c0_i32, %c0_i32_0 : i32, i32, i32
  }
  func.func @transform_1(%arg0: i32) -> (i32, i32) {
    %c0_i32 = arith.constant 0 : i32
    %c0_i32_0 = arith.constant 0 : i32
    %c0_i32_1 = arith.constant 0 : i32
    return %c0_i32, %c0_i32_0 : i32, i32
  }
  func.func @transform_2(%arg0: i32) -> (i32, i32) {
    %c0_i32 = arith.constant 0 : i32
    %c0_i32_0 = arith.constant 0 : i32
    %c0_i32_1 = arith.constant 0 : i32
    return %c0_i32, %c0_i32_0 : i32, i32
  }
  func.func @transform_3(%arg0: i32) -> (i32, i32) {
    %c0_i32 = arith.constant 0 : i32
    %c0_i32_0 = arith.constant 0 : i32
    %c0_i32_1 = arith.constant 0 : i32
    return %c0_i32, %c0_i32_0 : i32, i32
  }
  func.func @transform_4(%arg0: i32) -> (i32, i32) {
    %c0_i32 = arith.constant 0 : i32
    %c0_i32_0 = arith.constant 0 : i32
    %c0_i32_1 = arith.constant 0 : i32
    return %c0_i32, %c0_i32_0 : i32, i32
  }
  func.func @transform_5(%arg0: i32) -> (i32, i32) {
    %c0_i32 = arith.constant 0 : i32
    %c0_i32_0 = arith.constant 0 : i32
    %c0_i32_1 = arith.constant 0 : i32
    return %c0_i32, %c0_i32_0 : i32, i32
  }
  func.func @transform_6(%arg0: i32) -> (i32, i32) {
    %c0_i32 = arith.constant 0 : i32
    %c0_i32_0 = arith.constant 0 : i32
    %c0_i32_1 = arith.constant 0 : i32
    return %c0_i32, %c0_i32_0 : i32, i32
  }
  func.func @transform_7(%arg0: i32) -> (i32, i32, i32) {
    %c0_i32 = arith.constant 0 : i32
    %c0_i32_0 = arith.constant 0 : i32
    %c0_i32_1 = arith.constant 0 : i32
    %c0_i32_2 = arith.constant 0 : i32
    return %c0_i32, %c0_i32_0, %c0_i32_1 : i32, i32, i32
  }
  func.func @transform_8(%arg0: i32) -> (i32, i32) {
    %c0_i32 = arith.constant 0 : i32
    %c0_i32_0 = arith.constant 0 : i32
    %c0_i32_1 = arith.constant 0 : i32
    return %c0_i32, %c0_i32_0 : i32, i32
  }
  func.func @transform_9(%arg0: i32) -> (i32, i32) {
    %c0_i32 = arith.constant 0 : i32
    %c0_i32_0 = arith.constant 0 : i32
    %c0_i32_1 = arith.constant 0 : i32
    return %c0_i32, %c0_i32_0 : i32, i32
  }
  func.func @transform_10(%arg0: i32) -> (i32, i32) {
    %c0_i32 = arith.constant 0 : i32
    %c0_i32_0 = arith.constant 0 : i32
    %c0_i32_1 = arith.constant 0 : i32
    return %c0_i32, %c0_i32_0 : i32, i32
  }
  func.func @transform_11(%arg0: i32) -> (i32, i32) {
    %c0_i32 = arith.constant 0 : i32
    %c0_i32_0 = arith.constant 0 : i32
    %c0_i32_1 = arith.constant 0 : i32
    return %c0_i32, %c0_i32_0 : i32, i32
  }
  func.func @transform_12(%arg0: i32) -> (i32, i32) {
    %c0_i32 = arith.constant 0 : i32
    %c0_i32_0 = arith.constant 0 : i32
    %c0_i32_1 = arith.constant 0 : i32
    return %c0_i32, %c0_i32_0 : i32, i32
  }
  func.func @transform_13(%arg0: i32) -> (i32, i32) {
    %c0_i32 = arith.constant 0 : i32
    %c0_i32_0 = arith.constant 0 : i32
    %c0_i32_1 = arith.constant 0 : i32
    return %c0_i32, %c0_i32_0 : i32, i32
  }
  func.func @transform_14(%arg0: i32) -> (i32, i32) {
    %c0_i32 = arith.constant 0 : i32
    %c0_i32_0 = arith.constant 0 : i32
    %c0_i32_1 = arith.constant 0 : i32
    return %c0_i32, %c0_i32_0 : i32, i32
  }
  func.func @transform_15(%arg0: i32) -> (i32, i32) {
    %c0_i32 = arith.constant 0 : i32
    %c0_i32_0 = arith.constant 0 : i32
    %c0_i32_1 = arith.constant 0 : i32
    return %c0_i32, %c0_i32_0 : i32, i32
  }
  func.func @transform_16(%arg0: i32) -> (i32, i32) {
    %c0_i32 = arith.constant 0 : i32
    %c0_i32_0 = arith.constant 0 : i32
    %c0_i32_1 = arith.constant 0 : i32
    return %c0_i32, %c0_i32_0 : i32, i32
  }
  func.func @transform_17(%arg0: i32) -> (i32, i32, i32) {
    %c0_i32 = arith.constant 0 : i32
    %c0_i32_0 = arith.constant 0 : i32
    %c0_i32_1 = arith.constant 0 : i32
    return %arg0, %c0_i32, %c0_i32_0 : i32, i32, i32
  }
}

module attributes {stable_mosaic.version = 11 : i64} {
  func.func @_attention_block_kernel(%arg0: i32, %arg1: memref<2x8x32xf32, #tpu.memory_space<vmem>>, %arg2: memref<32x32xbf16, #tpu.memory_space<vmem>>, %arg3: memref<32x32xbf16, #tpu.memory_space<vmem>>, %arg4: memref<32x32xbf16, #tpu.memory_space<vmem>>, %arg5: memref<1x32xf32, #tpu.memory_space<vmem>>, %arg6: memref<1x32xf32, #tpu.memory_space<vmem>>, %arg7: memref<1x32xf32, #tpu.memory_space<vmem>>, %arg8: memref<4x8x32xbf16, #tpu.memory_space<vmem>>, %arg9: memref<1x32xf32, #tpu.memory_space<vmem>>, %arg10: memref<32x128xbf16, #tpu.memory_space<vmem>>, %arg11: memref<1x128xf32, #tpu.memory_space<vmem>>, %arg12: memref<128x32xbf16, #tpu.memory_space<vmem>>, %arg13: memref<1x32xf32, #tpu.memory_space<vmem>>, %arg14: memref<8x32xbf16, #tpu.memory_space<vmem>>, %arg15: memref<8x32xbf16, #tpu.memory_space<vmem>>, %arg16: memref<8x32xbf16, #tpu.memory_space<vmem>>, %arg17: memref<8x32xbf16, #tpu.memory_space<vmem>>, %arg18: memref<2x8x32xf32, #tpu.memory_space<vmem>>) attributes {dimension_semantics = [#tpu.dimension_semantics<parallel>], iteration_bounds = array<i64: 1>, scalar_prefetch = 0 : i64, scratch_operands = 0 : i64, tpu.core_type = #tpu.core_type<tc>, window_params = [{transform_indices = @transform_0, window_bounds = array<i64: 2, 8, 32>}, {pipeline_mode = #tpu.pipeline_mode<synchronous>, transform_indices = @transform_1, window_bounds = array<i64: 32, 32>}, {pipeline_mode = #tpu.pipeline_mode<synchronous>, transform_indices = @transform_2, window_bounds = array<i64: 32, 32>}, {pipeline_mode = #tpu.pipeline_mode<synchronous>, transform_indices = @transform_3, window_bounds = array<i64: 32, 32>}, {pipeline_mode = #tpu.pipeline_mode<synchronous>, transform_indices = @transform_4, window_bounds = array<i64: 1, 32>}, {pipeline_mode = #tpu.pipeline_mode<synchronous>, transform_indices = @transform_5, window_bounds = array<i64: 1, 32>}, {pipeline_mode = #tpu.pipeline_mode<synchronous>, transform_indices = @transform_6, window_bounds = array<i64: 1, 32>}, {pipeline_mode = #tpu.pipeline_mode<synchronous>, transform_indices = @transform_7, window_bounds = array<i64: 4, 8, 32>}, {pipeline_mode = #tpu.pipeline_mode<synchronous>, transform_indices = @transform_8, window_bounds = array<i64: 1, 32>}, {pipeline_mode = #tpu.pipeline_mode<synchronous>, transform_indices = @transform_9, window_bounds = array<i64: 32, 128>}, {pipeline_mode = #tpu.pipeline_mode<synchronous>, transform_indices = @transform_10, window_bounds = array<i64: 1, 128>}, {pipeline_mode = #tpu.pipeline_mode<synchronous>, transform_indices = @transform_11, window_bounds = array<i64: 128, 32>}, {pipeline_mode = #tpu.pipeline_mode<synchronous>, transform_indices = @transform_12, window_bounds = array<i64: 1, 32>}, {pipeline_mode = #tpu.pipeline_mode<synchronous>, transform_indices = @transform_13, window_bounds = array<i64: 8, 32>}, {pipeline_mode = #tpu.pipeline_mode<synchronous>, transform_indices = @transform_14, window_bounds = array<i64: 8, 32>}, {pipeline_mode = #tpu.pipeline_mode<synchronous>, transform_indices = @transform_15, window_bounds = array<i64: 8, 32>}, {pipeline_mode = #tpu.pipeline_mode<synchronous>, transform_indices = @transform_16, window_bounds = array<i64: 8, 32>}, {transform_indices = @transform_17, window_bounds = array<i64: 2, 8, 32>}]} {
    %c0 = arith.constant 0 : index
    %c0_0 = arith.constant 0 : index
    %c0_1 = arith.constant 0 : index
    %0 = vector.load %arg1[%c0, %c0_0, %c0_1] : memref<2x8x32xf32, #tpu.memory_space<vmem>>, vector<2x8x32xf32>
    %1 = vector.shape_cast %0 : vector<2x8x32xf32> to vector<16x32xf32>
    %2 = arith.truncf %1 : vector<16x32xf32> to vector<16x32xbf16>
    %c0_2 = arith.constant 0 : index
    %c0_3 = arith.constant 0 : index
    %3 = vector.load %arg2[%c0_2, %c0_3] : memref<32x32xbf16, #tpu.memory_space<vmem>>, vector<32x32xbf16>
    %cst = arith.constant dense<0.000000e+00> : vector<16x32xf32>
    %4 = tpu.matmul %2, %3, %cst {dimension_numbers = #tpu.dot_dimension_numbers<[1], [0], [0], [1], [0, 0, 1, 1], [], []>} : vector<16x32xbf16>, vector<32x32xbf16>, vector<16x32xf32> -> vector<16x32xf32>
    %c0_4 = arith.constant 0 : index
    %c0_5 = arith.constant 0 : index
    %5 = vector.load %arg5[%c0_4, %c0_5] : memref<1x32xf32, #tpu.memory_space<vmem>>, vector<1x32xf32>
    %6 = vector.broadcast %5 : vector<1x32xf32> to vector<16x32xf32>
    %7 = arith.addf %4, %6 : vector<16x32xf32>
    %c0_6 = arith.constant 0 : index
    %c0_7 = arith.constant 0 : index
    %8 = vector.load %arg3[%c0_6, %c0_7] : memref<32x32xbf16, #tpu.memory_space<vmem>>, vector<32x32xbf16>
    %cst_8 = arith.constant dense<0.000000e+00> : vector<16x32xf32>
    %9 = tpu.matmul %2, %8, %cst_8 {dimension_numbers = #tpu.dot_dimension_numbers<[1], [0], [0], [1], [0, 0, 1, 1], [], []>} : vector<16x32xbf16>, vector<32x32xbf16>, vector<16x32xf32> -> vector<16x32xf32>
    %c0_9 = arith.constant 0 : index
    %c0_10 = arith.constant 0 : index
    %10 = vector.load %arg6[%c0_9, %c0_10] : memref<1x32xf32, #tpu.memory_space<vmem>>, vector<1x32xf32>
    %11 = vector.broadcast %10 : vector<1x32xf32> to vector<16x32xf32>
    %12 = arith.addf %9, %11 : vector<16x32xf32>
    %c0_11 = arith.constant 0 : index
    %c0_12 = arith.constant 0 : index
    %13 = vector.load %arg4[%c0_11, %c0_12] : memref<32x32xbf16, #tpu.memory_space<vmem>>, vector<32x32xbf16>
    %cst_13 = arith.constant dense<0.000000e+00> : vector<16x32xf32>
    %14 = tpu.matmul %2, %13, %cst_13 {dimension_numbers = #tpu.dot_dimension_numbers<[1], [0], [0], [1], [0, 0, 1, 1], [], []>} : vector<16x32xbf16>, vector<32x32xbf16>, vector<16x32xf32> -> vector<16x32xf32>
    %c0_14 = arith.constant 0 : index
    %c0_15 = arith.constant 0 : index
    %15 = vector.load %arg7[%c0_14, %c0_15] : memref<1x32xf32, #tpu.memory_space<vmem>>, vector<1x32xf32>
    %16 = vector.broadcast %15 : vector<1x32xf32> to vector<16x32xf32>
    %17 = arith.addf %14, %16 : vector<16x32xf32>
    %18 = vector.extract_strided_slice %7 {offsets = [0, 0], sizes = [8, 32], strides = [1, 1]} : vector<16x32xf32> to vector<8x32xf32>
    %19 = arith.truncf %18 : vector<8x32xf32> to vector<8x32xbf16>
    %20 = vector.extract_strided_slice %12 {offsets = [0, 0], sizes = [8, 32], strides = [1, 1]} : vector<16x32xf32> to vector<8x32xf32>
    %21 = tpu.transpose %20, [1, 0] : vector<8x32xf32> -> vector<32x8xf32>
    %22 = arith.truncf %21 : vector<32x8xf32> to vector<32x8xbf16>
    %23 = vector.extract_strided_slice %17 {offsets = [0, 0], sizes = [8, 32], strides = [1, 1]} : vector<16x32xf32> to vector<8x32xf32>
    %24 = arith.truncf %23 : vector<8x32xf32> to vector<8x32xbf16>
    %cst_16 = arith.constant 0.000000e+00 : f32
    %25 = vector.broadcast %cst_16 : f32 to vector<8x32xf32>
    %26 = vector.extract_strided_slice %19 {offsets = [0, 0], sizes = [8, 8], strides = [1, 1]} : vector<8x32xbf16> to vector<8x8xbf16>
    %27 = vector.extract_strided_slice %22 {offsets = [0, 0], sizes = [8, 8], strides = [1, 1]} : vector<32x8xbf16> to vector<8x8xbf16>
    %cst_17 = arith.constant dense<0.000000e+00> : vector<8x8xf32>
    %28 = tpu.matmul %26, %27, %cst_17 {dimension_numbers = #tpu.dot_dimension_numbers<[1], [0], [0], [1], [0, 0, 1, 1], [], []>} : vector<8x8xbf16>, vector<8x8xbf16>, vector<8x8xf32> -> vector<8x8xf32>
    %cst_18 = arith.constant dense<0xFF800000> : vector<8xf32>
    %29 = vector.multi_reduction <maximumf>, %28, %cst_18 [1] : vector<8x8xf32> to vector<8xf32>
    %30 = vector.shape_cast %29 : vector<8xf32> to vector<8x1xf32>
    %31 = vector.broadcast %30 : vector<8x1xf32> to vector<8x8xf32>
    %32 = arith.subf %28, %31 : vector<8x8xf32>
    %33 = math.exp %32 : vector<8x8xf32>
    %cst_19 = arith.constant dense<0.000000e+00> : vector<8xf32>
    %34 = vector.multi_reduction <add>, %33, %cst_19 [1] : vector<8x8xf32> to vector<8xf32>
    %35 = vector.shape_cast %34 : vector<8xf32> to vector<8x1xf32>
    %36 = tpu.reciprocal %35 {approx = true} : vector<8x1xf32> -> vector<8x1xf32>
    %37 = vector.broadcast %36 : vector<8x1xf32> to vector<8x8xf32>
    %38 = arith.mulf %33, %37 : vector<8x8xf32>
    %39 = arith.truncf %38 : vector<8x8xf32> to vector<8x8xbf16>
    %40 = vector.extract_strided_slice %24 {offsets = [0, 0], sizes = [8, 8], strides = [1, 1]} : vector<8x32xbf16> to vector<8x8xbf16>
    %cst_20 = arith.constant dense<0.000000e+00> : vector<8x8xf32>
    %41 = tpu.matmul %39, %40, %cst_20 {dimension_numbers = #tpu.dot_dimension_numbers<[1], [0], [0], [1], [0, 0, 1, 1], [], []>} : vector<8x8xbf16>, vector<8x8xbf16>, vector<8x8xf32> -> vector<8x8xf32>
    %42 = arith.truncf %41 : vector<8x8xf32> to vector<8x8xbf16>
    %c0_21 = arith.constant 0 : index
    %c0_22 = arith.constant 0 : index
    %c0_23 = arith.constant 0 : index
    %43 = vector.load %arg8[%c0_21, %c0_22, %c0_23] : memref<4x8x32xbf16, #tpu.memory_space<vmem>>, vector<1x8x32xbf16>
    %44 = vector.shape_cast %43 : vector<1x8x32xbf16> to vector<8x32xbf16>
    %cst_24 = arith.constant dense<0.000000e+00> : vector<8x32xf32>
    %45 = tpu.matmul %42, %44, %cst_24 {dimension_numbers = #tpu.dot_dimension_numbers<[1], [0], [0], [1], [0, 0, 1, 1], [], []>} : vector<8x8xbf16>, vector<8x32xbf16>, vector<8x32xf32> -> vector<8x32xf32>
    %46 = arith.addf %25, %45 : vector<8x32xf32>
    %47 = vector.extract_strided_slice %19 {offsets = [0, 8], sizes = [8, 8], strides = [1, 1]} : vector<8x32xbf16> to vector<8x8xbf16>
    %48 = vector.extract_strided_slice %22 {offsets = [8, 0], sizes = [8, 8], strides = [1, 1]} : vector<32x8xbf16> to vector<8x8xbf16>
    %cst_25 = arith.constant dense<0.000000e+00> : vector<8x8xf32>
    %49 = tpu.matmul %47, %48, %cst_25 {dimension_numbers = #tpu.dot_dimension_numbers<[1], [0], [0], [1], [0, 0, 1, 1], [], []>} : vector<8x8xbf16>, vector<8x8xbf16>, vector<8x8xf32> -> vector<8x8xf32>
    %cst_26 = arith.constant dense<0xFF800000> : vector<8xf32>
    %50 = vector.multi_reduction <maximumf>, %49, %cst_26 [1] : vector<8x8xf32> to vector<8xf32>
    %51 = vector.shape_cast %50 : vector<8xf32> to vector<8x1xf32>
    %52 = vector.broadcast %51 : vector<8x1xf32> to vector<8x8xf32>
    %53 = arith.subf %49, %52 : vector<8x8xf32>
    %54 = math.exp %53 : vector<8x8xf32>
    %cst_27 = arith.constant dense<0.000000e+00> : vector<8xf32>
    %55 = vector.multi_reduction <add>, %54, %cst_27 [1] : vector<8x8xf32> to vector<8xf32>
    %56 = vector.shape_cast %55 : vector<8xf32> to vector<8x1xf32>
    %57 = tpu.reciprocal %56 {approx = true} : vector<8x1xf32> -> vector<8x1xf32>
    %58 = vector.broadcast %57 : vector<8x1xf32> to vector<8x8xf32>
    %59 = arith.mulf %54, %58 : vector<8x8xf32>
    %60 = arith.truncf %59 : vector<8x8xf32> to vector<8x8xbf16>
    %61 = vector.extract_strided_slice %24 {offsets = [0, 8], sizes = [8, 8], strides = [1, 1]} : vector<8x32xbf16> to vector<8x8xbf16>
    %cst_28 = arith.constant dense<0.000000e+00> : vector<8x8xf32>
    %62 = tpu.matmul %60, %61, %cst_28 {dimension_numbers = #tpu.dot_dimension_numbers<[1], [0], [0], [1], [0, 0, 1, 1], [], []>} : vector<8x8xbf16>, vector<8x8xbf16>, vector<8x8xf32> -> vector<8x8xf32>
    %63 = arith.truncf %62 : vector<8x8xf32> to vector<8x8xbf16>
    %c1 = arith.constant 1 : index
    %c0_29 = arith.constant 0 : index
    %c0_30 = arith.constant 0 : index
    %64 = vector.load %arg8[%c1, %c0_29, %c0_30] : memref<4x8x32xbf16, #tpu.memory_space<vmem>>, vector<1x8x32xbf16>
    %65 = vector.shape_cast %64 : vector<1x8x32xbf16> to vector<8x32xbf16>
    %cst_31 = arith.constant dense<0.000000e+00> : vector<8x32xf32>
    %66 = tpu.matmul %63, %65, %cst_31 {dimension_numbers = #tpu.dot_dimension_numbers<[1], [0], [0], [1], [0, 0, 1, 1], [], []>} : vector<8x8xbf16>, vector<8x32xbf16>, vector<8x32xf32> -> vector<8x32xf32>
    %67 = arith.addf %46, %66 : vector<8x32xf32>
    %68 = vector.extract_strided_slice %19 {offsets = [0, 16], sizes = [8, 8], strides = [1, 1]} : vector<8x32xbf16> to vector<8x8xbf16>
    %69 = vector.extract_strided_slice %22 {offsets = [16, 0], sizes = [8, 8], strides = [1, 1]} : vector<32x8xbf16> to vector<8x8xbf16>
    %cst_32 = arith.constant dense<0.000000e+00> : vector<8x8xf32>
    %70 = tpu.matmul %68, %69, %cst_32 {dimension_numbers = #tpu.dot_dimension_numbers<[1], [0], [0], [1], [0, 0, 1, 1], [], []>} : vector<8x8xbf16>, vector<8x8xbf16>, vector<8x8xf32> -> vector<8x8xf32>
    %cst_33 = arith.constant dense<0xFF800000> : vector<8xf32>
    %71 = vector.multi_reduction <maximumf>, %70, %cst_33 [1] : vector<8x8xf32> to vector<8xf32>
    %72 = vector.shape_cast %71 : vector<8xf32> to vector<8x1xf32>
    %73 = vector.broadcast %72 : vector<8x1xf32> to vector<8x8xf32>
    %74 = arith.subf %70, %73 : vector<8x8xf32>
    %75 = math.exp %74 : vector<8x8xf32>
    %cst_34 = arith.constant dense<0.000000e+00> : vector<8xf32>
    %76 = vector.multi_reduction <add>, %75, %cst_34 [1] : vector<8x8xf32> to vector<8xf32>
    %77 = vector.shape_cast %76 : vector<8xf32> to vector<8x1xf32>
    %78 = tpu.reciprocal %77 {approx = true} : vector<8x1xf32> -> vector<8x1xf32>
    %79 = vector.broadcast %78 : vector<8x1xf32> to vector<8x8xf32>
    %80 = arith.mulf %75, %79 : vector<8x8xf32>
    %81 = arith.truncf %80 : vector<8x8xf32> to vector<8x8xbf16>
    %82 = vector.extract_strided_slice %24 {offsets = [0, 16], sizes = [8, 8], strides = [1, 1]} : vector<8x32xbf16> to vector<8x8xbf16>
    %cst_35 = arith.constant dense<0.000000e+00> : vector<8x8xf32>
    %83 = tpu.matmul %81, %82, %cst_35 {dimension_numbers = #tpu.dot_dimension_numbers<[1], [0], [0], [1], [0, 0, 1, 1], [], []>} : vector<8x8xbf16>, vector<8x8xbf16>, vector<8x8xf32> -> vector<8x8xf32>
    %84 = arith.truncf %83 : vector<8x8xf32> to vector<8x8xbf16>
    %c2 = arith.constant 2 : index
    %c0_36 = arith.constant 0 : index
    %c0_37 = arith.constant 0 : index
    %85 = vector.load %arg8[%c2, %c0_36, %c0_37] : memref<4x8x32xbf16, #tpu.memory_space<vmem>>, vector<1x8x32xbf16>
    %86 = vector.shape_cast %85 : vector<1x8x32xbf16> to vector<8x32xbf16>
    %cst_38 = arith.constant dense<0.000000e+00> : vector<8x32xf32>
    %87 = tpu.matmul %84, %86, %cst_38 {dimension_numbers = #tpu.dot_dimension_numbers<[1], [0], [0], [1], [0, 0, 1, 1], [], []>} : vector<8x8xbf16>, vector<8x32xbf16>, vector<8x32xf32> -> vector<8x32xf32>
    %88 = arith.addf %67, %87 : vector<8x32xf32>
    %89 = vector.extract_strided_slice %19 {offsets = [0, 24], sizes = [8, 8], strides = [1, 1]} : vector<8x32xbf16> to vector<8x8xbf16>
    %90 = vector.extract_strided_slice %22 {offsets = [24, 0], sizes = [8, 8], strides = [1, 1]} : vector<32x8xbf16> to vector<8x8xbf16>
    %cst_39 = arith.constant dense<0.000000e+00> : vector<8x8xf32>
    %91 = tpu.matmul %89, %90, %cst_39 {dimension_numbers = #tpu.dot_dimension_numbers<[1], [0], [0], [1], [0, 0, 1, 1], [], []>} : vector<8x8xbf16>, vector<8x8xbf16>, vector<8x8xf32> -> vector<8x8xf32>
    %cst_40 = arith.constant dense<0xFF800000> : vector<8xf32>
    %92 = vector.multi_reduction <maximumf>, %91, %cst_40 [1] : vector<8x8xf32> to vector<8xf32>
    %93 = vector.shape_cast %92 : vector<8xf32> to vector<8x1xf32>
    %94 = vector.broadcast %93 : vector<8x1xf32> to vector<8x8xf32>
    %95 = arith.subf %91, %94 : vector<8x8xf32>
    %96 = math.exp %95 : vector<8x8xf32>
    %cst_41 = arith.constant dense<0.000000e+00> : vector<8xf32>
    %97 = vector.multi_reduction <add>, %96, %cst_41 [1] : vector<8x8xf32> to vector<8xf32>
    %98 = vector.shape_cast %97 : vector<8xf32> to vector<8x1xf32>
    %99 = tpu.reciprocal %98 {approx = true} : vector<8x1xf32> -> vector<8x1xf32>
    %100 = vector.broadcast %99 : vector<8x1xf32> to vector<8x8xf32>
    %101 = arith.mulf %96, %100 : vector<8x8xf32>
    %102 = arith.truncf %101 : vector<8x8xf32> to vector<8x8xbf16>
    %103 = vector.extract_strided_slice %24 {offsets = [0, 24], sizes = [8, 8], strides = [1, 1]} : vector<8x32xbf16> to vector<8x8xbf16>
    %cst_42 = arith.constant dense<0.000000e+00> : vector<8x8xf32>
    %104 = tpu.matmul %102, %103, %cst_42 {dimension_numbers = #tpu.dot_dimension_numbers<[1], [0], [0], [1], [0, 0, 1, 1], [], []>} : vector<8x8xbf16>, vector<8x8xbf16>, vector<8x8xf32> -> vector<8x8xf32>
    %105 = arith.truncf %104 : vector<8x8xf32> to vector<8x8xbf16>
    %c3 = arith.constant 3 : index
    %c0_43 = arith.constant 0 : index
    %c0_44 = arith.constant 0 : index
    %106 = vector.load %arg8[%c3, %c0_43, %c0_44] : memref<4x8x32xbf16, #tpu.memory_space<vmem>>, vector<1x8x32xbf16>
    %107 = vector.shape_cast %106 : vector<1x8x32xbf16> to vector<8x32xbf16>
    %cst_45 = arith.constant dense<0.000000e+00> : vector<8x32xf32>
    %108 = tpu.matmul %105, %107, %cst_45 {dimension_numbers = #tpu.dot_dimension_numbers<[1], [0], [0], [1], [0, 0, 1, 1], [], []>} : vector<8x8xbf16>, vector<8x32xbf16>, vector<8x32xf32> -> vector<8x32xf32>
    %109 = arith.addf %88, %108 : vector<8x32xf32>
    %110 = vector.extract_strided_slice %7 {offsets = [8, 0], sizes = [8, 32], strides = [1, 1]} : vector<16x32xf32> to vector<8x32xf32>
    %111 = arith.truncf %110 : vector<8x32xf32> to vector<8x32xbf16>
    %112 = vector.extract_strided_slice %12 {offsets = [8, 0], sizes = [8, 32], strides = [1, 1]} : vector<16x32xf32> to vector<8x32xf32>
    %113 = tpu.transpose %112, [1, 0] : vector<8x32xf32> -> vector<32x8xf32>
    %114 = arith.truncf %113 : vector<32x8xf32> to vector<32x8xbf16>
    %115 = vector.extract_strided_slice %17 {offsets = [8, 0], sizes = [8, 32], strides = [1, 1]} : vector<16x32xf32> to vector<8x32xf32>
    %116 = arith.truncf %115 : vector<8x32xf32> to vector<8x32xbf16>
    %cst_46 = arith.constant 0.000000e+00 : f32
    %117 = vector.broadcast %cst_46 : f32 to vector<8x32xf32>
    %118 = vector.extract_strided_slice %111 {offsets = [0, 0], sizes = [8, 8], strides = [1, 1]} : vector<8x32xbf16> to vector<8x8xbf16>
    %119 = vector.extract_strided_slice %114 {offsets = [0, 0], sizes = [8, 8], strides = [1, 1]} : vector<32x8xbf16> to vector<8x8xbf16>
    %cst_47 = arith.constant dense<0.000000e+00> : vector<8x8xf32>
    %120 = tpu.matmul %118, %119, %cst_47 {dimension_numbers = #tpu.dot_dimension_numbers<[1], [0], [0], [1], [0, 0, 1, 1], [], []>} : vector<8x8xbf16>, vector<8x8xbf16>, vector<8x8xf32> -> vector<8x8xf32>
    %cst_48 = arith.constant dense<0xFF800000> : vector<8xf32>
    %121 = vector.multi_reduction <maximumf>, %120, %cst_48 [1] : vector<8x8xf32> to vector<8xf32>
    %122 = vector.shape_cast %121 : vector<8xf32> to vector<8x1xf32>
    %123 = vector.broadcast %122 : vector<8x1xf32> to vector<8x8xf32>
    %124 = arith.subf %120, %123 : vector<8x8xf32>
    %125 = math.exp %124 : vector<8x8xf32>
    %cst_49 = arith.constant dense<0.000000e+00> : vector<8xf32>
    %126 = vector.multi_reduction <add>, %125, %cst_49 [1] : vector<8x8xf32> to vector<8xf32>
    %127 = vector.shape_cast %126 : vector<8xf32> to vector<8x1xf32>
    %128 = tpu.reciprocal %127 {approx = true} : vector<8x1xf32> -> vector<8x1xf32>
    %129 = vector.broadcast %128 : vector<8x1xf32> to vector<8x8xf32>
    %130 = arith.mulf %125, %129 : vector<8x8xf32>
    %131 = arith.truncf %130 : vector<8x8xf32> to vector<8x8xbf16>
    %132 = vector.extract_strided_slice %116 {offsets = [0, 0], sizes = [8, 8], strides = [1, 1]} : vector<8x32xbf16> to vector<8x8xbf16>
    %cst_50 = arith.constant dense<0.000000e+00> : vector<8x8xf32>
    %133 = tpu.matmul %131, %132, %cst_50 {dimension_numbers = #tpu.dot_dimension_numbers<[1], [0], [0], [1], [0, 0, 1, 1], [], []>} : vector<8x8xbf16>, vector<8x8xbf16>, vector<8x8xf32> -> vector<8x8xf32>
    %134 = arith.truncf %133 : vector<8x8xf32> to vector<8x8xbf16>
    %c0_51 = arith.constant 0 : index
    %c0_52 = arith.constant 0 : index
    %c0_53 = arith.constant 0 : index
    %135 = vector.load %arg8[%c0_51, %c0_52, %c0_53] : memref<4x8x32xbf16, #tpu.memory_space<vmem>>, vector<1x8x32xbf16>
    %136 = vector.shape_cast %135 : vector<1x8x32xbf16> to vector<8x32xbf16>
    %cst_54 = arith.constant dense<0.000000e+00> : vector<8x32xf32>
    %137 = tpu.matmul %134, %136, %cst_54 {dimension_numbers = #tpu.dot_dimension_numbers<[1], [0], [0], [1], [0, 0, 1, 1], [], []>} : vector<8x8xbf16>, vector<8x32xbf16>, vector<8x32xf32> -> vector<8x32xf32>
    %138 = arith.addf %117, %137 : vector<8x32xf32>
    %139 = vector.extract_strided_slice %111 {offsets = [0, 8], sizes = [8, 8], strides = [1, 1]} : vector<8x32xbf16> to vector<8x8xbf16>
    %140 = vector.extract_strided_slice %114 {offsets = [8, 0], sizes = [8, 8], strides = [1, 1]} : vector<32x8xbf16> to vector<8x8xbf16>
    %cst_55 = arith.constant dense<0.000000e+00> : vector<8x8xf32>
    %141 = tpu.matmul %139, %140, %cst_55 {dimension_numbers = #tpu.dot_dimension_numbers<[1], [0], [0], [1], [0, 0, 1, 1], [], []>} : vector<8x8xbf16>, vector<8x8xbf16>, vector<8x8xf32> -> vector<8x8xf32>
    %cst_56 = arith.constant dense<0xFF800000> : vector<8xf32>
    %142 = vector.multi_reduction <maximumf>, %141, %cst_56 [1] : vector<8x8xf32> to vector<8xf32>
    %143 = vector.shape_cast %142 : vector<8xf32> to vector<8x1xf32>
    %144 = vector.broadcast %143 : vector<8x1xf32> to vector<8x8xf32>
    %145 = arith.subf %141, %144 : vector<8x8xf32>
    %146 = math.exp %145 : vector<8x8xf32>
    %cst_57 = arith.constant dense<0.000000e+00> : vector<8xf32>
    %147 = vector.multi_reduction <add>, %146, %cst_57 [1] : vector<8x8xf32> to vector<8xf32>
    %148 = vector.shape_cast %147 : vector<8xf32> to vector<8x1xf32>
    %149 = tpu.reciprocal %148 {approx = true} : vector<8x1xf32> -> vector<8x1xf32>
    %150 = vector.broadcast %149 : vector<8x1xf32> to vector<8x8xf32>
    %151 = arith.mulf %146, %150 : vector<8x8xf32>
    %152 = arith.truncf %151 : vector<8x8xf32> to vector<8x8xbf16>
    %153 = vector.extract_strided_slice %116 {offsets = [0, 8], sizes = [8, 8], strides = [1, 1]} : vector<8x32xbf16> to vector<8x8xbf16>
    %cst_58 = arith.constant dense<0.000000e+00> : vector<8x8xf32>
    %154 = tpu.matmul %152, %153, %cst_58 {dimension_numbers = #tpu.dot_dimension_numbers<[1], [0], [0], [1], [0, 0, 1, 1], [], []>} : vector<8x8xbf16>, vector<8x8xbf16>, vector<8x8xf32> -> vector<8x8xf32>
    %155 = arith.truncf %154 : vector<8x8xf32> to vector<8x8xbf16>
    %c1_59 = arith.constant 1 : index
    %c0_60 = arith.constant 0 : index
    %c0_61 = arith.constant 0 : index
    %156 = vector.load %arg8[%c1_59, %c0_60, %c0_61] : memref<4x8x32xbf16, #tpu.memory_space<vmem>>, vector<1x8x32xbf16>
    %157 = vector.shape_cast %156 : vector<1x8x32xbf16> to vector<8x32xbf16>
    %cst_62 = arith.constant dense<0.000000e+00> : vector<8x32xf32>
    %158 = tpu.matmul %155, %157, %cst_62 {dimension_numbers = #tpu.dot_dimension_numbers<[1], [0], [0], [1], [0, 0, 1, 1], [], []>} : vector<8x8xbf16>, vector<8x32xbf16>, vector<8x32xf32> -> vector<8x32xf32>
    %159 = arith.addf %138, %158 : vector<8x32xf32>
    %160 = vector.extract_strided_slice %111 {offsets = [0, 16], sizes = [8, 8], strides = [1, 1]} : vector<8x32xbf16> to vector<8x8xbf16>
    %161 = vector.extract_strided_slice %114 {offsets = [16, 0], sizes = [8, 8], strides = [1, 1]} : vector<32x8xbf16> to vector<8x8xbf16>
    %cst_63 = arith.constant dense<0.000000e+00> : vector<8x8xf32>
    %162 = tpu.matmul %160, %161, %cst_63 {dimension_numbers = #tpu.dot_dimension_numbers<[1], [0], [0], [1], [0, 0, 1, 1], [], []>} : vector<8x8xbf16>, vector<8x8xbf16>, vector<8x8xf32> -> vector<8x8xf32>
    %cst_64 = arith.constant dense<0xFF800000> : vector<8xf32>
    %163 = vector.multi_reduction <maximumf>, %162, %cst_64 [1] : vector<8x8xf32> to vector<8xf32>
    %164 = vector.shape_cast %163 : vector<8xf32> to vector<8x1xf32>
    %165 = vector.broadcast %164 : vector<8x1xf32> to vector<8x8xf32>
    %166 = arith.subf %162, %165 : vector<8x8xf32>
    %167 = math.exp %166 : vector<8x8xf32>
    %cst_65 = arith.constant dense<0.000000e+00> : vector<8xf32>
    %168 = vector.multi_reduction <add>, %167, %cst_65 [1] : vector<8x8xf32> to vector<8xf32>
    %169 = vector.shape_cast %168 : vector<8xf32> to vector<8x1xf32>
    %170 = tpu.reciprocal %169 {approx = true} : vector<8x1xf32> -> vector<8x1xf32>
    %171 = vector.broadcast %170 : vector<8x1xf32> to vector<8x8xf32>
    %172 = arith.mulf %167, %171 : vector<8x8xf32>
    %173 = arith.truncf %172 : vector<8x8xf32> to vector<8x8xbf16>
    %174 = vector.extract_strided_slice %116 {offsets = [0, 16], sizes = [8, 8], strides = [1, 1]} : vector<8x32xbf16> to vector<8x8xbf16>
    %cst_66 = arith.constant dense<0.000000e+00> : vector<8x8xf32>
    %175 = tpu.matmul %173, %174, %cst_66 {dimension_numbers = #tpu.dot_dimension_numbers<[1], [0], [0], [1], [0, 0, 1, 1], [], []>} : vector<8x8xbf16>, vector<8x8xbf16>, vector<8x8xf32> -> vector<8x8xf32>
    %176 = arith.truncf %175 : vector<8x8xf32> to vector<8x8xbf16>
    %c2_67 = arith.constant 2 : index
    %c0_68 = arith.constant 0 : index
    %c0_69 = arith.constant 0 : index
    %177 = vector.load %arg8[%c2_67, %c0_68, %c0_69] : memref<4x8x32xbf16, #tpu.memory_space<vmem>>, vector<1x8x32xbf16>
    %178 = vector.shape_cast %177 : vector<1x8x32xbf16> to vector<8x32xbf16>
    %cst_70 = arith.constant dense<0.000000e+00> : vector<8x32xf32>
    %179 = tpu.matmul %176, %178, %cst_70 {dimension_numbers = #tpu.dot_dimension_numbers<[1], [0], [0], [1], [0, 0, 1, 1], [], []>} : vector<8x8xbf16>, vector<8x32xbf16>, vector<8x32xf32> -> vector<8x32xf32>
    %180 = arith.addf %159, %179 : vector<8x32xf32>
    %181 = vector.extract_strided_slice %111 {offsets = [0, 24], sizes = [8, 8], strides = [1, 1]} : vector<8x32xbf16> to vector<8x8xbf16>
    %182 = vector.extract_strided_slice %114 {offsets = [24, 0], sizes = [8, 8], strides = [1, 1]} : vector<32x8xbf16> to vector<8x8xbf16>
    %cst_71 = arith.constant dense<0.000000e+00> : vector<8x8xf32>
    %183 = tpu.matmul %181, %182, %cst_71 {dimension_numbers = #tpu.dot_dimension_numbers<[1], [0], [0], [1], [0, 0, 1, 1], [], []>} : vector<8x8xbf16>, vector<8x8xbf16>, vector<8x8xf32> -> vector<8x8xf32>
    %cst_72 = arith.constant dense<0xFF800000> : vector<8xf32>
    %184 = vector.multi_reduction <maximumf>, %183, %cst_72 [1] : vector<8x8xf32> to vector<8xf32>
    %185 = vector.shape_cast %184 : vector<8xf32> to vector<8x1xf32>
    %186 = vector.broadcast %185 : vector<8x1xf32> to vector<8x8xf32>
    %187 = arith.subf %183, %186 : vector<8x8xf32>
    %188 = math.exp %187 : vector<8x8xf32>
    %cst_73 = arith.constant dense<0.000000e+00> : vector<8xf32>
    %189 = vector.multi_reduction <add>, %188, %cst_73 [1] : vector<8x8xf32> to vector<8xf32>
    %190 = vector.shape_cast %189 : vector<8xf32> to vector<8x1xf32>
    %191 = tpu.reciprocal %190 {approx = true} : vector<8x1xf32> -> vector<8x1xf32>
    %192 = vector.broadcast %191 : vector<8x1xf32> to vector<8x8xf32>
    %193 = arith.mulf %188, %192 : vector<8x8xf32>
    %194 = arith.truncf %193 : vector<8x8xf32> to vector<8x8xbf16>
    %195 = vector.extract_strided_slice %116 {offsets = [0, 24], sizes = [8, 8], strides = [1, 1]} : vector<8x32xbf16> to vector<8x8xbf16>
    %cst_74 = arith.constant dense<0.000000e+00> : vector<8x8xf32>
    %196 = tpu.matmul %194, %195, %cst_74 {dimension_numbers = #tpu.dot_dimension_numbers<[1], [0], [0], [1], [0, 0, 1, 1], [], []>} : vector<8x8xbf16>, vector<8x8xbf16>, vector<8x8xf32> -> vector<8x8xf32>
    %197 = arith.truncf %196 : vector<8x8xf32> to vector<8x8xbf16>
    %c3_75 = arith.constant 3 : index
    %c0_76 = arith.constant 0 : index
    %c0_77 = arith.constant 0 : index
    %198 = vector.load %arg8[%c3_75, %c0_76, %c0_77] : memref<4x8x32xbf16, #tpu.memory_space<vmem>>, vector<1x8x32xbf16>
    %199 = vector.shape_cast %198 : vector<1x8x32xbf16> to vector<8x32xbf16>
    %cst_78 = arith.constant dense<0.000000e+00> : vector<8x32xf32>
    %200 = tpu.matmul %197, %199, %cst_78 {dimension_numbers = #tpu.dot_dimension_numbers<[1], [0], [0], [1], [0, 0, 1, 1], [], []>} : vector<8x8xbf16>, vector<8x32xbf16>, vector<8x32xf32> -> vector<8x32xf32>
    %201 = arith.addf %180, %200 : vector<8x32xf32>
    %202 = tpu.concatenate %109, %201 in 0 : vector<8x32xf32>, vector<8x32xf32> -> vector<16x32xf32>
    %203 = arith.addf %1, %202 : vector<16x32xf32>
    %c0_79 = arith.constant 0 : index
    %c0_80 = arith.constant 0 : index
    %204 = vector.load %arg9[%c0_79, %c0_80] : memref<1x32xf32, #tpu.memory_space<vmem>>, vector<1x32xf32>
    %205 = vector.broadcast %204 : vector<1x32xf32> to vector<16x32xf32>
    %206 = arith.addf %203, %205 : vector<16x32xf32>
    %207 = vector.shape_cast %206 : vector<16x32xf32> to vector<2x8x32xf32>
    %c0_81 = arith.constant 0 : index
    %c0_82 = arith.constant 0 : index
    %208 = vector.load %arg14[%c0_81, %c0_82] : memref<8x32xbf16, #tpu.memory_space<vmem>>, vector<8x32xbf16>
    %209 = arith.extf %208 : vector<8x32xbf16> to vector<8x32xf32>
    %c0_83 = arith.constant 0 : index
    %c0_84 = arith.constant 0 : index
    %210 = vector.load %arg15[%c0_83, %c0_84] : memref<8x32xbf16, #tpu.memory_space<vmem>>, vector<8x32xbf16>
    %211 = arith.extf %210 : vector<8x32xbf16> to vector<8x32xf32>
    %cst_85 = arith.constant dense<0.000000e+00> : vector<2x8xf32>
    %212 = vector.multi_reduction <add>, %207, %cst_85 [2] : vector<2x8x32xf32> to vector<2x8xf32>
    %213 = vector.shape_cast %212 : vector<2x8xf32> to vector<2x8x1xf32>
    %cst_86 = arith.constant 3.200000e+01 : f32
    %214 = vector.broadcast %cst_86 : f32 to vector<2x8x1xf32>
    %215 = arith.divf %213, %214 : vector<2x8x1xf32>
    %cst_87 = arith.constant dense<0.000000e+00> : vector<2x1xf32>
    %216 = vector.multi_reduction <add>, %215, %cst_87 [1] : vector<2x8x1xf32> to vector<2x1xf32>
    %217 = vector.shape_cast %216 : vector<2x1xf32> to vector<2x1x1xf32>
    %cst_88 = arith.constant 8.000000e+00 : f32
    %218 = vector.broadcast %cst_88 : f32 to vector<2x1x1xf32>
    %219 = arith.divf %217, %218 : vector<2x1x1xf32>
    %220 = vector.broadcast %219 : vector<2x1x1xf32> to vector<2x8x32xf32>
    %221 = arith.subf %207, %220 : vector<2x8x32xf32>
    %222 = arith.mulf %221, %221 : vector<2x8x32xf32>
    %cst_89 = arith.constant dense<0.000000e+00> : vector<2x8xf32>
    %223 = vector.multi_reduction <add>, %222, %cst_89 [2] : vector<2x8x32xf32> to vector<2x8xf32>
    %224 = vector.shape_cast %223 : vector<2x8xf32> to vector<2x8x1xf32>
    %cst_90 = arith.constant 3.200000e+01 : f32
    %225 = vector.broadcast %cst_90 : f32 to vector<2x8x1xf32>
    %226 = arith.divf %224, %225 : vector<2x8x1xf32>
    %cst_91 = arith.constant dense<0.000000e+00> : vector<2x1xf32>
    %227 = vector.multi_reduction <add>, %226, %cst_91 [1] : vector<2x8x1xf32> to vector<2x1xf32>
    %228 = vector.shape_cast %227 : vector<2x1xf32> to vector<2x1x1xf32>
    %cst_92 = arith.constant 8.000000e+00 : f32
    %229 = vector.broadcast %cst_92 : f32 to vector<2x1x1xf32>
    %230 = arith.divf %228, %229 : vector<2x1x1xf32>
    %cst_93 = arith.constant 9.99999974E-6 : f32
    %231 = vector.broadcast %cst_93 : f32 to vector<2x1x1xf32>
    %232 = arith.addf %230, %231 : vector<2x1x1xf32>
    %233 = math.rsqrt %232 : vector<2x1x1xf32>
    %234 = vector.broadcast %233 : vector<2x1x1xf32> to vector<2x8x32xf32>
    %235 = arith.mulf %221, %234 : vector<2x8x32xf32>
    %236 = vector.shape_cast %209 : vector<8x32xf32> to vector<1x8x32xf32>
    %237 = vector.broadcast %236 : vector<1x8x32xf32> to vector<2x8x32xf32>
    %238 = arith.mulf %235, %237 : vector<2x8x32xf32>
    %239 = vector.shape_cast %211 : vector<8x32xf32> to vector<1x8x32xf32>
    %240 = vector.broadcast %239 : vector<1x8x32xf32> to vector<2x8x32xf32>
    %241 = arith.addf %238, %240 : vector<2x8x32xf32>
    %242 = vector.shape_cast %241 : vector<2x8x32xf32> to vector<16x32xf32>
    %243 = arith.truncf %242 : vector<16x32xf32> to vector<16x32xbf16>
    %cst_94 = arith.constant 0.000000e+00 : f32
    %244 = vector.broadcast %cst_94 : f32 to vector<16x32xf32>
    %c0_95 = arith.constant 0 : index
    %c0_96 = arith.constant 0 : index
    %245 = vector.load %arg10[%c0_95, %c0_96] : memref<32x128xbf16, #tpu.memory_space<vmem>>, vector<32x128xbf16>
    %cst_97 = arith.constant dense<0.000000e+00> : vector<16x128xf32>
    %246 = tpu.matmul %243, %245, %cst_97 {dimension_numbers = #tpu.dot_dimension_numbers<[1], [0], [0], [1], [0, 0, 1, 1], [], []>} : vector<16x32xbf16>, vector<32x128xbf16>, vector<16x128xf32> -> vector<16x128xf32>
    %c0_98 = arith.constant 0 : index
    %c0_99 = arith.constant 0 : index
    %247 = vector.load %arg11[%c0_98, %c0_99] : memref<1x128xf32, #tpu.memory_space<vmem>>, vector<1x128xf32>
    %248 = vector.broadcast %247 : vector<1x128xf32> to vector<16x128xf32>
    %249 = arith.addf %246, %248 : vector<16x128xf32>
    %cst_100 = arith.constant 0.000000e+00 : f32
    %250 = vector.broadcast %cst_100 : f32 to vector<16x128xf32>
    %251 = arith.maximumf %249, %250 : vector<16x128xf32>
    %252 = arith.truncf %251 : vector<16x128xf32> to vector<16x128xbf16>
    %c0_101 = arith.constant 0 : index
    %c0_102 = arith.constant 0 : index
    %253 = vector.load %arg12[%c0_101, %c0_102] : memref<128x32xbf16, #tpu.memory_space<vmem>>, vector<128x32xbf16>
    %cst_103 = arith.constant dense<0.000000e+00> : vector<16x32xf32>
    %254 = tpu.matmul %252, %253, %cst_103 {dimension_numbers = #tpu.dot_dimension_numbers<[1], [0], [0], [1], [0, 0, 1, 1], [], []>} : vector<16x128xbf16>, vector<128x32xbf16>, vector<16x32xf32> -> vector<16x32xf32>
    %255 = arith.addf %244, %254 : vector<16x32xf32>
    %c0_104 = arith.constant 0 : index
    %c0_105 = arith.constant 0 : index
    %256 = vector.load %arg13[%c0_104, %c0_105] : memref<1x32xf32, #tpu.memory_space<vmem>>, vector<1x32xf32>
    %257 = vector.broadcast %256 : vector<1x32xf32> to vector<16x32xf32>
    %258 = arith.addf %255, %257 : vector<16x32xf32>
    %259 = vector.shape_cast %258 : vector<16x32xf32> to vector<2x8x32xf32>
    %260 = arith.addf %241, %259 : vector<2x8x32xf32>
    %c0_106 = arith.constant 0 : index
    %c0_107 = arith.constant 0 : index
    %261 = vector.load %arg16[%c0_106, %c0_107] : memref<8x32xbf16, #tpu.memory_space<vmem>>, vector<8x32xbf16>
    %262 = arith.extf %261 : vector<8x32xbf16> to vector<8x32xf32>
    %c0_108 = arith.constant 0 : index
    %c0_109 = arith.constant 0 : index
    %263 = vector.load %arg17[%c0_108, %c0_109] : memref<8x32xbf16, #tpu.memory_space<vmem>>, vector<8x32xbf16>
    %264 = arith.extf %263 : vector<8x32xbf16> to vector<8x32xf32>
    %cst_110 = arith.constant dense<0.000000e+00> : vector<2x8xf32>
    %265 = vector.multi_reduction <add>, %260, %cst_110 [2] : vector<2x8x32xf32> to vector<2x8xf32>
    %266 = vector.shape_cast %265 : vector<2x8xf32> to vector<2x8x1xf32>
    %cst_111 = arith.constant 3.200000e+01 : f32
    %267 = vector.broadcast %cst_111 : f32 to vector<2x8x1xf32>
    %268 = arith.divf %266, %267 : vector<2x8x1xf32>
    %cst_112 = arith.constant dense<0.000000e+00> : vector<2x1xf32>
    %269 = vector.multi_reduction <add>, %268, %cst_112 [1] : vector<2x8x1xf32> to vector<2x1xf32>
    %270 = vector.shape_cast %269 : vector<2x1xf32> to vector<2x1x1xf32>
    %cst_113 = arith.constant 8.000000e+00 : f32
    %271 = vector.broadcast %cst_113 : f32 to vector<2x1x1xf32>
    %272 = arith.divf %270, %271 : vector<2x1x1xf32>
    %273 = vector.broadcast %272 : vector<2x1x1xf32> to vector<2x8x32xf32>
    %274 = arith.subf %260, %273 : vector<2x8x32xf32>
    %275 = arith.mulf %274, %274 : vector<2x8x32xf32>
    %cst_114 = arith.constant dense<0.000000e+00> : vector<2x8xf32>
    %276 = vector.multi_reduction <add>, %275, %cst_114 [2] : vector<2x8x32xf32> to vector<2x8xf32>
    %277 = vector.shape_cast %276 : vector<2x8xf32> to vector<2x8x1xf32>
    %cst_115 = arith.constant 3.200000e+01 : f32
    %278 = vector.broadcast %cst_115 : f32 to vector<2x8x1xf32>
    %279 = arith.divf %277, %278 : vector<2x8x1xf32>
    %cst_116 = arith.constant dense<0.000000e+00> : vector<2x1xf32>
    %280 = vector.multi_reduction <add>, %279, %cst_116 [1] : vector<2x8x1xf32> to vector<2x1xf32>
    %281 = vector.shape_cast %280 : vector<2x1xf32> to vector<2x1x1xf32>
    %cst_117 = arith.constant 8.000000e+00 : f32
    %282 = vector.broadcast %cst_117 : f32 to vector<2x1x1xf32>
    %283 = arith.divf %281, %282 : vector<2x1x1xf32>
    %cst_118 = arith.constant 9.99999974E-6 : f32
    %284 = vector.broadcast %cst_118 : f32 to vector<2x1x1xf32>
    %285 = arith.addf %283, %284 : vector<2x1x1xf32>
    %286 = math.rsqrt %285 : vector<2x1x1xf32>
    %287 = vector.broadcast %286 : vector<2x1x1xf32> to vector<2x8x32xf32>
    %288 = arith.mulf %274, %287 : vector<2x8x32xf32>
    %289 = vector.shape_cast %262 : vector<8x32xf32> to vector<1x8x32xf32>
    %290 = vector.broadcast %289 : vector<1x8x32xf32> to vector<2x8x32xf32>
    %291 = arith.mulf %288, %290 : vector<2x8x32xf32>
    %292 = vector.shape_cast %264 : vector<8x32xf32> to vector<1x8x32xf32>
    %293 = vector.broadcast %292 : vector<1x8x32xf32> to vector<2x8x32xf32>
    %294 = arith.addf %291, %293 : vector<2x8x32xf32>
    %c0_119 = arith.constant 0 : index
    %c0_120 = arith.constant 0 : index
    %c0_121 = arith.constant 0 : index
    %295 = vector.load %arg18[%c0_119, %c0_120, %c0_121] : memref<2x8x32xf32, #tpu.memory_space<vmem>>, vector<2x8x32xf32>
    tpu.vector_store %arg18[%c0_119, %c0_120, %c0_121], %294 {strides = array<i32>} : memref<2x8x32xf32, #tpu.memory_space<vmem>>, vector<2x8x32xf32>,
    return
  }
  func.func @transform_0(%arg0: i32) -> (i32, i32, i32) {
    %c0_i32 = arith.constant 0 : i32
    %c0_i32_0 = arith.constant 0 : i32
    %c0_i32_1 = arith.constant 0 : i32
    return %arg0, %c0_i32, %c0_i32_0 : i32, i32, i32
  }
  func.func @transform_1(%arg0: i32) -> (i32, i32) {
    %c0_i32 = arith.constant 0 : i32
    %c0_i32_0 = arith.constant 0 : i32
    %c0_i32_1 = arith.constant 0 : i32
    return %c0_i32, %c0_i32_0 : i32, i32
  }
  func.func @transform_2(%arg0: i32) -> (i32, i32) {
    %c0_i32 = arith.constant 0 : i32
    %c0_i32_0 = arith.constant 0 : i32
    %c0_i32_1 = arith.constant 0 : i32
    return %c0_i32, %c0_i32_0 : i32, i32
  }
  func.func @transform_3(%arg0: i32) -> (i32, i32) {
    %c0_i32 = arith.constant 0 : i32
    %c0_i32_0 = arith.constant 0 : i32
    %c0_i32_1 = arith.constant 0 : i32
    return %c0_i32, %c0_i32_0 : i32, i32
  }
  func.func @transform_4(%arg0: i32) -> (i32, i32) {
    %c0_i32 = arith.constant 0 : i32
    %c0_i32_0 = arith.constant 0 : i32
    %c0_i32_1 = arith.constant 0 : i32
    return %c0_i32, %c0_i32_0 : i32, i32
  }
  func.func @transform_5(%arg0: i32) -> (i32, i32) {
    %c0_i32 = arith.constant 0 : i32
    %c0_i32_0 = arith.constant 0 : i32
    %c0_i32_1 = arith.constant 0 : i32
    return %c0_i32, %c0_i32_0 : i32, i32
  }
  func.func @transform_6(%arg0: i32) -> (i32, i32) {
    %c0_i32 = arith.constant 0 : i32
    %c0_i32_0 = arith.constant 0 : i32
    %c0_i32_1 = arith.constant 0 : i32
    return %c0_i32, %c0_i32_0 : i32, i32
  }
  func.func @transform_7(%arg0: i32) -> (i32, i32, i32) {
    %c0_i32 = arith.constant 0 : i32
    %c0_i32_0 = arith.constant 0 : i32
    %c0_i32_1 = arith.constant 0 : i32
    %c0_i32_2 = arith.constant 0 : i32
    return %c0_i32, %c0_i32_0, %c0_i32_1 : i32, i32, i32
  }
  func.func @transform_8(%arg0: i32) -> (i32, i32) {
    %c0_i32 = arith.constant 0 : i32
    %c0_i32_0 = arith.constant 0 : i32
    %c0_i32_1 = arith.constant 0 : i32
    return %c0_i32, %c0_i32_0 : i32, i32
  }
  func.func @transform_9(%arg0: i32) -> (i32, i32) {
    %c0_i32 = arith.constant 0 : i32
    %c0_i32_0 = arith.constant 0 : i32
    %c0_i32_1 = arith.constant 0 : i32
    return %c0_i32, %c0_i32_0 : i32, i32
  }
  func.func @transform_10(%arg0: i32) -> (i32, i32) {
    %c0_i32 = arith.constant 0 : i32
    %c0_i32_0 = arith.constant 0 : i32
    %c0_i32_1 = arith.constant 0 : i32
    return %c0_i32, %c0_i32_0 : i32, i32
  }
  func.func @transform_11(%arg0: i32) -> (i32, i32) {
    %c0_i32 = arith.constant 0 : i32
    %c0_i32_0 = arith.constant 0 : i32
    %c0_i32_1 = arith.constant 0 : i32
    return %c0_i32, %c0_i32_0 : i32, i32
  }
  func.func @transform_12(%arg0: i32) -> (i32, i32) {
    %c0_i32 = arith.constant 0 : i32
    %c0_i32_0 = arith.constant 0 : i32
    %c0_i32_1 = arith.constant 0 : i32
    return %c0_i32, %c0_i32_0 : i32, i32
  }
  func.func @transform_13(%arg0: i32) -> (i32, i32) {
    %c0_i32 = arith.constant 0 : i32
    %c0_i32_0 = arith.constant 0 : i32
    %c0_i32_1 = arith.constant 0 : i32
    return %c0_i32, %c0_i32_0 : i32, i32
  }
  func.func @transform_14(%arg0: i32) -> (i32, i32) {
    %c0_i32 = arith.constant 0 : i32
    %c0_i32_0 = arith.constant 0 : i32
    %c0_i32_1 = arith.constant 0 : i32
    return %c0_i32, %c0_i32_0 : i32, i32
  }
  func.func @transform_15(%arg0: i32) -> (i32, i32) {
    %c0_i32 = arith.constant 0 : i32
    %c0_i32_0 = arith.constant 0 : i32
    %c0_i32_1 = arith.constant 0 : i32
    return %c0_i32, %c0_i32_0 : i32, i32
  }
  func.func @transform_16(%arg0: i32) -> (i32, i32) {
    %c0_i32 = arith.constant 0 : i32
    %c0_i32_0 = arith.constant 0 : i32
    %c0_i32_1 = arith.constant 0 : i32
    return %c0_i32, %c0_i32_0 : i32, i32
  }
  func.func @transform_17(%arg0: i32) -> (i32, i32, i32) {
    %c0_i32 = arith.constant 0 : i32
    %c0_i32_0 = arith.constant 0 : i32
    %c0_i32_1 = arith.constant 0 : i32
    return %arg0, %c0_i32, %c0_i32_0 : i32, i32, i32
  }
}

</mosaic_0001>

<bundles_post_ra>
// kernel: tpu_custom_call.1
= control target key start
LH: loop header
LB: loop body
LE: loop exit
PB: predicated region body
PF: predicated region fallthrough
CT: control target
= control target key end

     0   :  { %s2065_s0 = inlined_call_operand.vmem [shape: f32[2,8,32], index: 0, kind: input, shape index: {}]   ;;  %s2066_s1 = inlined_call_operand.vmem [shape: bf16[32,32], index: 1, kind: input, shape index: {}]   ;;  %s2067_s2 = inlined_call_operand.vmem [shape: bf16[32,32], index: 2, kind: input, shape index: {}]   ;;  %s2068_s3 = inlined_call_operand.vmem [shape: bf16[32,32], index: 3, kind: input, shape index: {}]   ;;  %s2069_s4 = inlined_call_operand.hbm [shape: f32[1,32], index: 4, kind: input, shape index: {}]   ;;  %s2070_s5 = inlined_call_operand.hbm [shape: f32[1,32], index: 5, kind: input, shape index: {}]   ;;  %s2071_s6 = inlined_call_operand.hbm [shape: f32[1,32], index: 6, kind: input, shape index: {}]   ;;  %s2072_s7 = inlined_call_operand.vmem [shape: bf16[4,8,32], index: 7, kind: input, shape index: {}]   ;;  %s2073_s8 = inlined_call_operand.hbm [shape: f32[1,32], index: 8, kind: input, shape index: {}]   ;;  %s2074_s9 = inlined_call_operand.hbm [shape: bf16[32,128], index: 9, kind: input, shape index: {}]   ;;  %s2075_s10 = inlined_call_operand.hbm [shape: f32[1,128], index: 10, kind: input, shape index: {}]   ;;  %s2076_s11 = inlined_call_operand.vmem [shape: bf16[128,32], index: 11, kind: input, shape index: {}]   ;;  %s2077_s12 = inlined_call_operand.hbm [shape: f32[1,32], index: 12, kind: input, shape index: {}]   ;;  %s2078_s13 = inlined_call_operand.vmem [shape: bf16[8,32], index: 13, kind: input, shape index: {}]   ;;  %s2079_s14 = inlined_call_operand.vmem [shape: bf16[8,32], index: 14, kind: input, shape index: {}]   ;;  %s2080_s15 = inlined_call_operand.vmem [shape: bf16[8,32], index: 15, kind: input, shape index: {}]   ;;  %s2081_s16 = inlined_call_operand.hbm [shape: bf16[8,32], index: 16, kind: input, shape index: {}]   ;;  %s2082_s17 = inlined_call_operand.hbm [shape: f32[2,8,32], index: 17, kind: output, shape index: {}]  }
   0x1   :  { %2085 = sst [smem:[#allocation23_spill]] %s2065_s0 }
   0x2   :  { %2086 = sst [smem:[#allocation24_spill]] %s2066_s1 }
   0x3   :  { %22 = vsyncpa [#allocation3], 0 }
   0x4   :  { %23 = vsyncpa [#allocation6], 0 }
   0x5   :  { %24 = vsyncpa [#allocation9], 0 }
   0x6   :  { %25 = vsyncpa [#allocation12], 0 }
   0x7   :  { %26 = vsyncpa [#allocation15], 0  ;;  %s52_s26 = sshll.u32 %s2070_s5, 4  ;;  %s53_s26 = int_to_ptr.hbm [resolvable:$true] %s52_s26 }
   0x8   :  { %27 = vsyncpa [#allocation4], 0  ;;  %s1691_s27 = smov [#allocation5]   ;;  %s76_s30 = sshll.u32 %s2073_s8, 4  ;;  %s77_s30 = int_to_ptr.hbm [resolvable:$true] %s76_s30 }
   0x9   :  { %s54_s28 = sshll.u32 %s1691_s27, 4  ;;  %s1692_s18 = smov [#allocation8]   ;;  %s55_s28 = int_to_ptr.vmem [resolvable:$true] %s54_s28 }
   0xa   :  { %57 = dma.hbm_to_vmem [thread:$0]  %s53_s26, 16, %s55_s28, [#allocation6]  }
   0xb   :  { %s78_s19 = sshll.u32 %s1692_s18, 4  ;;  %s100_s21 = sshll.u32 %s2075_s10, 4  ;;  %s79_s19 = int_to_ptr.vmem [resolvable:$true] %s78_s19  ;;  %s101_s21 = int_to_ptr.hbm [resolvable:$true] %s100_s21 }
   0xc   :  { %81 = dma.hbm_to_vmem [thread:$0]  %s77_s30, 16, %s79_s19, [#allocation9]  }
   0xd   :  { %s41_s23 = sshll.u32 %s2069_s4, 4  ;;  %s1693_s24 = smov [#allocation11]   ;;  %s42_s23 = int_to_ptr.hbm [resolvable:$true] %s41_s23 }
   0xe   :  { %s102_s25 = sshll.u32 %s1693_s24, 4  ;;  %s1694_s8 = smov [#allocation2]   ;;  %s103_s25 = int_to_ptr.vmem [resolvable:$true] %s102_s25 }
   0xf   :  { %105 = dma.hbm_to_vmem [thread:$0]  %s101_s21, 16, %s103_s25, [#allocation12]  }
  0x10   :  { %s43_s26 = sshll.u32 %s1694_s8, 4  ;;  %s63_s29 = sshll.u32 %s2071_s6, 4  ;;  %s44_s26 = int_to_ptr.vmem [resolvable:$true] %s43_s26  ;;  %s64_s29 = int_to_ptr.hbm [resolvable:$true] %s63_s29 }
  0x11   :  { %46 = dma.hbm_to_vmem [thread:$0]  %s42_s23, 16, %s44_s26, [#allocation3]  }
  0x12   :  { %s86_s30 = sshll.u32 %s2074_s9, 4  ;;  %s1695_s18 = smov [#allocation7]   ;;  %s87_s30 = int_to_ptr.hbm [resolvable:$true] %s86_s30 }
  0x13   :  { %s65_s4 = sshll.u32 %s1695_s18, 4  ;;  %s1696_s19 = smov [#allocation10]   ;;  %s66_s4 = int_to_ptr.vmem [resolvable:$true] %s65_s4 }
  0x14   :  { %68 = dma.hbm_to_vmem [thread:$0]  %s64_s29, 16, %s66_s4, [#allocation6]  }
  0x15   :  { %s88_s1 = sshll.u32 %s1696_s19, 4  ;;  %s1697_s20 = smov 64   ;;  %s89_s1 = int_to_ptr.vmem [resolvable:$true] %s88_s1 }
  0x16   :  { %s1698_s21 = smov 4   ;;  %s113_s22 = sshll.u32 %s2077_s12, 4  ;;  %s114_s22 = int_to_ptr.hbm [resolvable:$true] %s113_s22 }
  0x17   :  { %94 = dma.hbm_to_vmem [thread:$0]  %s87_s30, 256, %s89_s1, [#allocation9], %s1697_s20, %s1697_s20, %s1698_s21  }
  0x18   :  { %s1699_s23 = smov [#allocation13]   ;;  %s130_s8 = sshll.u32 %s2081_s16, 4  ;;  %s131_s8 = int_to_ptr.hbm [resolvable:$true] %s130_s8 }
  0x19   :  { %s115_s24 = sshll.u32 %s1699_s23, 4  ;;  %s1700_s26 = smov [#allocation14]   ;;  %s116_s24 = int_to_ptr.vmem [resolvable:$true] %s115_s24 }
  0x1a   :  { %118 = dma.hbm_to_vmem [thread:$0]  %s114_s22, 16, %s116_s24, [#allocation12]  }
  0x1b   :  { %s132_s27 = sshll.u32 %s1700_s26, 4  ;;  %s133_s27 = int_to_ptr.vmem [resolvable:$true] %s132_s27 }
  0x1c   :  { %135 = dma.hbm_to_vmem [thread:$0]  %s131_s8, 64, %s133_s27, [#allocation15]  }
  0x1d   :  { %1679 = dma.done.wait [#allocation3], 16  }
  0x1e   :  { %1680 = vsyncadd [#allocation3], 4294967280 }
  0x1f   :  { %1681 = dma.done.wait [#allocation6], 32  }
  0x20   :  { %1682 = vsyncadd [#allocation6], 4294967264 }
  0x21   :  { %1683 = dma.done.wait [#allocation9], 272  }
  0x22   :  { %1684 = vsyncadd [#allocation9], 4294967024 }
  0x23   :  { %1685 = dma.done.wait [#allocation12], 32  }
  0x24   :  { %1686 = vsyncadd [#allocation12], 4294967264 }
  0x25   :  { %1687 = dma.done.wait [#allocation15], 64  }
  0x26   :  { %1688 = vsyncadd [#allocation15], 4294967232  ;;  %s2087_s29 = sld [smem:[#allocation24_spill]]  ;;  %v1381_v4 = vld [vmem:[%s2067_s2 + $0x8] sm:$0xff]  ;;  %v1380_v5 = vld [vmem:[%s2067_s2] sm:$0xff]  ;;  %vm192_vm0 = vcmask 261120  }
  0x27   :  { %s2088_s18 = sld [smem:[#allocation23_spill]]  ;;  %236 = vmatpush.bf16.msra.mxu1 %v1381_v4  ;;  %v1383_v7 = vld [vmem:[%s2068_s3 + $0x8] sm:$0xff]  ;;  %v1382_v8 = vld [vmem:[%s2068_s3] sm:$0xff]  ;;  %s1701_s2 = smov 112   ;;  %vm320_vm1 = vcmask 1043456   ;;  %vm316_vm2 = vcmask 64512  }
  0x28   :  { %270 = vmatpush.bf16.msra.mxu2 %v1383_v7  ;;  %v1413_v9 = vld [vmem:[#allocation2] ss:$0 sm:$0xff]  ;;  %s1702_s9 = smov 120   ;;  %v1862_v15 = vld [vmem:[#allocation5] ss:$0 sm:$0xff]  ;;  %s1703_s3 = smov 104  }
  0x29   :  { %v1865_v18 = vld [vmem:[#allocation7] ss:$0 sm:$0xff]  ;;  %s1266_s12 = sshll.u32 %s2082_s17, 4  ;;  %s1707_s28 = smov 128   ;;  %s1267_s12 = int_to_ptr.hbm [resolvable:$true] %s1266_s12 }
  0x2b   :  { %237 = vmatpush.bf16.msra.mxu1 %v1380_v5 }
  0x2c   :  { %v1379_v0 = vld [vmem:[%s2087_s29 + $0x8] sm:$0xff]  ;;  %v1378_v1 = vld [vmem:[%s2087_s29] sm:$0xff]  ;;  %271 = vmatpush.bf16.msra.mxu2 %v1382_v8  ;;  %s1708_s29 = smov 8  }
  0x2d   :  { %v1832_v2 = vld [vmem:[%s2088_s18] sm:$0xff]  ;;  %v1837_v3 = vld [vmem:[%s2088_s18 + $0x8] sm:$0xff]  ;;  %202 = vmatpush.bf16.msra.mxu0 %v1379_v0 }
  0x2e   :  { %v171_v6 = vpack.c.bf16 %v1837_v3, %v1832_v2 }
  0x30   :  { %1300 = vmatmul.msk.bf16.vlgmr.msra.gmra.mxu1 %vm192_vm0, %v171_v6  ;;  %1309 = vmatmul.msk.bf16.vlgmr.msra.gmra.mxu2 %vm192_vm0, %v171_v6 }
  0x31   :  { %203 = vmatpush.bf16.msra.mxu0 %v1378_v1 }
  0x34   :  { %1291 = vmatmul.msk.bf16.vlgmr.msra.gmra.mxu0 %vm192_vm0, %v171_v6 }
  0xad   :  { %v239_v16 = vpop.f32.mrf.mxu1 }
  0xae   :  { %v240_v17 = vadd.f32 %v1862_v15, %v239_v16 }
  0xb1   :  { %v205_v10 = vpop.f32.mrf.mxu0 }
  0xb2   :  { %v206_v11 = vadd.f32 %v1413_v9, %v205_v10 }
  0xb3   :  { %v273_v19 = vpop.f32.mrf.mxu2 }
  0xb4   :  { %v278_v12 = vpack.c.bf16 %v206_v11, %v206_v11  ;;  %v274_v20 = vadd.f32 %v1865_v18, %v273_v19 }
  0xb5   :  { %v241_v0 = vpop.f32.mrf.mxu1 }
  0xb6   :  { %v371_v13 = vunpack.c.l.b16 %v278_v12  ;;  %v315_v21 = vpack.c.bf16 %v274_v20, %v274_v20  ;;  %v242_v1 = vadd.f32 %v1862_v15, %v241_v0 }
  0xb8   :  { %v1856_v14 = vpack.c.b16 %v371_v13, %v371_v13  ;;  %v407_v23 = vunpack.c.l.b16 %v315_v21  ;;  %v353_v49 = vsel %vm320_vm1, %v315_v21, 0  ;;  %v369_v21 = vld [vmem:[%s2072_s7] sm:$0xf] }
  0xb9   :  { %v207_v22 = vpop.f32.mrf.mxu0  ;;  %362 = vmatpush.bf16.msra.mxu3 %v353_v49 }
  0xba   :  { %471 = vrot.lane.b32.xlu1 %v1856_v14, %s1701_s2  ;;  %373 = vrot.lane.b32.xlu0 %v1856_v14, %s1702_s9  ;;  %v208_v24 = vadd.f32 %v1413_v9, %v207_v22  ;;  %v1868_v25 = vpack.c.b16 %v407_v23, %v407_v23  ;;  %v456_v22 = vsel %vm320_vm1, %v369_v21, 0 }
  0xbc   :  { %v1870_v26 = vpack.c.bf16 %v208_v24, %v208_v24 }
  0xbd   :  { %465 = vmatpush.bf16.msrb.mxu3 %v456_v22 }
  0xbe   :  { %v715_v27 = vunpack.c.l.b16 %v1870_v26 }
  0xc0   :  { %v1875_v28 = vpack.c.b16 %v715_v27, %v715_v27 }
  0xdc   :  { %279 = vxpose.xlu0.b32.start.end [1/1] (short) (narrow) %v240_v17, 32 }
 0x12c   :  { %v374_v29 = vpop.permute.xlu0 %373  ;;  %v472_v39 = vpop.permute.xlu1 %471 }
 0x162   :  { %504 = vrot.lane.b32.xlu0 %v1868_v25, %s1701_s2 }
 0x16a   :  { %717 = vrot.lane.b32.xlu0 %v1875_v28, %s1702_s9 }
 0x172   :  { %807 = vrot.lane.b32.xlu0 %v1875_v28, %s1701_s2 }
 0x180   :  { %v295_v30 = vpop.trf.xlu0 }
 0x181   :  { %v311_v31 = vpack.c.bf16 %v295_v30, %v295_v30  ;;  %v1314_v30 = vld [vmem:[%s2072_s7 + $0x4] sm:$0xf] }
 0x183   :  { %v322_v32 = vsel %vm320_vm1, %v311_v31, 0  ;;  %v437_v31 = vsel %vm320_vm1, %v1314_v30, 0 }
 0x184   :  { %331 = vmatpush.bf16.msrb.mxu0 %v322_v32  ;;  %446 = vmatpush.bf16.msrb.mxu2 %v437_v31 }
 0x187   :  { %1310 = vmatmul.msk.bf16.vlgmr.msrb.gmra.mxu0 %vm316_vm2, %v278_v12 }
 0x188   :  { %v296_v33 = vpop.trf.xlu0 }
 0x189   :  { %v312_v34 = vpack.c.bf16 %v296_v33, %v296_v33 }
 0x18b   :  { %v379_v35 = vsel %vm320_vm1, %v312_v34, 0  ;;  %v275_v34 = vpop.f32.mrf.mxu2 }
 0x18c   :  { %388 = vmatpush.bf16.msra.mxu0 %v379_v35  ;;  %v276_v35 = vadd.f32 %v1865_v18, %v275_v34 }
 0x190   :  { %v297_v36 = vpop.trf.xlu0 }
 0x191   :  { %v313_v37 = vpack.c.bf16 %v297_v36, %v297_v36 }
 0x193   :  { %v477_v38 = vsel %vm320_vm1, %v313_v37, 0  ;;  %v662_v37 = vpack.c.bf16 %v276_v35, %v276_v35 }
 0x194   :  { %486 = vmatpush.bf16.msrb.mxu0 %v477_v38 }
 0x197   :  { %1312 = vmatmul.msk.bf16.vlgmr.msra.gmra.mxu0 %vm316_vm2, %v374_v29 }
 0x198   :  { %v298_v5 = vpop.trf.xlu0 }
 0x199   :  { %v314_v19 = vpack.c.bf16 %v298_v5, %v298_v5 }
 0x19b   :  { %v554_v20 = vsel %vm320_vm1, %v314_v19, 0 }
 0x1a7   :  { %1317 = vmatmul.msk.bf16.vlgmr.msrb.gmra.mxu0 %vm316_vm2, %v472_v39 }
 0x1d4   :  { %v505_v8 = vpop.permute.xlu0 %504 }
 0x1d5   :  { %v510_v9 = vsel %vm320_vm1, %v505_v8, 0 }
 0x1dc   :  { %v718_v34 = vpop.permute.xlu0 %717 }
 0x1e4   :  { %v808_v35 = vpop.permute.xlu0 %807 }
 0x204   :  { %v333_v40 = vpop.f32.mrf.mxu0 }
 0x205   :  { %v337_v45 = vsel %vm316_vm2, %v333_v40, -inf }
 0x20c   :  { %v335_v41 = vpop.f32.mrf.mxu0 }
 0x214   :  { %v390_v42 = vpop.f32.mrf.mxu0 }
 0x215   :  { %v394_v43 = vsel %vm316_vm2, %v390_v42, -inf }
 0x216   :  { %395 = vmax.xlane.f32.xlu1 %v394_v43  ;;  %v1319_v43 = vld [vmem:[%s2072_s7 + $0x8] sm:$0xf] }
 0x21c   :  { %v392_v44 = vpop.f32.mrf.mxu0 }
 0x21d   :  { %v532_v44 = vsel %vm320_vm1, %v1319_v43, 0 }
 0x21e   :  { %338 = vmax.xlane.f32.xlu1 %v337_v45  ;;  %541 = vmatpush.bf16.msra.mxu2 %v532_v44 }
 0x224   :  { %v488_v46 = vpop.f32.mrf.mxu0 }
 0x225   :  { %v492_v47 = vsel %vm316_vm2, %v488_v46, -inf }
 0x226   :  { %493 = vmax.xlane.f32.xlu2 %v492_v47 }
 0x22c   :  { %v490_v48 = vpop.f32.mrf.mxu0 }
 0x289   :  { %v396_v50 = vpop.xlane.xlu1 %395 }
 0x28a   :  { %v397_v51 = vsub.f32 %v390_v42, %v396_v50 }
 0x28c   :  { %v398_v52 = vmul.f32 1.442695, %v397_v51 }
 0x28e   :  { %1419 = vpow2.f32 %v398_v52 }
 0x291   :  { %v339_v53 = vpop.xlane.xlu1 %338 }
 0x292   :  { %v340_v54 = vsub.f32 %v333_v40, %v339_v53  ;;  %v698_v40 = vsel %vm320_vm1, %v662_v37, 0 }
 0x294   :  { %v1420_v55 = vpop.eup %1419  ;;  %v341_v56 = vmul.f32 1.442695, %v340_v54 }
 0x295   :  { %v400_v57 = vsel %vm316_vm2, %v1420_v55, 0.0 }
 0x296   :  { %1421 = vpow2.f32 %v341_v56  ;;  %401 = vadd.xlane.f32.xlu2 %v400_v57 }
 0x299   :  { %v494_v60 = vpop.xlane.xlu2 %493 }
 0x29a   :  { %v495_v61 = vsub.f32 %v488_v46, %v494_v60 }
 0x29c   :  { %v1422_v58 = vpop.eup %1421  ;;  %v496_v62 = vmul.f32 1.442695, %v495_v61 }
 0x29d   :  { %v343_v59 = vsel %vm316_vm2, %v1422_v58, 0.0 }
 0x29e   :  { %344 = vadd.xlane.f32.xlu1 %v343_v59  ;;  %1423 = vpow2.f32 %v496_v62 }
 0x2a4   :  { %v1424_v63 = vpop.eup %1423 }
 0x2a5   :  { %v498_v4 = vsel %vm316_vm2, %v1424_v63, 0.0 }
 0x2ae   :  { %409 = vrot.lane.b32.xlu2 %v1868_v25, %s1702_s9 }
 0x2d7   :  { %499 = vadd.xlane.f32.xlu2 %v498_v4 }
 0x2d8   :  { %626 = vxpose.xlu1.b32.start.end [1/1] (short) (narrow) %v242_v1, 32 }
 0x2ef   :  { %548 = vrot.lane.b32.xlu2 %v1856_v14, %s1703_s3 }
 0x309   :  { %v402_v6 = vpop.xlane.xlu2 %401 }
 0x30a   :  { %1425 = vrcp.f32 %v402_v6 }
 0x310   :  { %v1426_v7 = vpop.eup %1425 }
 0x311   :  { %v404_v10 = vmul.f32 %v1426_v7, %v1420_v55  ;;  %v345_v11 = vpop.xlane.xlu1 %344  ;;  %v410_v12 = vpop.permute.xlu2 %409 }
 0x312   :  { %1427 = vrcp.f32 %v345_v11  ;;  %v415_v13 = vsel %vm320_vm1, %v410_v12, 0  ;;  %v751_v11 = vunpack.c.l.b16 %v662_v37 }
 0x313   :  { %424 = vmatpush.bf16.msrb.mxu1 %v415_v13  ;;  %v405_v15 = vpack.c.bf16 %v404_v10, %v404_v10 }
 0x314   :  { %v1932_v12 = vpack.c.b16 %v751_v11, %v751_v11 }
 0x316   :  { %1313 = vmatmul.msk.bf16.vlgmr.msrb.gmra.mxu1 %vm316_vm2, %v405_v15 }
 0x317   :  { %519 = vmatpush.bf16.msra.mxu1 %v510_v9 }
 0x318   :  { %v1428_v16 = vpop.eup %1427 }
 0x319   :  { %v347_v14 = vmul.f32 %v1428_v16, %v1422_v58 }
 0x31b   :  { %v348_v17 = vpack.c.bf16 %v347_v14, %v347_v14 }
 0x31d   :  { %1311 = vmatmul.msk.bf16.vlgmr.msra.gmra.mxu3 %vm316_vm2, %v348_v17 }
 0x31e   :  { %563 = vmatpush.bf16.msra.mxu3 %v554_v20 }
 0x34a   :  { %v500_v23 = vpop.xlane.xlu2 %499 }
 0x34b   :  { %1429 = vrcp.f32 %v500_v23 }
 0x351   :  { %v1430_v24 = vpop.eup %1429 }
 0x352   :  { %v502_v27 = vmul.f32 %v1430_v24, %v1424_v63  ;;  %v549_v42 = vpop.permute.xlu2 %548 }
 0x354   :  { %v503_v29 = vpack.c.bf16 %v502_v27, %v502_v27 }
 0x356   :  { %1318 = vmatmul.msk.bf16.vlgmr.msra.gmra.mxu1 %vm316_vm2, %v503_v29 }
 0x37c   :  { %v642_v18 = vpop.trf.xlu1 }
 0x37d   :  { %v658_v45 = vpack.c.bf16 %v642_v18, %v642_v18 }
 0x37f   :  { %v667_v46 = vsel %vm320_vm1, %v658_v45, 0 }
 0x384   :  { %v643_v13 = vpop.trf.xlu1 }
 0x38c   :  { %v644_v15 = vpop.trf.xlu1 }
 0x38d   :  { %v660_v29 = vpack.c.bf16 %v644_v15, %v644_v15 }
 0x393   :  { %v426_v32 = vpop.f32.mrf.mxu1 }
 0x394   :  { %v430_v33 = vpack.c.bf16 %v426_v32, %v426_v32  ;;  %v645_v16 = vpop.trf.xlu1 }
 0x395   :  { %v661_v19 = vpack.c.bf16 %v645_v16, %v645_v16 }
 0x396   :  { %1315 = vmatmul.msk.bf16.vlgmr.msrb.gmra.mxu2 %vm316_vm2, %v430_v33  ;;  %v813_v33 = vsel %vm320_vm1, %v660_v29, 0 }
 0x397   :  { %676 = vmatpush.bf16.msrb.mxu2 %v667_v46  ;;  %v885_v23 = vsel %vm320_vm1, %v661_v19, 0 }
 0x39b   :  { %v428_v36 = vpop.f32.mrf.mxu1 }
 0x39c   :  { %v1323_v36 = vld [vmem:[%s2072_s7 + $0xc] sm:$0xf] }
 0x39d   :  { %v1952_v37 = vsel %vm320_vm1, %v1323_v36, 0 }
 0x39e   :  { %618 = vmatpush.bf16.msrb.mxu1 %v1952_v37 }
 0x3a0   :  { %v364_v38 = vpop.f32.mrf.mxu3 }
 0x3a1   :  { %v368_v39 = vpack.c.bf16 %v364_v38, %v364_v38 }
 0x3a3   :  { %1316 = vmatmul.msk.bf16.vlgmr.msrb.gmra.mxu3 %vm316_vm2, %v368_v39 }
 0x3a4   :  { %707 = vmatpush.bf16.msrb.mxu3 %v698_v40 }
 0x3a8   :  { %v366_v41 = vpop.f32.mrf.mxu3 }
 0x3b3   :  { %1321 = vmatmul.msk.bf16.vlgmr.msra.gmra.mxu3 %vm316_vm2, %v549_v42 }
 0x3b4   :  { %801 = vmatpush.bf16.msra.mxu3 %v456_v22 }
 0x3d3   :  { %v521_v47 = vpop.f32.mrf.mxu1 }
 0x3d4   :  { %v525_v48 = vpack.c.bf16 %v521_v47, %v521_v47 }
 0x3d6   :  { %1320 = vmatmul.msk.bf16.vlgmr.msra.gmra.mxu2 %vm316_vm2, %v525_v48 }
 0x3d7   :  { %785 = vmatpush.bf16.msra.mxu2 %v437_v31 }
 0x3db   :  { %v523_v49 = vpop.f32.mrf.mxu1 }
 0x3e6   :  { %1325 = vmatmul.msk.bf16.vlgmr.msrb.gmra.mxu2 %vm316_vm2, %v1870_v26 }
 0x3e7   :  { %872 = vmatpush.bf16.msrb.mxu2 %v532_v44 }
 0x419   :  { %v448_v50 = vpop.f32.mrf.mxu2 }
 0x421   :  { %v450_v51 = vpop.f32.mrf.mxu2 }
 0x426   :  { %v467_v52 = vpop.f32.mrf.mxu3 }
 0x427   :  { %v468_v53 = vadd.f32 %v467_v52, %v448_v50 }
 0x42e   :  { %v469_v54 = vpop.f32.mrf.mxu3 }
 0x436   :  { %v565_v55 = vpop.f32.mrf.mxu3 }
 0x437   :  { %v569_v63 = vsel %vm316_vm2, %v565_v55, -inf }
 0x43e   :  { %v567_v56 = vpop.f32.mrf.mxu3 }
 0x459   :  { %v543_v57 = vpop.f32.mrf.mxu2 }
 0x45a   :  { %v1926_v58 = vadd.f32 %v543_v57, %v468_v53 }
 0x461   :  { %v545_v59 = vpop.f32.mrf.mxu2 }
 0x469   :  { %v678_v60 = vpop.f32.mrf.mxu2 }
 0x46a   :  { %v682_v61 = vsel %vm316_vm2, %v678_v60, -inf }
 0x46b   :  { %683 = vmax.xlane.f32.xlu2 %v682_v61 }
 0x471   :  { %v680_v62 = vpop.f32.mrf.mxu2 }
 0x473   :  { %570 = vmax.xlane.f32.xlu2 %v569_v63 }
 0x4de   :  { %v684_v26 = vpop.xlane.xlu2 %683 }
 0x4df   :  { %v685_v0 = vsub.f32 %v678_v60, %v684_v26 }
 0x4e1   :  { %v686_v1 = vmul.f32 1.442695, %v685_v0 }
 0x4e3   :  { %1431 = vpow2.f32 %v686_v1 }
 0x4e6   :  { %v571_v4 = vpop.xlane.xlu2 %570 }
 0x4e7   :  { %v572_v5 = vsub.f32 %v565_v55, %v571_v4 }
 0x4e9   :  { %v1432_v6 = vpop.eup %1431  ;;  %v573_v7 = vmul.f32 1.442695, %v572_v5 }
 0x4ea   :  { %v688_v8 = vsel %vm316_vm2, %v1432_v6, 0.0 }
 0x4eb   :  { %1433 = vpow2.f32 %v573_v7  ;;  %689 = vadd.xlane.f32.xlu1 %v688_v8 }
 0x4f1   :  { %v1434_v9 = vpop.eup %1433 }
 0x4f2   :  { %v575_v10 = vsel %vm316_vm2, %v1434_v9, 0.0 }
 0x4f3   :  { %576 = vadd.xlane.f32.xlu2 %v575_v10 }
 0x504   :  { %840 = vrot.lane.b32.xlu1 %v1932_v12, %s1701_s2 }
 0x50b   :  { %581 = vrot.lane.b32.xlu2 %v1868_v25, %s1703_s3  ;;  %v659_v25 = vpack.c.bf16 %v643_v13, %v643_v13 }
 0x50d   :  { %v723_v31 = vsel %vm320_vm1, %v659_v25, 0 }
 0x513   :  { %879 = vrot.lane.b32.xlu2 %v1875_v28, %s1703_s3 }
 0x55e   :  { %v690_v14 = vpop.xlane.xlu1 %689 }
 0x55f   :  { %1435 = vrcp.f32 %v690_v14 }
 0x565   :  { %v1436_v17 = vpop.eup %1435 }
 0x566   :  { %v692_v20 = vmul.f32 %v1436_v17, %v1432_v6  ;;  %v577_v21 = vpop.xlane.xlu2 %576  ;;  %v1969_v6 = vld [vmem:[#allocation8] ss:$0 sm:$0xff] }
 0x567   :  { %1437 = vrcp.f32 %v577_v21 }
 0x568   :  { %v693_v22 = vpack.c.bf16 %v692_v20, %v692_v20 }
 0x56a   :  { %1326 = vmatmul.msk.bf16.vlgmr.msrb.gmra.mxu3 %vm316_vm2, %v693_v22 }
 0x56b   :  { %894 = vmatpush.bf16.msrb.mxu3 %v885_v23 }
 0x56d   :  { %v1438_v24 = vpop.eup %1437 }
 0x56e   :  { %v579_v27 = vmul.f32 %v1438_v24, %v1434_v9  ;;  %v582_v28 = vpop.permute.xlu2 %581 }
 0x56f   :  { %v587_v30 = vsel %vm320_vm1, %v582_v28, 0 }
 0x570   :  { %v580_v32 = vpack.c.bf16 %v579_v27, %v579_v27  ;;  %596 = vmatpush.bf16.msra.mxu0 %v587_v30  ;;  %v1704_v27 = vmov 32.0  }
 0x573   :  { %1322 = vmatmul.msk.bf16.vlgmr.msra.gmra.mxu0 %vm316_vm2, %v580_v32  ;;  %v1705_v32 = vmov 8.0  }
 0x574   :  { %732 = vmatpush.bf16.msrb.mxu0 %v723_v31 }
 0x576   :  { %v880_v44 = vpop.permute.xlu2 %879  ;;  %v841_v17 = vpop.permute.xlu1 %840 }
 0x577   :  { %v846_v21 = vsel %vm320_vm1, %v841_v17, 0 }
 0x578   :  { %822 = vmatpush.bf16.msra.mxu0 %v813_v33 }
 0x583   :  { %1327 = vmatmul.msk.bf16.vlgmr.msrb.gmra.mxu0 %vm316_vm2, %v718_v34 }
 0x593   :  { %1331 = vmatmul.msk.bf16.vlgmr.msra.gmra.mxu0 %vm316_vm2, %v808_v35 }
 0x5ed   :  { %v709_v38 = vpop.f32.mrf.mxu3 }
 0x5ee   :  { %v713_v39 = vpack.c.bf16 %v709_v38, %v709_v38 }
 0x5f0   :  { %v598_v40 = vpop.f32.mrf.mxu0  ;;  %1330 = vmatmul.msk.bf16.vlgmr.msra.gmra.mxu3 %vm316_vm2, %v713_v39 }
 0x5f1   :  { %v602_v41 = vpack.c.bf16 %v598_v40, %v598_v40 }
 0x5f3   :  { %1324 = vmatmul.msk.bf16.vlgmr.msrb.gmra.mxu1 %vm316_vm2, %v602_v41 }
 0x5f5   :  { %v711_v42 = vpop.f32.mrf.mxu3 }
 0x5f8   :  { %v600_v43 = vpop.f32.mrf.mxu0 }
 0x600   :  { %v734_v18 = vpop.f32.mrf.mxu0  ;;  %1334 = vmatmul.msk.bf16.vlgmr.msrb.gmra.mxu3 %vm316_vm2, %v880_v44 }
 0x601   :  { %v738_v45 = vsel %vm316_vm2, %v734_v18, -inf }
 0x602   :  { %739 = vmax.xlane.f32.xlu0 %v738_v45 }
 0x608   :  { %v736_v46 = vpop.f32.mrf.mxu0 }
 0x610   :  { %v824_v47 = vpop.f32.mrf.mxu0 }
 0x611   :  { %v828_v48 = vsel %vm316_vm2, %v824_v47, -inf }
 0x612   :  { %829 = vmax.xlane.f32.xlu2 %v828_v48 }
 0x618   :  { %v826_v49 = vpop.f32.mrf.mxu0 }
 0x670   :  { %v620_v50 = vpop.f32.mrf.mxu1 }
 0x671   :  { %v624_v51 = vadd.f32 %v620_v50, %v1926_v58 }
 0x673   :  { %v1961_v52 = vpop.f32.mrf.mxu3  ;;  %v951_v5 = vadd.f32 %v624_v51, %v1832_v2 }
 0x675   :  { %v740_v53 = vpop.xlane.xlu0 %739  ;;  %v957_v7 = vadd.f32 %v1969_v6, %v951_v5 }
 0x676   :  { %v741_v54 = vsub.f32 %v734_v18, %v740_v53 }
 0x677   :  { %v963_v8 = vsel %vm192_vm0, %v957_v7, 0.0 }
 0x678   :  { %v742_v55 = vmul.f32 1.442695, %v741_v54  ;;  %v622_v56 = vpop.f32.mrf.mxu1 }
 0x67a   :  { %1439 = vpow2.f32 %v742_v55 }
 0x67b   :  { %v805_v57 = vpop.f32.mrf.mxu3 }
 0x680   :  { %v1440_v59 = vpop.eup %1439 }
 0x681   :  { %v744_v60 = vsel %vm316_vm2, %v1440_v59, 0.0 }
 0x682   :  { %745 = vadd.xlane.f32.xlu2 %v744_v60 }
 0x683   :  { %v896_v61 = vpop.f32.mrf.mxu3 }
 0x684   :  { %v900_v62 = vsel %vm316_vm2, %v896_v61, -inf }
 0x685   :  { %901 = vmax.xlane.f32.xlu0 %v900_v62  ;;  %v830_v63 = vpop.xlane.xlu2 %829 }
 0x686   :  { %v831_v26 = vsub.f32 %v824_v47, %v830_v63 }
 0x688   :  { %v832_v0 = vmul.f32 1.442695, %v831_v26 }
 0x68a   :  { %1441 = vpow2.f32 %v832_v0 }
 0x68b   :  { %v898_v58 = vpop.f32.mrf.mxu3 }
 0x690   :  { %v1442_v1 = vpop.eup %1441 }
 0x691   :  { %v834_v4 = vsel %vm316_vm2, %v1442_v1, 0.0 }
 0x692   :  { %835 = vadd.xlane.f32.xlu2 %v834_v4 }
 0x699   :  { %753 = vrot.lane.b32.xlu0 %v1932_v12, %s1702_s9 }
 0x6c3   :  { %964 = vadd.xlane.f32.xlu0 %v963_v8 }
 0x6f5   :  { %v746_v13 = vpop.xlane.xlu2 %745 }
 0x6f8   :  { %v902_v9 = vpop.xlane.xlu0 %901 }
 0x6f9   :  { %v903_v10 = vsub.f32 %v896_v61, %v902_v9 }
 0x6fb   :  { %v904_v11 = vmul.f32 1.442695, %v903_v10 }
 0x6fd   :  { %1443 = vpow2.f32 %v904_v11 }
 0x6fe   :  { %1445 = vrcp.f32 %v746_v13 }
 0x703   :  { %v1444_v15 = vpop.eup %1443 }
 0x704   :  { %v906_v16 = vsel %vm316_vm2, %v1444_v15, 0.0  ;;  %v1446_v14 = vpop.eup %1445 }
 0x705   :  { %907 = vadd.xlane.f32.xlu2 %v906_v16  ;;  %v748_v2 = vmul.f32 %v1446_v14, %v1440_v59  ;;  %v836_v23 = vpop.xlane.xlu2 %835 }
 0x706   :  { %1447 = vrcp.f32 %v836_v23 }
 0x707   :  { %v749_v22 = vpack.c.bf16 %v748_v2, %v748_v2  ;;  %1449 = vrcp.f32 %v1704_v27 }
 0x708   :  { %1451 = vrcp.f32 %v1705_v32 }
 0x70b   :  { %v754_v19 = vpop.permute.xlu0 %753 }
 0x70c   :  { %v759_v20 = vsel %vm320_vm1, %v754_v19, 0  ;;  %v1448_v25 = vpop.eup %1447 }
 0x70d   :  { %768 = vmatpush.bf16.msra.mxu1 %v759_v20  ;;  %v838_v24 = vmul.f32 %v1448_v25, %v1442_v1  ;;  %v1450_v29 = vpop.eup %1449 }
 0x70e   :  { %v970_v30 = vmul.f32 32.0, %v1450_v29  ;;  %v1452_v34 = vpop.eup %1451  ;;  %vm974_vm3 = vweird.f32 %v1450_v29 }
 0x70f   :  { %v839_v28 = vpack.c.bf16 %v838_v24, %v838_v24  ;;  %v991_v36 = vmul.f32 8.0, %v1452_v34  ;;  %vm995_vm4 = vweird.f32 %v1452_v34 }
 0x710   :  { %1328 = vmatmul.msk.bf16.vlgmr.msra.gmra.mxu1 %vm316_vm2, %v749_v22  ;;  %v971_v31 = vsub.f32 1.0, %v970_v30 }
 0x711   :  { %855 = vmatpush.bf16.msrb.mxu1 %v846_v21  ;;  %v992_v39 = vsub.f32 1.0, %v991_v36 }
 0x712   :  { %v972_v33 = vmul.f32 %v1450_v29, %v971_v31 }
 0x713   :  { %v993_v41 = vmul.f32 %v1452_v34, %v992_v39 }
 0x714   :  { %v973_v35 = vadd.f32 %v1450_v29, %v972_v33 }
 0x715   :  { %944 = vmatpush.bf16.msra.mxu1 %v1952_v37  ;;  %v994_v44 = vadd.f32 %v1452_v34, %v993_v41 }
 0x716   :  { %v1981_v37 = vsel %vm974_vm3, %v1450_v29, %v973_v35 }
 0x717   :  { %v1984_v46 = vsel %vm995_vm4, %v1452_v34, %v994_v44 }
 0x71d   :  { %912 = vrot.lane.b32.xlu2 %v1932_v12, %s1703_s3 }
 0x720   :  { %1332 = vmatmul.msk.bf16.vlgmr.msrb.gmra.mxu1 %vm316_vm2, %v839_v28 }
 0x736   :  { %v965_v38 = vpop.xlane.xlu0 %964 }
 0x737   :  { %v976_v40 = vmul.f32 %v1981_v37, %v965_v38 }
 0x739   :  { %v978_v12 = vrot.slane %v976_v40, 4 }
 0x73b   :  { %v979_v42 = vadd.f32 %v978_v12, %v976_v40 }
 0x73d   :  { %v980_v43 = vrot.slane %v979_v42, 2 }
 0x73f   :  { %v981_v18 = vadd.f32 %v980_v43, %v979_v42  ;;  %v1385_v43 = vld [vmem:[#allocation10 + $0x8] sm:$0xff] }
 0x741   :  { %v982_v45 = vrot.slane %v981_v18, 1 }
 0x743   :  { %v983_v47 = vadd.f32 %v982_v45, %v981_v18  ;;  %v1384_v45 = vld [vmem:[#allocation10] sm:$0xff] }
 0x745   :  { %v997_v48 = vmul.f32 %v1984_v46, %v983_v47 }
 0x747   :  { %v1987_v49 = vsub.f32 %v957_v7, %v997_v48 }
 0x749   :  { %v1001_v50 = vmul.f32 %v1987_v49, %v1987_v49 }
 0x74b   :  { %v1003_v51 = vsel %vm192_vm0, %v1001_v50, 0.0 }
 0x74c   :  { %1004 = vadd.xlane.f32.xlu2 %v1003_v51 }
 0x778   :  { %v908_v53 = vpop.xlane.xlu2 %907 }
 0x779   :  { %1453 = vrcp.f32 %v908_v53  ;;  %v1393_v53 = vld [vmem:[%s2076_s11 + $0x38] sm:$0xff] }
 0x77a   :  { %1162 = vmatpush.bf16.msra.mxu3 %v1393_v53 }
 0x77f   :  { %v1454_v54 = vpop.eup %1453 }
 0x780   :  { %v910_v55 = vmul.f32 %v1454_v54, %v1444_v15  ;;  %v913_v56 = vpop.permute.xlu2 %912 }
 0x781   :  { %v918_v57 = vsel %vm320_vm1, %v913_v56, 0  ;;  %v1392_v56 = vld [vmem:[%s2076_s11 + $0x30] sm:$0xff] }
 0x782   :  { %v911_v59 = vpack.c.bf16 %v910_v55, %v910_v55  ;;  %927 = vmatpush.bf16.msrb.mxu0 %v918_v57  ;;  %1163 = vmatpush.bf16.msra.mxu3 %v1392_v56 }
 0x785   :  { %1335 = vmatmul.msk.bf16.vlgmr.msrb.gmra.mxu0 %vm316_vm2, %v911_v59 }
 0x78d   :  { %v770_v60 = vpop.f32.mrf.mxu1 }
 0x78e   :  { %v774_v61 = vpack.c.bf16 %v770_v60, %v770_v60  ;;  %v1391_v60 = vld [vmem:[%s2076_s11 + $0x28] sm:$0xff] }
 0x78f   :  { %1164 = vmatpush.bf16.msra.mxu3 %v1391_v60 }
 0x790   :  { %1329 = vmatmul.msk.bf16.vlgmr.msra.gmra.mxu2 %vm316_vm2, %v774_v61 }
 0x791   :  { %1083 = vmatpush.bf16.msra.mxu2 %v1385_v43 }
 0x795   :  { %v772_v62 = vpop.f32.mrf.mxu1  ;;  %1084 = vmatpush.bf16.msra.mxu2 %v1384_v45 }
 0x796   :  { %v1390_v62 = vld [vmem:[%s2076_s11 + $0x20] sm:$0xff] }
 0x797   :  { %1165 = vmatpush.bf16.msra.mxu3 %v1390_v62 }
 0x79d   :  { %v857_v63 = vpop.f32.mrf.mxu1 }
 0x79e   :  { %v861_v26 = vpack.c.bf16 %v857_v63, %v857_v63 }
 0x7a0   :  { %1333 = vmatmul.msk.bf16.vlgmr.msrb.gmra.mxu2 %vm316_vm2, %v861_v26 }
 0x7a5   :  { %v859_v0 = vpop.f32.mrf.mxu1 }
 0x7bf   :  { %v1005_v29 = vpop.xlane.xlu2 %1004 }
 0x7c0   :  { %v1009_v30 = vmul.f32 %v1005_v29, %v1981_v37 }
 0x7c2   :  { %v1011_v31 = vrot.slane %v1009_v30, 4 }
 0x7c4   :  { %v1012_v32 = vadd.f32 %v1011_v31, %v1009_v30  ;;  %v1418_v30 = vld [vmem:[#allocation13] ss:$0 sm:$0xff] }
 0x7c6   :  { %v1013_v33 = vrot.slane %v1012_v32, 2 }
 0x7c8   :  { %v1014_v34 = vadd.f32 %v1013_v33, %v1012_v32 }
 0x7ca   :  { %v1015_v35 = vrot.slane %v1014_v34, 1 }
 0x7cc   :  { %v1016_v36 = vadd.f32 %v1015_v35, %v1014_v34 }
 0x7ce   :  { %v1023_v38 = vmul.f32 %v1016_v36, %v1984_v46 }
 0x7d0   :  { %v1025_v39 = vadd.f32 1e-05, %v1023_v38 }
 0x7d2   :  { %1455 = vrsqrt.f32 %v1025_v39  ;;  %vm1033_vm6 = vweird.f32 %v1025_v39 }
 0x7d8   :  { %v1456_v44 = vpop.eup %1455 }
 0x7d9   :  { %v1028_v48 = vmul.f32 %v1456_v44, %v1025_v39  ;;  %vm1034_vm5 = vweird.f32 %v1456_v44 }
 0x7da   :  { %vm1035_vm7 = vmor %vm1033_vm6, %vm1034_vm5 }
 0x7db   :  { %v1029_v54 = vmul.f32 %v1456_v44, %v1028_v48 }
 0x7dd   :  { %v1030_v59 = vmul.f32 0.5, %v1029_v54 }
 0x7df   :  { %v1031_v61 = vsub.f32 1.5, %v1030_v59 }
 0x7e1   :  { %v1032_v26 = vmul.f32 %v1456_v44, %v1031_v61 }
 0x802   :  { %v929_v58 = vpop.f32.mrf.mxu0 }
 0x803   :  { %v933_v1 = vpack.c.bf16 %v929_v58, %v929_v58 }
 0x805   :  { %1336 = vmatmul.msk.bf16.vlgmr.msra.gmra.mxu1 %vm316_vm2, %v933_v1  ;;  %v1036_v1 = vsel %vm1035_vm7, %v1456_v44, %v1032_v26 }
 0x80a   :  { %v931_v4 = vpop.f32.mrf.mxu0 }
 0x813   :  { %v787_v5 = vpop.f32.mrf.mxu2 }
 0x814   :  { %v804_v8 = vadd.f32 %v1961_v52, %v787_v5  ;;  %v959_v5 = vld [vmem:[%s2078_s13] sm:$0xf] }
 0x81b   :  { %v789_v7 = vpop.f32.mrf.mxu2 }
 0x823   :  { %v874_v9 = vpop.f32.mrf.mxu2 }
 0x824   :  { %v878_v10 = vadd.f32 %v874_v9, %v804_v8  ;;  %v1047_v8 = vmul.f32 %v1036_v1, %v1987_v49  ;;  %v960_v9 = vunpack.c.l.bf16 %v959_v5  ;;  %v1389_v49 = vld [vmem:[%s2076_s11 + $0x18] sm:$0xff] }
 0x825   :  { %1166 = vmatpush.bf16.msra.mxu3 %v1389_v49 }
 0x82b   :  { %v876_v11 = vpop.f32.mrf.mxu2 }
 0x82c   :  { %v961_v11 = vld [vmem:[%s2079_s14] sm:$0xf] }
 0x882   :  { %v946_v13 = vpop.f32.mrf.mxu1 }
 0x883   :  { %v950_v15 = vadd.f32 %v946_v13, %v878_v10 }
 0x885   :  { %v952_v16 = vadd.f32 %v950_v15, %v1837_v3 }
 0x887   :  { %v958_v14 = vadd.f32 %v1969_v6, %v952_v16  ;;  %v962_v16 = vunpack.c.l.bf16 %v961_v11 }
 0x889   :  { %v966_v17 = vsel %vm192_vm0, %v958_v14, 0.0 }
 0x88a   :  { %967 = vadd.xlane.f32.xlu1 %v966_v17  ;;  %v948_v2 = vpop.f32.mrf.mxu1 }
 0x8fd   :  { %v968_v19 = vpop.xlane.xlu1 %967 }
 0x8fe   :  { %v977_v20 = vmul.f32 %v1981_v37, %v968_v19 }
 0x900   :  { %v984_v21 = vrot.slane %v977_v20, 4 }
 0x902   :  { %v985_v22 = vadd.f32 %v984_v21, %v977_v20  ;;  %v1388_v21 = vld [vmem:[%s2076_s11 + $0x10] sm:$0xff] }
 0x903   :  { %1167 = vmatpush.bf16.msra.mxu3 %v1388_v21 }
 0x904   :  { %v986_v23 = vrot.slane %v985_v22, 2 }
 0x906   :  { %v987_v52 = vadd.f32 %v986_v23, %v985_v22  ;;  %v1387_v22 = vld [vmem:[%s2076_s11 + $0x8] sm:$0xff]  ;;  %v1386_v23 = vld [vmem:[%s2076_s11] sm:$0xff] }
 0x907   :  { %1168 = vmatpush.bf16.msra.mxu3 %v1387_v22 }
 0x908   :  { %v988_v25 = vrot.slane %v987_v52, 1 }
 0x90a   :  { %v989_v24 = vadd.f32 %v988_v25, %v987_v52  ;;  %v1417_v25 = vld [vmem:[#allocation11] ss:$0 sm:$0xff] }
 0x90b   :  { %1169 = vmatpush.bf16.msra.mxu3 %v1386_v23 }
 0x90c   :  { %v998_v27 = vmul.f32 %v1984_v46, %v989_v24 }
 0x90e   :  { %v2003_v28 = vsub.f32 %v958_v14, %v998_v27  ;;  %v1049_v14 = vmul.f32 %v1047_v8, %v960_v9 }
 0x910   :  { %v1002_v3 = vmul.f32 %v2003_v28, %v2003_v28  ;;  %v1051_v2 = vadd.f32 %v1049_v14, %v962_v16 }
 0x912   :  { %v1006_v6 = vsel %vm192_vm0, %v1002_v3, 0.0 }
 0x913   :  { %1007 = vadd.xlane.f32.xlu0 %v1006_v6 }
 0x986   :  { %v1008_v40 = vpop.xlane.xlu0 %1007 }
 0x987   :  { %v1010_v12 = vmul.f32 %v1008_v40, %v1981_v37 }
 0x989   :  { %v1017_v41 = vrot.slane %v1010_v12, 4 }
 0x98b   :  { %v1018_v42 = vadd.f32 %v1017_v41, %v1010_v12 }
 0x98d   :  { %v1019_v18 = vrot.slane %v1018_v42, 2 }
 0x98f   :  { %v1020_v47 = vadd.f32 %v1019_v18, %v1018_v42 }
 0x991   :  { %v1021_v50 = vrot.slane %v1020_v47, 1 }
 0x993   :  { %v1022_v51 = vadd.f32 %v1021_v50, %v1020_v47 }
 0x995   :  { %v1024_v55 = vmul.f32 %v1022_v51, %v1984_v46 }
 0x997   :  { %v1026_v57 = vadd.f32 1e-05, %v1024_v55 }
 0x999   :  { %1457 = vrsqrt.f32 %v1026_v57  ;;  %vm1043_vm9 = vweird.f32 %v1026_v57 }
 0x99f   :  { %v1458_v63 = vpop.eup %1457 }
 0x9a0   :  { %v1038_v0 = vmul.f32 %v1458_v63, %v1026_v57  ;;  %vm1044_vm8 = vweird.f32 %v1458_v63 }
 0x9a1   :  { %vm1045_vm10 = vmor %vm1043_vm9, %vm1044_vm8 }
 0x9a2   :  { %v1039_v58 = vmul.f32 %v1458_v63, %v1038_v0 }
 0x9a4   :  { %v1040_v4 = vmul.f32 0.5, %v1039_v58 }
 0x9a6   :  { %v1041_v7 = vsub.f32 1.5, %v1040_v4 }
 0x9a8   :  { %v1042_v10 = vmul.f32 %v1458_v63, %v1041_v7 }
 0x9aa   :  { %v1046_v13 = vsel %vm1045_vm10, %v1458_v63, %v1042_v10 }
 0x9ab   :  { %v1048_v15 = vmul.f32 %v1046_v13, %v2003_v28 }
 0x9ad   :  { %v1050_v17 = vmul.f32 %v1048_v15, %v960_v9 }
 0x9af   :  { %v1052_v19 = vadd.f32 %v1050_v17, %v962_v16 }
 0x9b1   :  { %v1053_v20 = vpack.c.bf16 %v1052_v19, %v1051_v2 }
 0x9b3   :  { %1345 = vmatmul.msk.bf16.vlgmr.msra.gmra.mxu2 %vm192_vm0, %v1053_v20 }
 0xa36   :  { %v1086_v52 = vpop.f32.mrf.mxu2 }
 0xa37   :  { %v1087_v24 = vadd.f32 %v1417_v25, %v1086_v52 }
 0xa39   :  { %v1091_v3 = vmax.f32 %v1087_v24, 0.0 }
 0xa3e   :  { %v1088_v27 = vpop.f32.mrf.mxu2 }
 0xa3f   :  { %v1089_v28 = vadd.f32 %v1417_v25, %v1088_v27  ;;  %v1178_v27 = vld [vmem:[%s2080_s15] sm:$0xf]  ;;  %s1706_s15 = smov [#allocation16]  }
 0xa40   :  { %s1264_s8 = sshll.u32 %s1706_s15, 4  ;;  %s1265_s8 = int_to_ptr.vmem [resolvable:$true] %s1264_s8 }
 0xa41   :  { %v1092_v6 = vmax.f32 %v1089_v28, 0.0 }
 0xa43   :  { %v1093_v29 = vpack.c.bf16 %v1092_v6, %v1091_v3 }
 0xa45   :  { %1170 = vmatmul.bf16.vlgmr.msra.gmra.mxu3 %v1093_v29  ;;  %v1180_v29 = vld [vmem:[#allocation14] sm:$0xf] }
 0xac8   :  { %v1171_v31 = vpop.f32.mrf.mxu3 }
 0xac9   :  { %v1172_v32 = vadd.f32 %v1418_v30, %v1171_v31 }
 0xacb   :  { %v1176_v33 = vadd.f32 %v1172_v32, %v1051_v2 }
 0xacd   :  { %v1182_v34 = vsel %vm192_vm0, %v1176_v33, 0.0 }
 0xace   :  { %1183 = vadd.xlane.f32.xlu1 %v1182_v34 }
 0xad0   :  { %v1173_v35 = vpop.f32.mrf.mxu3 }
 0xad1   :  { %v1174_v36 = vadd.f32 %v1418_v30, %v1173_v35  ;;  %v1179_v30 = vunpack.c.l.bf16 %v1178_v27 }
 0xad3   :  { %v1177_v38 = vadd.f32 %v1174_v36, %v1052_v19 }
 0xad5   :  { %v1185_v39 = vsel %vm192_vm0, %v1177_v38, 0.0 }
 0xad6   :  { %1186 = vadd.xlane.f32.xlu0 %v1185_v39 }
 0xb41   :  { %v1184_v40 = vpop.xlane.xlu1 %1183 }
 0xb42   :  { %v1188_v12 = vmul.f32 %v1184_v40, %v1981_v37 }
 0xb44   :  { %v1190_v41 = vrot.slane %v1188_v12, 4 }
 0xb46   :  { %v1191_v42 = vadd.f32 %v1190_v41, %v1188_v12 }
 0xb48   :  { %v1192_v43 = vrot.slane %v1191_v42, 2 }
 0xb49   :  { %v1187_v44 = vpop.xlane.xlu0 %1186 }
 0xb4a   :  { %v1193_v18 = vadd.f32 %v1192_v43, %v1191_v42  ;;  %v1189_v45 = vmul.f32 %v1187_v44, %v1981_v37 }
 0xb4c   :  { %v1194_v47 = vrot.slane %v1193_v18, 1  ;;  %v1196_v48 = vrot.slane %v1189_v45, 4 }
 0xb4e   :  { %v1195_v50 = vadd.f32 %v1194_v47, %v1193_v18  ;;  %v1197_v51 = vadd.f32 %v1196_v48, %v1189_v45 }
 0xb50   :  { %v1198_v53 = vrot.slane %v1197_v51, 2  ;;  %v1202_v54 = vmul.f32 %v1195_v50, %v1984_v46 }
 0xb52   :  { %v1199_v55 = vadd.f32 %v1198_v53, %v1197_v51  ;;  %v1204_v56 = vsub.f32 %v1176_v33, %v1202_v54  ;;  %v1181_v33 = vunpack.c.l.bf16 %v1180_v29 }
 0xb54   :  { %v1200_v57 = vrot.slane %v1199_v55, 1  ;;  %v1206_v59 = vmul.f32 %v1204_v56, %v1204_v56 }
 0xb56   :  { %v1201_v60 = vadd.f32 %v1200_v57, %v1199_v55  ;;  %v1208_v61 = vsel %vm192_vm0, %v1206_v59, 0.0 }
 0xb57   :  { %1209 = vadd.xlane.f32.xlu1 %v1208_v61 }
 0xb58   :  { %v1203_v62 = vmul.f32 %v1201_v60, %v1984_v46 }
 0xb5a   :  { %v1205_v63 = vsub.f32 %v1177_v38, %v1203_v62 }
 0xb5c   :  { %v1207_v26 = vmul.f32 %v1205_v63, %v1205_v63 }
 0xb5e   :  { %v1211_v0 = vsel %vm192_vm0, %v1207_v26, 0.0 }
 0xb5f   :  { %1212 = vadd.xlane.f32.xlu0 %v1211_v0 }
 0xbca   :  { %v1210_v58 = vpop.xlane.xlu1 %1209 }
 0xbcb   :  { %v1214_v1 = vmul.f32 %v1210_v58, %v1981_v37 }
 0xbcd   :  { %v1216_v4 = vrot.slane %v1214_v1, 4 }
 0xbcf   :  { %v1217_v5 = vadd.f32 %v1216_v4, %v1214_v1 }
 0xbd1   :  { %v1218_v7 = vrot.slane %v1217_v5, 2 }
 0xbd2   :  { %v1213_v8 = vpop.xlane.xlu0 %1212 }
 0xbd3   :  { %v1219_v9 = vadd.f32 %v1218_v7, %v1217_v5  ;;  %v1215_v10 = vmul.f32 %v1213_v8, %v1981_v37 }
 0xbd5   :  { %v1220_v11 = vrot.slane %v1219_v9, 1  ;;  %v1222_v13 = vrot.slane %v1215_v10, 4 }
 0xbd7   :  { %v1221_v15 = vadd.f32 %v1220_v11, %v1219_v9  ;;  %v1223_v16 = vadd.f32 %v1222_v13, %v1215_v10 }
 0xbd9   :  { %v1228_v14 = vmul.f32 %v1221_v15, %v1984_v46  ;;  %v1224_v17 = vrot.slane %v1223_v16, 2 }
 0xbdb   :  { %v1230_v2 = vadd.f32 1e-05, %v1228_v14  ;;  %v1225_v19 = vadd.f32 %v1224_v17, %v1223_v16 }
 0xbdd   :  { %1459 = vrsqrt.f32 %v1230_v2  ;;  %v1226_v20 = vrot.slane %v1225_v19, 1  ;;  %vm1238_vm12 = vweird.f32 %v1230_v2 }
 0xbdf   :  { %v1227_v49 = vadd.f32 %v1226_v20, %v1225_v19 }
 0xbe1   :  { %v1229_v21 = vmul.f32 %v1227_v49, %v1984_v46 }
 0xbe3   :  { %v1460_v22 = vpop.eup %1459  ;;  %v1231_v23 = vadd.f32 1e-05, %v1229_v21 }
 0xbe4   :  { %v1233_v52 = vmul.f32 %v1460_v22, %v1230_v2  ;;  %vm1239_vm11 = vweird.f32 %v1460_v22 }
 0xbe5   :  { %1461 = vrsqrt.f32 %v1231_v23  ;;  %vm1240_vm13 = vmor %vm1238_vm12, %vm1239_vm11  ;;  %vm1248_vm15 = vweird.f32 %v1231_v23 }
 0xbe6   :  { %v1234_v25 = vmul.f32 %v1460_v22, %v1233_v52 }
 0xbe8   :  { %v1235_v37 = vmul.f32 0.5, %v1234_v25 }
 0xbea   :  { %v1236_v24 = vsub.f32 1.5, %v1235_v37 }
 0xbeb   :  { %v1462_v28 = vpop.eup %1461 }
 0xbec   :  { %v1237_v3 = vmul.f32 %v1460_v22, %v1236_v24  ;;  %v1243_v6 = vmul.f32 %v1462_v28, %v1231_v23  ;;  %vm1249_vm14 = vweird.f32 %v1462_v28 }
 0xbed   :  { %vm1250_vm1 = vmor %vm1248_vm15, %vm1249_vm14 }
 0xbee   :  { %v1241_v46 = vsel %vm1240_vm13, %v1460_v22, %v1237_v3  ;;  %v1244_v31 = vmul.f32 %v1462_v28, %v1243_v6 }
 0xbef   :  { %v1252_v32 = vmul.f32 %v1241_v46, %v1204_v56 }
 0xbf0   :  { %v1245_v34 = vmul.f32 0.5, %v1244_v31 }
 0xbf1   :  { %v1254_v35 = vmul.f32 %v1252_v32, %v1179_v30 }
 0xbf2   :  { %v1246_v36 = vsub.f32 1.5, %v1245_v34 }
 0xbf3   :  { %v1256_v38 = vadd.f32 %v1254_v35, %v1181_v33 }
 0xbf4   :  { %v1247_v39 = vmul.f32 %v1462_v28, %v1246_v36 }
 0xbf5   :  { %1258 = vst.msk [vmem:[#allocation16] sm:$0xff] %vm192_vm0, %v1256_v38 }
 0xbf6   :  { %v1251_v40 = vsel %vm1250_vm1, %v1462_v28, %v1247_v39 }
 0xbf7   :  { %v1253_v12 = vmul.f32 %v1251_v40, %v1205_v63 }
 0xbf9   :  { %v1255_v41 = vmul.f32 %v1253_v12, %v1179_v30 }
 0xbfb   :  { %v1257_v42 = vadd.f32 %v1255_v41, %v1181_v33 }
 0xbfd   :  { %1259 = vst.msk [vmem:[#allocation16 + $0x8] sm:$0xff] %vm192_vm0, %v1257_v42 }
 0xbfe   :  { %1272 = dma.vmem_to_hbm [thread:$0]  %s1265_s8, 256, %s1267_s12, [#allocation4], %s1707_s28, %s1707_s28, %s1708_s29  }
 0xbff   :  { %1689 = dma.done.wait [#allocation4], 256  }
 0xc00   :  { %1690 = vsyncadd [#allocation4], 4294967040 }
 0xc01   :  { %1277 = vsyncpa [#allocation3], 1 }
 0xc02   :  { %1278 = vsyncpa [#allocation6], 1 }
 0xc03   :  { %1279 = vsyncpa [#allocation9], 1 }
 0xc04   :  { %1280 = vsyncpa [#allocation12], 1 }
 0xc05   :  { %1281 = vsyncpa [#allocation15], 1 }
 0xc06   :  { %1282 = vsyncpa [#allocation4], 1 }

// kernel: tpu_custom_call.1
= control target key start
LH: loop header
LB: loop body
LE: loop exit
PB: predicated region body
PF: predicated region fallthrough
CT: control target
= control target key end

     0   :  { %s2065_s0 = inlined_call_operand.vmem [shape: f32[2,8,32], index: 0, kind: input, shape index: {}]   ;;  %s2066_s1 = inlined_call_operand.vmem [shape: bf16[32,32], index: 1, kind: input, shape index: {}]   ;;  %s2067_s2 = inlined_call_operand.vmem [shape: bf16[32,32], index: 2, kind: input, shape index: {}]   ;;  %s2068_s3 = inlined_call_operand.vmem [shape: bf16[32,32], index: 3, kind: input, shape index: {}]   ;;  %s2069_s4 = inlined_call_operand.hbm [shape: f32[1,32], index: 4, kind: input, shape index: {}]   ;;  %s2070_s5 = inlined_call_operand.hbm [shape: f32[1,32], index: 5, kind: input, shape index: {}]   ;;  %s2071_s6 = inlined_call_operand.hbm [shape: f32[1,32], index: 6, kind: input, shape index: {}]   ;;  %s2072_s7 = inlined_call_operand.vmem [shape: bf16[4,8,32], index: 7, kind: input, shape index: {}]   ;;  %s2073_s8 = inlined_call_operand.hbm [shape: f32[1,32], index: 8, kind: input, shape index: {}]   ;;  %s2074_s9 = inlined_call_operand.hbm [shape: bf16[32,128], index: 9, kind: input, shape index: {}]   ;;  %s2075_s10 = inlined_call_operand.hbm [shape: f32[1,128], index: 10, kind: input, shape index: {}]   ;;  %s2076_s11 = inlined_call_operand.vmem [shape: bf16[128,32], index: 11, kind: input, shape index: {}]   ;;  %s2077_s12 = inlined_call_operand.hbm [shape: f32[1,32], index: 12, kind: input, shape index: {}]   ;;  %s2078_s13 = inlined_call_operand.vmem [shape: bf16[8,32], index: 13, kind: input, shape index: {}]   ;;  %s2079_s14 = inlined_call_operand.vmem [shape: bf16[8,32], index: 14, kind: input, shape index: {}]   ;;  %s2080_s15 = inlined_call_operand.vmem [shape: bf16[8,32], index: 15, kind: input, shape index: {}]   ;;  %s2081_s16 = inlined_call_operand.hbm [shape: bf16[8,32], index: 16, kind: input, shape index: {}]   ;;  %s2082_s17 = inlined_call_operand.hbm [shape: f32[2,8,32], index: 17, kind: output, shape index: {}]  }
   0x1   :  { %2085 = sst [smem:[#allocation23_spill]] %s2065_s0 }
   0x2   :  { %2086 = sst [smem:[#allocation24_spill]] %s2066_s1 }
   0x3   :  { %22 = vsyncpa [#allocation3], 0 }
   0x4   :  { %23 = vsyncpa [#allocation6], 0 }
   0x5   :  { %24 = vsyncpa [#allocation9], 0 }
   0x6   :  { %25 = vsyncpa [#allocation12], 0 }
   0x7   :  { %26 = vsyncpa [#allocation15], 0  ;;  %s52_s26 = sshll.u32 %s2070_s5, 4  ;;  %s53_s26 = int_to_ptr.hbm [resolvable:$true] %s52_s26 }
   0x8   :  { %27 = vsyncpa [#allocation4], 0  ;;  %s1691_s27 = smov [#allocation5]   ;;  %s76_s30 = sshll.u32 %s2073_s8, 4  ;;  %s77_s30 = int_to_ptr.hbm [resolvable:$true] %s76_s30 }
   0x9   :  { %s54_s28 = sshll.u32 %s1691_s27, 4  ;;  %s1692_s18 = smov [#allocation8]   ;;  %s55_s28 = int_to_ptr.vmem [resolvable:$true] %s54_s28 }
   0xa   :  { %57 = dma.hbm_to_vmem [thread:$0]  %s53_s26, 16, %s55_s28, [#allocation6]  }
   0xb   :  { %s78_s19 = sshll.u32 %s1692_s18, 4  ;;  %s100_s21 = sshll.u32 %s2075_s10, 4  ;;  %s79_s19 = int_to_ptr.vmem [resolvable:$true] %s78_s19  ;;  %s101_s21 = int_to_ptr.hbm [resolvable:$true] %s100_s21 }
   0xc   :  { %81 = dma.hbm_to_vmem [thread:$0]  %s77_s30, 16, %s79_s19, [#allocation9]  }
   0xd   :  { %s41_s23 = sshll.u32 %s2069_s4, 4  ;;  %s1693_s24 = smov [#allocation11]   ;;  %s42_s23 = int_to_ptr.hbm [resolvable:$true] %s41_s23 }
   0xe   :  { %s102_s25 = sshll.u32 %s1693_s24, 4  ;;  %s1694_s8 = smov [#allocation2]   ;;  %s103_s25 = int_to_ptr.vmem [resolvable:$true] %s102_s25 }
   0xf   :  { %105 = dma.hbm_to_vmem [thread:$0]  %s101_s21, 16, %s103_s25, [#allocation12]  }
  0x10   :  { %s43_s26 = sshll.u32 %s1694_s8, 4  ;;  %s63_s29 = sshll.u32 %s2071_s6, 4  ;;  %s44_s26 = int_to_ptr.vmem [resolvable:$true] %s43_s26  ;;  %s64_s29 = int_to_ptr.hbm [resolvable:$true] %s63_s29 }
  0x11   :  { %46 = dma.hbm_to_vmem [thread:$0]  %s42_s23, 16, %s44_s26, [#allocation3]  }
  0x12   :  { %s86_s30 = sshll.u32 %s2074_s9, 4  ;;  %s1695_s18 = smov [#allocation7]   ;;  %s87_s30 = int_to_ptr.hbm [resolvable:$true] %s86_s30 }
  0x13   :  { %s65_s4 = sshll.u32 %s1695_s18, 4  ;;  %s1696_s19 = smov [#allocation10]   ;;  %s66_s4 = int_to_ptr.vmem [resolvable:$true] %s65_s4 }
  0x14   :  { %68 = dma.hbm_to_vmem [thread:$0]  %s64_s29, 16, %s66_s4, [#allocation6]  }
  0x15   :  { %s88_s1 = sshll.u32 %s1696_s19, 4  ;;  %s1697_s20 = smov 64   ;;  %s89_s1 = int_to_ptr.vmem [resolvable:$true] %s88_s1 }
  0x16   :  { %s1698_s21 = smov 4   ;;  %s113_s22 = sshll.u32 %s2077_s12, 4  ;;  %s114_s22 = int_to_ptr.hbm [resolvable:$true] %s113_s22 }
  0x17   :  { %94 = dma.hbm_to_vmem [thread:$0]  %s87_s30, 256, %s89_s1, [#allocation9], %s1697_s20, %s1697_s20, %s1698_s21  }
  0x18   :  { %s1699_s23 = smov [#allocation13]   ;;  %s130_s8 = sshll.u32 %s2081_s16, 4  ;;  %s131_s8 = int_to_ptr.hbm [resolvable:$true] %s130_s8 }
  0x19   :  { %s115_s24 = sshll.u32 %s1699_s23, 4  ;;  %s1700_s26 = smov [#allocation14]   ;;  %s116_s24 = int_to_ptr.vmem [resolvable:$true] %s115_s24 }
  0x1a   :  { %118 = dma.hbm_to_vmem [thread:$0]  %s114_s22, 16, %s116_s24, [#allocation12]  }
  0x1b   :  { %s132_s27 = sshll.u32 %s1700_s26, 4  ;;  %s133_s27 = int_to_ptr.vmem [resolvable:$true] %s132_s27 }
  0x1c   :  { %135 = dma.hbm_to_vmem [thread:$0]  %s131_s8, 64, %s133_s27, [#allocation15]  }
  0x1d   :  { %1679 = dma.done.wait [#allocation3], 16  }
  0x1e   :  { %1680 = vsyncadd [#allocation3], 4294967280 }
  0x1f   :  { %1681 = dma.done.wait [#allocation6], 32  }
  0x20   :  { %1682 = vsyncadd [#allocation6], 4294967264 }
  0x21   :  { %1683 = dma.done.wait [#allocation9], 272  }
  0x22   :  { %1684 = vsyncadd [#allocation9], 4294967024 }
  0x23   :  { %1685 = dma.done.wait [#allocation12], 32  }
  0x24   :  { %1686 = vsyncadd [#allocation12], 4294967264 }
  0x25   :  { %1687 = dma.done.wait [#allocation15], 64  }
  0x26   :  { %1688 = vsyncadd [#allocation15], 4294967232  ;;  %s2087_s29 = sld [smem:[#allocation24_spill]]  ;;  %v1381_v4 = vld [vmem:[%s2067_s2 + $0x8] sm:$0xff]  ;;  %v1380_v5 = vld [vmem:[%s2067_s2] sm:$0xff]  ;;  %vm192_vm0 = vcmask 261120  }
  0x27   :  { %s2088_s18 = sld [smem:[#allocation23_spill]]  ;;  %236 = vmatpush.bf16.msra.mxu1 %v1381_v4  ;;  %v1383_v7 = vld [vmem:[%s2068_s3 + $0x8] sm:$0xff]  ;;  %v1382_v8 = vld [vmem:[%s2068_s3] sm:$0xff]  ;;  %s1701_s2 = smov 112   ;;  %vm320_vm1 = vcmask 1043456   ;;  %vm316_vm2 = vcmask 64512  }
  0x28   :  { %270 = vmatpush.bf16.msra.mxu2 %v1383_v7  ;;  %v1413_v9 = vld [vmem:[#allocation2] ss:$0 sm:$0xff]  ;;  %s1702_s9 = smov 120   ;;  %v1862_v15 = vld [vmem:[#allocation5] ss:$0 sm:$0xff]  ;;  %s1703_s3 = smov 104  }
  0x29   :  { %v1865_v18 = vld [vmem:[#allocation7] ss:$0 sm:$0xff]  ;;  %s1266_s12 = sshll.u32 %s2082_s17, 4  ;;  %s1707_s28 = smov 128   ;;  %s1267_s12 = int_to_ptr.hbm [resolvable:$true] %s1266_s12 }
  0x2b   :  { %237 = vmatpush.bf16.msra.mxu1 %v1380_v5 }
  0x2c   :  { %v1379_v0 = vld [vmem:[%s2087_s29 + $0x8] sm:$0xff]  ;;  %v1378_v1 = vld [vmem:[%s2087_s29] sm:$0xff]  ;;  %271 = vmatpush.bf16.msra.mxu2 %v1382_v8  ;;  %s1708_s29 = smov 8  }
  0x2d   :  { %v1832_v2 = vld [vmem:[%s2088_s18] sm:$0xff]  ;;  %v1837_v3 = vld [vmem:[%s2088_s18 + $0x8] sm:$0xff]  ;;  %202 = vmatpush.bf16.msra.mxu0 %v1379_v0 }
  0x2e   :  { %v171_v6 = vpack.c.bf16 %v1837_v3, %v1832_v2 }
  0x30   :  { %1300 = vmatmul.msk.bf16.vlgmr.msra.gmra.mxu1 %vm192_vm0, %v171_v6  ;;  %1309 = vmatmul.msk.bf16.vlgmr.msra.gmra.mxu2 %vm192_vm0, %v171_v6 }
  0x31   :  { %203 = vmatpush.bf16.msra.mxu0 %v1378_v1 }
  0x34   :  { %1291 = vmatmul.msk.bf16.vlgmr.msra.gmra.mxu0 %vm192_vm0, %v171_v6 }
  0xad   :  { %v239_v16 = vpop.f32.mrf.mxu1 }
  0xae   :  { %v240_v17 = vadd.f32 %v1862_v15, %v239_v16 }
  0xb1   :  { %v205_v10 = vpop.f32.mrf.mxu0 }
  0xb2   :  { %v206_v11 = vadd.f32 %v1413_v9, %v205_v10 }
  0xb3   :  { %v273_v19 = vpop.f32.mrf.mxu2 }
  0xb4   :  { %v278_v12 = vpack.c.bf16 %v206_v11, %v206_v11  ;;  %v274_v20 = vadd.f32 %v1865_v18, %v273_v19 }
  0xb5   :  { %v241_v0 = vpop.f32.mrf.mxu1 }
  0xb6   :  { %v371_v13 = vunpack.c.l.b16 %v278_v12  ;;  %v315_v21 = vpack.c.bf16 %v274_v20, %v274_v20  ;;  %v242_v1 = vadd.f32 %v1862_v15, %v241_v0 }
  0xb8   :  { %v1856_v14 = vpack.c.b16 %v371_v13, %v371_v13  ;;  %v407_v23 = vunpack.c.l.b16 %v315_v21  ;;  %v353_v49 = vsel %vm320_vm1, %v315_v21, 0  ;;  %v369_v21 = vld [vmem:[%s2072_s7] sm:$0xf] }
  0xb9   :  { %v207_v22 = vpop.f32.mrf.mxu0  ;;  %362 = vmatpush.bf16.msra.mxu3 %v353_v49 }
  0xba   :  { %471 = vrot.lane.b32.xlu1 %v1856_v14, %s1701_s2  ;;  %373 = vrot.lane.b32.xlu0 %v1856_v14, %s1702_s9  ;;  %v208_v24 = vadd.f32 %v1413_v9, %v207_v22  ;;  %v1868_v25 = vpack.c.b16 %v407_v23, %v407_v23  ;;  %v456_v22 = vsel %vm320_vm1, %v369_v21, 0 }
  0xbc   :  { %v1870_v26 = vpack.c.bf16 %v208_v24, %v208_v24 }
  0xbd   :  { %465 = vmatpush.bf16.msrb.mxu3 %v456_v22 }
  0xbe   :  { %v715_v27 = vunpack.c.l.b16 %v1870_v26 }
  0xc0   :  { %v1875_v28 = vpack.c.b16 %v715_v27, %v715_v27 }
  0xdc   :  { %279 = vxpose.xlu0.b32.start.end [1/1] (short) (narrow) %v240_v17, 32 }
 0x12c   :  { %v374_v29 = vpop.permute.xlu0 %373  ;;  %v472_v39 = vpop.permute.xlu1 %471 }
 0x162   :  { %504 = vrot.lane.b32.xlu0 %v1868_v25, %s1701_s2 }
 0x16a   :  { %717 = vrot.lane.b32.xlu0 %v1875_v28, %s1702_s9 }
 0x172   :  { %807 = vrot.lane.b32.xlu0 %v1875_v28, %s1701_s2 }
 0x180   :  { %v295_v30 = vpop.trf.xlu0 }
 0x181   :  { %v311_v31 = vpack.c.bf16 %v295_v30, %v295_v30  ;;  %v1314_v30 = vld [vmem:[%s2072_s7 + $0x4] sm:$0xf] }
 0x183   :  { %v322_v32 = vsel %vm320_vm1, %v311_v31, 0  ;;  %v437_v31 = vsel %vm320_vm1, %v1314_v30, 0 }
 0x184   :  { %331 = vmatpush.bf16.msrb.mxu0 %v322_v32  ;;  %446 = vmatpush.bf16.msrb.mxu2 %v437_v31 }
 0x187   :  { %1310 = vmatmul.msk.bf16.vlgmr.msrb.gmra.mxu0 %vm316_vm2, %v278_v12 }
 0x188   :  { %v296_v33 = vpop.trf.xlu0 }
 0x189   :  { %v312_v34 = vpack.c.bf16 %v296_v33, %v296_v33 }
 0x18b   :  { %v379_v35 = vsel %vm320_vm1, %v312_v34, 0  ;;  %v275_v34 = vpop.f32.mrf.mxu2 }
 0x18c   :  { %388 = vmatpush.bf16.msra.mxu0 %v379_v35  ;;  %v276_v35 = vadd.f32 %v1865_v18, %v275_v34 }
 0x190   :  { %v297_v36 = vpop.trf.xlu0 }
 0x191   :  { %v313_v37 = vpack.c.bf16 %v297_v36, %v297_v36 }
 0x193   :  { %v477_v38 = vsel %vm320_vm1, %v313_v37, 0  ;;  %v662_v37 = vpack.c.bf16 %v276_v35, %v276_v35 }
 0x194   :  { %486 = vmatpush.bf16.msrb.mxu0 %v477_v38 }
 0x197   :  { %1312 = vmatmul.msk.bf16.vlgmr.msra.gmra.mxu0 %vm316_vm2, %v374_v29 }
 0x198   :  { %v298_v5 = vpop.trf.xlu0 }
 0x199   :  { %v314_v19 = vpack.c.bf16 %v298_v5, %v298_v5 }
 0x19b   :  { %v554_v20 = vsel %vm320_vm1, %v314_v19, 0 }
 0x1a7   :  { %1317 = vmatmul.msk.bf16.vlgmr.msrb.gmra.mxu0 %vm316_vm2, %v472_v39 }
 0x1d4   :  { %v505_v8 = vpop.permute.xlu0 %504 }
 0x1d5   :  { %v510_v9 = vsel %vm320_vm1, %v505_v8, 0 }
 0x1dc   :  { %v718_v34 = vpop.permute.xlu0 %717 }
 0x1e4   :  { %v808_v35 = vpop.permute.xlu0 %807 }
 0x204   :  { %v333_v40 = vpop.f32.mrf.mxu0 }
 0x205   :  { %v337_v45 = vsel %vm316_vm2, %v333_v40, -inf }
 0x20c   :  { %v335_v41 = vpop.f32.mrf.mxu0 }
 0x214   :  { %v390_v42 = vpop.f32.mrf.mxu0 }
 0x215   :  { %v394_v43 = vsel %vm316_vm2, %v390_v42, -inf }
 0x216   :  { %395 = vmax.xlane.f32.xlu1 %v394_v43  ;;  %v1319_v43 = vld [vmem:[%s2072_s7 + $0x8] sm:$0xf] }
 0x21c   :  { %v392_v44 = vpop.f32.mrf.mxu0 }
 0x21d   :  { %v532_v44 = vsel %vm320_vm1, %v1319_v43, 0 }
 0x21e   :  { %338 = vmax.xlane.f32.xlu1 %v337_v45  ;;  %541 = vmatpush.bf16.msra.mxu2 %v532_v44 }
 0x224   :  { %v488_v46 = vpop.f32.mrf.mxu0 }
 0x225   :  { %v492_v47 = vsel %vm316_vm2, %v488_v46, -inf }
 0x226   :  { %493 = vmax.xlane.f32.xlu2 %v492_v47 }
 0x22c   :  { %v490_v48 = vpop.f32.mrf.mxu0 }
 0x289   :  { %v396_v50 = vpop.xlane.xlu1 %395 }
 0x28a   :  { %v397_v51 = vsub.f32 %v390_v42, %v396_v50 }
 0x28c   :  { %v398_v52 = vmul.f32 1.442695, %v397_v51 }
 0x28e   :  { %1419 = vpow2.f32 %v398_v52 }
 0x291   :  { %v339_v53 = vpop.xlane.xlu1 %338 }
 0x292   :  { %v340_v54 = vsub.f32 %v333_v40, %v339_v53  ;;  %v698_v40 = vsel %vm320_vm1, %v662_v37, 0 }
 0x294   :  { %v1420_v55 = vpop.eup %1419  ;;  %v341_v56 = vmul.f32 1.442695, %v340_v54 }
 0x295   :  { %v400_v57 = vsel %vm316_vm2, %v1420_v55, 0.0 }
 0x296   :  { %1421 = vpow2.f32 %v341_v56  ;;  %401 = vadd.xlane.f32.xlu2 %v400_v57 }
 0x299   :  { %v494_v60 = vpop.xlane.xlu2 %493 }
 0x29a   :  { %v495_v61 = vsub.f32 %v488_v46, %v494_v60 }
 0x29c   :  { %v1422_v58 = vpop.eup %1421  ;;  %v496_v62 = vmul.f32 1.442695, %v495_v61 }
 0x29d   :  { %v343_v59 = vsel %vm316_vm2, %v1422_v58, 0.0 }
 0x29e   :  { %344 = vadd.xlane.f32.xlu1 %v343_v59  ;;  %1423 = vpow2.f32 %v496_v62 }
 0x2a4   :  { %v1424_v63 = vpop.eup %1423 }
 0x2a5   :  { %v498_v4 = vsel %vm316_vm2, %v1424_v63, 0.0 }
 0x2ae   :  { %409 = vrot.lane.b32.xlu2 %v1868_v25, %s1702_s9 }
 0x2d7   :  { %499 = vadd.xlane.f32.xlu2 %v498_v4 }
 0x2d8   :  { %626 = vxpose.xlu1.b32.start.end [1/1] (short) (narrow) %v242_v1, 32 }
 0x2ef   :  { %548 = vrot.lane.b32.xlu2 %v1856_v14, %s1703_s3 }
 0x309   :  { %v402_v6 = vpop.xlane.xlu2 %401 }
 0x30a   :  { %1425 = vrcp.f32 %v402_v6 }
 0x310   :  { %v1426_v7 = vpop.eup %1425 }
 0x311   :  { %v404_v10 = vmul.f32 %v1426_v7, %v1420_v55  ;;  %v345_v11 = vpop.xlane.xlu1 %344  ;;  %v410_v12 = vpop.permute.xlu2 %409 }
 0x312   :  { %1427 = vrcp.f32 %v345_v11  ;;  %v415_v13 = vsel %vm320_vm1, %v410_v12, 0  ;;  %v751_v11 = vunpack.c.l.b16 %v662_v37 }
 0x313   :  { %424 = vmatpush.bf16.msrb.mxu1 %v415_v13  ;;  %v405_v15 = vpack.c.bf16 %v404_v10, %v404_v10 }
 0x314   :  { %v1932_v12 = vpack.c.b16 %v751_v11, %v751_v11 }
 0x316   :  { %1313 = vmatmul.msk.bf16.vlgmr.msrb.gmra.mxu1 %vm316_vm2, %v405_v15 }
 0x317   :  { %519 = vmatpush.bf16.msra.mxu1 %v510_v9 }
 0x318   :  { %v1428_v16 = vpop.eup %1427 }
 0x319   :  { %v347_v14 = vmul.f32 %v1428_v16, %v1422_v58 }
 0x31b   :  { %v348_v17 = vpack.c.bf16 %v347_v14, %v347_v14 }
 0x31d   :  { %1311 = vmatmul.msk.bf16.vlgmr.msra.gmra.mxu3 %vm316_vm2, %v348_v17 }
 0x31e   :  { %563 = vmatpush.bf16.msra.mxu3 %v554_v20 }
 0x34a   :  { %v500_v23 = vpop.xlane.xlu2 %499 }
 0x34b   :  { %1429 = vrcp.f32 %v500_v23 }
 0x351   :  { %v1430_v24 = vpop.eup %1429 }
 0x352   :  { %v502_v27 = vmul.f32 %v1430_v24, %v1424_v63  ;;  %v549_v42 = vpop.permute.xlu2 %548 }
 0x354   :  { %v503_v29 = vpack.c.bf16 %v502_v27, %v502_v27 }
 0x356   :  { %1318 = vmatmul.msk.bf16.vlgmr.msra.gmra.mxu1 %vm316_vm2, %v503_v29 }
 0x37c   :  { %v642_v18 = vpop.trf.xlu1 }
 0x37d   :  { %v658_v45 = vpack.c.bf16 %v642_v18, %v642_v18 }
 0x37f   :  { %v667_v46 = vsel %vm320_vm1, %v658_v45, 0 }
 0x384   :  { %v643_v13 = vpop.trf.xlu1 }
 0x38c   :  { %v644_v15 = vpop.trf.xlu1 }
 0x38d   :  { %v660_v29 = vpack.c.bf16 %v644_v15, %v644_v15 }
 0x393   :  { %v426_v32 = vpop.f32.mrf.mxu1 }
 0x394   :  { %v430_v33 = vpack.c.bf16 %v426_v32, %v426_v32  ;;  %v645_v16 = vpop.trf.xlu1 }
 0x395   :  { %v661_v19 = vpack.c.bf16 %v645_v16, %v645_v16 }
 0x396   :  { %1315 = vmatmul.msk.bf16.vlgmr.msrb.gmra.mxu2 %vm316_vm2, %v430_v33  ;;  %v813_v33 = vsel %vm320_vm1, %v660_v29, 0 }
 0x397   :  { %676 = vmatpush.bf16.msrb.mxu2 %v667_v46  ;;  %v885_v23 = vsel %vm320_vm1, %v661_v19, 0 }
 0x39b   :  { %v428_v36 = vpop.f32.mrf.mxu1 }
 0x39c   :  { %v1323_v36 = vld [vmem:[%s2072_s7 + $0xc] sm:$0xf] }
 0x39d   :  { %v1952_v37 = vsel %vm320_vm1, %v1323_v36, 0 }
 0x39e   :  { %618 = vmatpush.bf16.msrb.mxu1 %v1952_v37 }
 0x3a0   :  { %v364_v38 = vpop.f32.mrf.mxu3 }
 0x3a1   :  { %v368_v39 = vpack.c.bf16 %v364_v38, %v364_v38 }
 0x3a3   :  { %1316 = vmatmul.msk.bf16.vlgmr.msrb.gmra.mxu3 %vm316_vm2, %v368_v39 }
 0x3a4   :  { %707 = vmatpush.bf16.msrb.mxu3 %v698_v40 }
 0x3a8   :  { %v366_v41 = vpop.f32.mrf.mxu3 }
 0x3b3   :  { %1321 = vmatmul.msk.bf16.vlgmr.msra.gmra.mxu3 %vm316_vm2, %v549_v42 }
 0x3b4   :  { %801 = vmatpush.bf16.msra.mxu3 %v456_v22 }
 0x3d3   :  { %v521_v47 = vpop.f32.mrf.mxu1 }
 0x3d4   :  { %v525_v48 = vpack.c.bf16 %v521_v47, %v521_v47 }
 0x3d6   :  { %1320 = vmatmul.msk.bf16.vlgmr.msra.gmra.mxu2 %vm316_vm2, %v525_v48 }
 0x3d7   :  { %785 = vmatpush.bf16.msra.mxu2 %v437_v31 }
 0x3db   :  { %v523_v49 = vpop.f32.mrf.mxu1 }
 0x3e6   :  { %1325 = vmatmul.msk.bf16.vlgmr.msrb.gmra.mxu2 %vm316_vm2, %v1870_v26 }
 0x3e7   :  { %872 = vmatpush.bf16.msrb.mxu2 %v532_v44 }
 0x419   :  { %v448_v50 = vpop.f32.mrf.mxu2 }
 0x421   :  { %v450_v51 = vpop.f32.mrf.mxu2 }
 0x426   :  { %v467_v52 = vpop.f32.mrf.mxu3 }
 0x427   :  { %v468_v53 = vadd.f32 %v467_v52, %v448_v50 }
 0x42e   :  { %v469_v54 = vpop.f32.mrf.mxu3 }
 0x436   :  { %v565_v55 = vpop.f32.mrf.mxu3 }
 0x437   :  { %v569_v63 = vsel %vm316_vm2, %v565_v55, -inf }
 0x43e   :  { %v567_v56 = vpop.f32.mrf.mxu3 }
 0x459   :  { %v543_v57 = vpop.f32.mrf.mxu2 }
 0x45a   :  { %v1926_v58 = vadd.f32 %v543_v57, %v468_v53 }
 0x461   :  { %v545_v59 = vpop.f32.mrf.mxu2 }
 0x469   :  { %v678_v60 = vpop.f32.mrf.mxu2 }
 0x46a   :  { %v682_v61 = vsel %vm316_vm2, %v678_v60, -inf }
 0x46b   :  { %683 = vmax.xlane.f32.xlu2 %v682_v61 }
 0x471   :  { %v680_v62 = vpop.f32.mrf.mxu2 }
 0x473   :  { %570 = vmax.xlane.f32.xlu2 %v569_v63 }
 0x4de   :  { %v684_v26 = vpop.xlane.xlu2 %683 }
 0x4df   :  { %v685_v0 = vsub.f32 %v678_v60, %v684_v26 }
 0x4e1   :  { %v686_v1 = vmul.f32 1.442695, %v685_v0 }
 0x4e3   :  { %1431 = vpow2.f32 %v686_v1 }
 0x4e6   :  { %v571_v4 = vpop.xlane.xlu2 %570 }
 0x4e7   :  { %v572_v5 = vsub.f32 %v565_v55, %v571_v4 }
 0x4e9   :  { %v1432_v6 = vpop.eup %1431  ;;  %v573_v7 = vmul.f32 1.442695, %v572_v5 }
 0x4ea   :  { %v688_v8 = vsel %vm316_vm2, %v1432_v6, 0.0 }
 0x4eb   :  { %1433 = vpow2.f32 %v573_v7  ;;  %689 = vadd.xlane.f32.xlu1 %v688_v8 }
 0x4f1   :  { %v1434_v9 = vpop.eup %1433 }
 0x4f2   :  { %v575_v10 = vsel %vm316_vm2, %v1434_v9, 0.0 }
 0x4f3   :  { %576 = vadd.xlane.f32.xlu2 %v575_v10 }
 0x504   :  { %840 = vrot.lane.b32.xlu1 %v1932_v12, %s1701_s2 }
 0x50b   :  { %581 = vrot.lane.b32.xlu2 %v1868_v25, %s1703_s3  ;;  %v659_v25 = vpack.c.bf16 %v643_v13, %v643_v13 }
 0x50d   :  { %v723_v31 = vsel %vm320_vm1, %v659_v25, 0 }
 0x513   :  { %879 = vrot.lane.b32.xlu2 %v1875_v28, %s1703_s3 }
 0x55e   :  { %v690_v14 = vpop.xlane.xlu1 %689 }
 0x55f   :  { %1435 = vrcp.f32 %v690_v14 }
 0x565   :  { %v1436_v17 = vpop.eup %1435 }
 0x566   :  { %v692_v20 = vmul.f32 %v1436_v17, %v1432_v6  ;;  %v577_v21 = vpop.xlane.xlu2 %576  ;;  %v1969_v6 = vld [vmem:[#allocation8] ss:$0 sm:$0xff] }
 0x567   :  { %1437 = vrcp.f32 %v577_v21 }
 0x568   :  { %v693_v22 = vpack.c.bf16 %v692_v20, %v692_v20 }
 0x56a   :  { %1326 = vmatmul.msk.bf16.vlgmr.msrb.gmra.mxu3 %vm316_vm2, %v693_v22 }
 0x56b   :  { %894 = vmatpush.bf16.msrb.mxu3 %v885_v23 }
 0x56d   :  { %v1438_v24 = vpop.eup %1437 }
 0x56e   :  { %v579_v27 = vmul.f32 %v1438_v24, %v1434_v9  ;;  %v582_v28 = vpop.permute.xlu2 %581 }
 0x56f   :  { %v587_v30 = vsel %vm320_vm1, %v582_v28, 0 }
 0x570   :  { %v580_v32 = vpack.c.bf16 %v579_v27, %v579_v27  ;;  %596 = vmatpush.bf16.msra.mxu0 %v587_v30  ;;  %v1704_v27 = vmov 32.0  }
 0x573   :  { %1322 = vmatmul.msk.bf16.vlgmr.msra.gmra.mxu0 %vm316_vm2, %v580_v32  ;;  %v1705_v32 = vmov 8.0  }
 0x574   :  { %732 = vmatpush.bf16.msrb.mxu0 %v723_v31 }
 0x576   :  { %v880_v44 = vpop.permute.xlu2 %879  ;;  %v841_v17 = vpop.permute.xlu1 %840 }
 0x577   :  { %v846_v21 = vsel %vm320_vm1, %v841_v17, 0 }
 0x578   :  { %822 = vmatpush.bf16.msra.mxu0 %v813_v33 }
 0x583   :  { %1327 = vmatmul.msk.bf16.vlgmr.msrb.gmra.mxu0 %vm316_vm2, %v718_v34 }
 0x593   :  { %1331 = vmatmul.msk.bf16.vlgmr.msra.gmra.mxu0 %vm316_vm2, %v808_v35 }
 0x5ed   :  { %v709_v38 = vpop.f32.mrf.mxu3 }
 0x5ee   :  { %v713_v39 = vpack.c.bf16 %v709_v38, %v709_v38 }
 0x5f0   :  { %v598_v40 = vpop.f32.mrf.mxu0  ;;  %1330 = vmatmul.msk.bf16.vlgmr.msra.gmra.mxu3 %vm316_vm2, %v713_v39 }
 0x5f1   :  { %v602_v41 = vpack.c.bf16 %v598_v40, %v598_v40 }
 0x5f3   :  { %1324 = vmatmul.msk.bf16.vlgmr.msrb.gmra.mxu1 %vm316_vm2, %v602_v41 }
 0x5f5   :  { %v711_v42 = vpop.f32.mrf.mxu3 }
 0x5f8   :  { %v600_v43 = vpop.f32.mrf.mxu0 }
 0x600   :  { %v734_v18 = vpop.f32.mrf.mxu0  ;;  %1334 = vmatmul.msk.bf16.vlgmr.msrb.gmra.mxu3 %vm316_vm2, %v880_v44 }
 0x601   :  { %v738_v45 = vsel %vm316_vm2, %v734_v18, -inf }
 0x602   :  { %739 = vmax.xlane.f32.xlu0 %v738_v45 }
 0x608   :  { %v736_v46 = vpop.f32.mrf.mxu0 }
 0x610   :  { %v824_v47 = vpop.f32.mrf.mxu0 }
 0x611   :  { %v828_v48 = vsel %vm316_vm2, %v824_v47, -inf }
 0x612   :  { %829 = vmax.xlane.f32.xlu2 %v828_v48 }
 0x618   :  { %v826_v49 = vpop.f32.mrf.mxu0 }
 0x670   :  { %v620_v50 = vpop.f32.mrf.mxu1 }
 0x671   :  { %v624_v51 = vadd.f32 %v620_v50, %v1926_v58 }
 0x673   :  { %v1961_v52 = vpop.f32.mrf.mxu3  ;;  %v951_v5 = vadd.f32 %v624_v51, %v1832_v2 }
 0x675   :  { %v740_v53 = vpop.xlane.xlu0 %739  ;;  %v957_v7 = vadd.f32 %v1969_v6, %v951_v5 }
 0x676   :  { %v741_v54 = vsub.f32 %v734_v18, %v740_v53 }
 0x677   :  { %v963_v8 = vsel %vm192_vm0, %v957_v7, 0.0 }
 0x678   :  { %v742_v55 = vmul.f32 1.442695, %v741_v54  ;;  %v622_v56 = vpop.f32.mrf.mxu1 }
 0x67a   :  { %1439 = vpow2.f32 %v742_v55 }
 0x67b   :  { %v805_v57 = vpop.f32.mrf.mxu3 }
 0x680   :  { %v1440_v59 = vpop.eup %1439 }
 0x681   :  { %v744_v60 = vsel %vm316_vm2, %v1440_v59, 0.0 }
 0x682   :  { %745 = vadd.xlane.f32.xlu2 %v744_v60 }
 0x683   :  { %v896_v61 = vpop.f32.mrf.mxu3 }
 0x684   :  { %v900_v62 = vsel %vm316_vm2, %v896_v61, -inf }
 0x685   :  { %901 = vmax.xlane.f32.xlu0 %v900_v62  ;;  %v830_v63 = vpop.xlane.xlu2 %829 }
 0x686   :  { %v831_v26 = vsub.f32 %v824_v47, %v830_v63 }
 0x688   :  { %v832_v0 = vmul.f32 1.442695, %v831_v26 }
 0x68a   :  { %1441 = vpow2.f32 %v832_v0 }
 0x68b   :  { %v898_v58 = vpop.f32.mrf.mxu3 }
 0x690   :  { %v1442_v1 = vpop.eup %1441 }
 0x691   :  { %v834_v4 = vsel %vm316_vm2, %v1442_v1, 0.0 }
 0x692   :  { %835 = vadd.xlane.f32.xlu2 %v834_v4 }
 0x699   :  { %753 = vrot.lane.b32.xlu0 %v1932_v12, %s1702_s9 }
 0x6c3   :  { %964 = vadd.xlane.f32.xlu0 %v963_v8 }
 0x6f5   :  { %v746_v13 = vpop.xlane.xlu2 %745 }
 0x6f8   :  { %v902_v9 = vpop.xlane.xlu0 %901 }
 0x6f9   :  { %v903_v10 = vsub.f32 %v896_v61, %v902_v9 }
 0x6fb   :  { %v904_v11 = vmul.f32 1.442695, %v903_v10 }
 0x6fd   :  { %1443 = vpow2.f32 %v904_v11 }
 0x6fe   :  { %1445 = vrcp.f32 %v746_v13 }
 0x703   :  { %v1444_v15 = vpop.eup %1443 }
 0x704   :  { %v906_v16 = vsel %vm316_vm2, %v1444_v15, 0.0  ;;  %v1446_v14 = vpop.eup %1445 }
 0x705   :  { %907 = vadd.xlane.f32.xlu2 %v906_v16  ;;  %v748_v2 = vmul.f32 %v1446_v14, %v1440_v59  ;;  %v836_v23 = vpop.xlane.xlu2 %835 }
 0x706   :  { %1447 = vrcp.f32 %v836_v23 }
 0x707   :  { %v749_v22 = vpack.c.bf16 %v748_v2, %v748_v2  ;;  %1449 = vrcp.f32 %v1704_v27 }
 0x708   :  { %1451 = vrcp.f32 %v1705_v32 }
 0x70b   :  { %v754_v19 = vpop.permute.xlu0 %753 }
 0x70c   :  { %v759_v20 = vsel %vm320_vm1, %v754_v19, 0  ;;  %v1448_v25 = vpop.eup %1447 }
 0x70d   :  { %768 = vmatpush.bf16.msra.mxu1 %v759_v20  ;;  %v838_v24 = vmul.f32 %v1448_v25, %v1442_v1  ;;  %v1450_v29 = vpop.eup %1449 }
 0x70e   :  { %v970_v30 = vmul.f32 32.0, %v1450_v29  ;;  %v1452_v34 = vpop.eup %1451  ;;  %vm974_vm3 = vweird.f32 %v1450_v29 }
 0x70f   :  { %v839_v28 = vpack.c.bf16 %v838_v24, %v838_v24  ;;  %v991_v36 = vmul.f32 8.0, %v1452_v34  ;;  %vm995_vm4 = vweird.f32 %v1452_v34 }
 0x710   :  { %1328 = vmatmul.msk.bf16.vlgmr.msra.gmra.mxu1 %vm316_vm2, %v749_v22  ;;  %v971_v31 = vsub.f32 1.0, %v970_v30 }
 0x711   :  { %855 = vmatpush.bf16.msrb.mxu1 %v846_v21  ;;  %v992_v39 = vsub.f32 1.0, %v991_v36 }
 0x712   :  { %v972_v33 = vmul.f32 %v1450_v29, %v971_v31 }
 0x713   :  { %v993_v41 = vmul.f32 %v1452_v34, %v992_v39 }
 0x714   :  { %v973_v35 = vadd.f32 %v1450_v29, %v972_v33 }
 0x715   :  { %944 = vmatpush.bf16.msra.mxu1 %v1952_v37  ;;  %v994_v44 = vadd.f32 %v1452_v34, %v993_v41 }
 0x716   :  { %v1981_v37 = vsel %vm974_vm3, %v1450_v29, %v973_v35 }
 0x717   :  { %v1984_v46 = vsel %vm995_vm4, %v1452_v34, %v994_v44 }
 0x71d   :  { %912 = vrot.lane.b32.xlu2 %v1932_v12, %s1703_s3 }
 0x720   :  { %1332 = vmatmul.msk.bf16.vlgmr.msrb.gmra.mxu1 %vm316_vm2, %v839_v28 }
 0x736   :  { %v965_v38 = vpop.xlane.xlu0 %964 }
 0x737   :  { %v976_v40 = vmul.f32 %v1981_v37, %v965_v38 }
 0x739   :  { %v978_v12 = vrot.slane %v976_v40, 4 }
 0x73b   :  { %v979_v42 = vadd.f32 %v978_v12, %v976_v40 }
 0x73d   :  { %v980_v43 = vrot.slane %v979_v42, 2 }
 0x73f   :  { %v981_v18 = vadd.f32 %v980_v43, %v979_v42  ;;  %v1385_v43 = vld [vmem:[#allocation10 + $0x8] sm:$0xff] }
 0x741   :  { %v982_v45 = vrot.slane %v981_v18, 1 }
 0x743   :  { %v983_v47 = vadd.f32 %v982_v45, %v981_v18  ;;  %v1384_v45 = vld [vmem:[#allocation10] sm:$0xff] }
 0x745   :  { %v997_v48 = vmul.f32 %v1984_v46, %v983_v47 }
 0x747   :  { %v1987_v49 = vsub.f32 %v957_v7, %v997_v48 }
 0x749   :  { %v1001_v50 = vmul.f32 %v1987_v49, %v1987_v49 }
 0x74b   :  { %v1003_v51 = vsel %vm192_vm0, %v1001_v50, 0.0 }
 0x74c   :  { %1004 = vadd.xlane.f32.xlu2 %v1003_v51 }
 0x778   :  { %v908_v53 = vpop.xlane.xlu2 %907 }
 0x779   :  { %1453 = vrcp.f32 %v908_v53  ;;  %v1393_v53 = vld [vmem:[%s2076_s11 + $0x38] sm:$0xff] }
 0x77a   :  { %1162 = vmatpush.bf16.msra.mxu3 %v1393_v53 }
 0x77f   :  { %v1454_v54 = vpop.eup %1453 }
 0x780   :  { %v910_v55 = vmul.f32 %v1454_v54, %v1444_v15  ;;  %v913_v56 = vpop.permute.xlu2 %912 }
 0x781   :  { %v918_v57 = vsel %vm320_vm1, %v913_v56, 0  ;;  %v1392_v56 = vld [vmem:[%s2076_s11 + $0x30] sm:$0xff] }
 0x782   :  { %v911_v59 = vpack.c.bf16 %v910_v55, %v910_v55  ;;  %927 = vmatpush.bf16.msrb.mxu0 %v918_v57  ;;  %1163 = vmatpush.bf16.msra.mxu3 %v1392_v56 }
 0x785   :  { %1335 = vmatmul.msk.bf16.vlgmr.msrb.gmra.mxu0 %vm316_vm2, %v911_v59 }
 0x78d   :  { %v770_v60 = vpop.f32.mrf.mxu1 }
 0x78e   :  { %v774_v61 = vpack.c.bf16 %v770_v60, %v770_v60  ;;  %v1391_v60 = vld [vmem:[%s2076_s11 + $0x28] sm:$0xff] }
 0x78f   :  { %1164 = vmatpush.bf16.msra.mxu3 %v1391_v60 }
 0x790   :  { %1329 = vmatmul.msk.bf16.vlgmr.msra.gmra.mxu2 %vm316_vm2, %v774_v61 }
 0x791   :  { %1083 = vmatpush.bf16.msra.mxu2 %v1385_v43 }
 0x795   :  { %v772_v62 = vpop.f32.mrf.mxu1  ;;  %1084 = vmatpush.bf16.msra.mxu2 %v1384_v45 }
 0x796   :  { %v1390_v62 = vld [vmem:[%s2076_s11 + $0x20] sm:$0xff] }
 0x797   :  { %1165 = vmatpush.bf16.msra.mxu3 %v1390_v62 }
 0x79d   :  { %v857_v63 = vpop.f32.mrf.mxu1 }
 0x79e   :  { %v861_v26 = vpack.c.bf16 %v857_v63, %v857_v63 }
 0x7a0   :  { %1333 = vmatmul.msk.bf16.vlgmr.msrb.gmra.mxu2 %vm316_vm2, %v861_v26 }
 0x7a5   :  { %v859_v0 = vpop.f32.mrf.mxu1 }
 0x7bf   :  { %v1005_v29 = vpop.xlane.xlu2 %1004 }
 0x7c0   :  { %v1009_v30 = vmul.f32 %v1005_v29, %v1981_v37 }
 0x7c2   :  { %v1011_v31 = vrot.slane %v1009_v30, 4 }
 0x7c4   :  { %v1012_v32 = vadd.f32 %v1011_v31, %v1009_v30  ;;  %v1418_v30 = vld [vmem:[#allocation13] ss:$0 sm:$0xff] }
 0x7c6   :  { %v1013_v33 = vrot.slane %v1012_v32, 2 }
 0x7c8   :  { %v1014_v34 = vadd.f32 %v1013_v33, %v1012_v32 }
 0x7ca   :  { %v1015_v35 = vrot.slane %v1014_v34, 1 }
 0x7cc   :  { %v1016_v36 = vadd.f32 %v1015_v35, %v1014_v34 }
 0x7ce   :  { %v1023_v38 = vmul.f32 %v1016_v36, %v1984_v46 }
 0x7d0   :  { %v1025_v39 = vadd.f32 1e-05, %v1023_v38 }
 0x7d2   :  { %1455 = vrsqrt.f32 %v1025_v39  ;;  %vm1033_vm6 = vweird.f32 %v1025_v39 }
 0x7d8   :  { %v1456_v44 = vpop.eup %1455 }
 0x7d9   :  { %v1028_v48 = vmul.f32 %v1456_v44, %v1025_v39  ;;  %vm1034_vm5 = vweird.f32 %v1456_v44 }
 0x7da   :  { %vm1035_vm7 = vmor %vm1033_vm6, %vm1034_vm5 }
 0x7db   :  { %v1029_v54 = vmul.f32 %v1456_v44, %v1028_v48 }
 0x7dd   :  { %v1030_v59 = vmul.f32 0.5, %v1029_v54 }
 0x7df   :  { %v1031_v61 = vsub.f32 1.5, %v1030_v59 }
 0x7e1   :  { %v1032_v26 = vmul.f32 %v1456_v44, %v1031_v61 }
 0x802   :  { %v929_v58 = vpop.f32.mrf.mxu0 }
 0x803   :  { %v933_v1 = vpack.c.bf16 %v929_v58, %v929_v58 }
 0x805   :  { %1336 = vmatmul.msk.bf16.vlgmr.msra.gmra.mxu1 %vm316_vm2, %v933_v1  ;;  %v1036_v1 = vsel %vm1035_vm7, %v1456_v44, %v1032_v26 }
 0x80a   :  { %v931_v4 = vpop.f32.mrf.mxu0 }
 0x813   :  { %v787_v5 = vpop.f32.mrf.mxu2 }
 0x814   :  { %v804_v8 = vadd.f32 %v1961_v52, %v787_v5  ;;  %v959_v5 = vld [vmem:[%s2078_s13] sm:$0xf] }
 0x81b   :  { %v789_v7 = vpop.f32.mrf.mxu2 }
 0x823   :  { %v874_v9 = vpop.f32.mrf.mxu2 }
 0x824   :  { %v878_v10 = vadd.f32 %v874_v9, %v804_v8  ;;  %v1047_v8 = vmul.f32 %v1036_v1, %v1987_v49  ;;  %v960_v9 = vunpack.c.l.bf16 %v959_v5  ;;  %v1389_v49 = vld [vmem:[%s2076_s11 + $0x18] sm:$0xff] }
 0x825   :  { %1166 = vmatpush.bf16.msra.mxu3 %v1389_v49 }
 0x82b   :  { %v876_v11 = vpop.f32.mrf.mxu2 }
 0x82c   :  { %v961_v11 = vld [vmem:[%s2079_s14] sm:$0xf] }
 0x882   :  { %v946_v13 = vpop.f32.mrf.mxu1 }
 0x883   :  { %v950_v15 = vadd.f32 %v946_v13, %v878_v10 }
 0x885   :  { %v952_v16 = vadd.f32 %v950_v15, %v1837_v3 }
 0x887   :  { %v958_v14 = vadd.f32 %v1969_v6, %v952_v16  ;;  %v962_v16 = vunpack.c.l.bf16 %v961_v11 }
 0x889   :  { %v966_v17 = vsel %vm192_vm0, %v958_v14, 0.0 }
 0x88a   :  { %967 = vadd.xlane.f32.xlu1 %v966_v17  ;;  %v948_v2 = vpop.f32.mrf.mxu1 }
 0x8fd   :  { %v968_v19 = vpop.xlane.xlu1 %967 }
 0x8fe   :  { %v977_v20 = vmul.f32 %v1981_v37, %v968_v19 }
 0x900   :  { %v984_v21 = vrot.slane %v977_v20, 4 }
 0x902   :  { %v985_v22 = vadd.f32 %v984_v21, %v977_v20  ;;  %v1388_v21 = vld [vmem:[%s2076_s11 + $0x10] sm:$0xff] }
 0x903   :  { %1167 = vmatpush.bf16.msra.mxu3 %v1388_v21 }
 0x904   :  { %v986_v23 = vrot.slane %v985_v22, 2 }
 0x906   :  { %v987_v52 = vadd.f32 %v986_v23, %v985_v22  ;;  %v1387_v22 = vld [vmem:[%s2076_s11 + $0x8] sm:$0xff]  ;;  %v1386_v23 = vld [vmem:[%s2076_s11] sm:$0xff] }
 0x907   :  { %1168 = vmatpush.bf16.msra.mxu3 %v1387_v22 }
 0x908   :  { %v988_v25 = vrot.slane %v987_v52, 1 }
 0x90a   :  { %v989_v24 = vadd.f32 %v988_v25, %v987_v52  ;;  %v1417_v25 = vld [vmem:[#allocation11] ss:$0 sm:$0xff] }
 0x90b   :  { %1169 = vmatpush.bf16.msra.mxu3 %v1386_v23 }
 0x90c   :  { %v998_v27 = vmul.f32 %v1984_v46, %v989_v24 }
 0x90e   :  { %v2003_v28 = vsub.f32 %v958_v14, %v998_v27  ;;  %v1049_v14 = vmul.f32 %v1047_v8, %v960_v9 }
 0x910   :  { %v1002_v3 = vmul.f32 %v2003_v28, %v2003_v28  ;;  %v1051_v2 = vadd.f32 %v1049_v14, %v962_v16 }
 0x912   :  { %v1006_v6 = vsel %vm192_vm0, %v1002_v3, 0.0 }
 0x913   :  { %1007 = vadd.xlane.f32.xlu0 %v1006_v6 }
 0x986   :  { %v1008_v40 = vpop.xlane.xlu0 %1007 }
 0x987   :  { %v1010_v12 = vmul.f32 %v1008_v40, %v1981_v37 }
 0x989   :  { %v1017_v41 = vrot.slane %v1010_v12, 4 }
 0x98b   :  { %v1018_v42 = vadd.f32 %v1017_v41, %v1010_v12 }
 0x98d   :  { %v1019_v18 = vrot.slane %v1018_v42, 2 }
 0x98f   :  { %v1020_v47 = vadd.f32 %v1019_v18, %v1018_v42 }
 0x991   :  { %v1021_v50 = vrot.slane %v1020_v47, 1 }
 0x993   :  { %v1022_v51 = vadd.f32 %v1021_v50, %v1020_v47 }
 0x995   :  { %v1024_v55 = vmul.f32 %v1022_v51, %v1984_v46 }
 0x997   :  { %v1026_v57 = vadd.f32 1e-05, %v1024_v55 }
 0x999   :  { %1457 = vrsqrt.f32 %v1026_v57  ;;  %vm1043_vm9 = vweird.f32 %v1026_v57 }
 0x99f   :  { %v1458_v63 = vpop.eup %1457 }
 0x9a0   :  { %v1038_v0 = vmul.f32 %v1458_v63, %v1026_v57  ;;  %vm1044_vm8 = vweird.f32 %v1458_v63 }
 0x9a1   :  { %vm1045_vm10 = vmor %vm1043_vm9, %vm1044_vm8 }
 0x9a2   :  { %v1039_v58 = vmul.f32 %v1458_v63, %v1038_v0 }
 0x9a4   :  { %v1040_v4 = vmul.f32 0.5, %v1039_v58 }
 0x9a6   :  { %v1041_v7 = vsub.f32 1.5, %v1040_v4 }
 0x9a8   :  { %v1042_v10 = vmul.f32 %v1458_v63, %v1041_v7 }
 0x9aa   :  { %v1046_v13 = vsel %vm1045_vm10, %v1458_v63, %v1042_v10 }
 0x9ab   :  { %v1048_v15 = vmul.f32 %v1046_v13, %v2003_v28 }
 0x9ad   :  { %v1050_v17 = vmul.f32 %v1048_v15, %v960_v9 }
 0x9af   :  { %v1052_v19 = vadd.f32 %v1050_v17, %v962_v16 }
 0x9b1   :  { %v1053_v20 = vpack.c.bf16 %v1052_v19, %v1051_v2 }
 0x9b3   :  { %1345 = vmatmul.msk.bf16.vlgmr.msra.gmra.mxu2 %vm192_vm0, %v1053_v20 }
 0xa36   :  { %v1086_v52 = vpop.f32.mrf.mxu2 }
 0xa37   :  { %v1087_v24 = vadd.f32 %v1417_v25, %v1086_v52 }
 0xa39   :  { %v1091_v3 = vmax.f32 %v1087_v24, 0.0 }
 0xa3e   :  { %v1088_v27 = vpop.f32.mrf.mxu2 }
 0xa3f   :  { %v1089_v28 = vadd.f32 %v1417_v25, %v1088_v27  ;;  %v1178_v27 = vld [vmem:[%s2080_s15] sm:$0xf]  ;;  %s1706_s15 = smov [#allocation16]  }
 0xa40   :  { %s1264_s8 = sshll.u32 %s1706_s15, 4  ;;  %s1265_s8 = int_to_ptr.vmem [resolvable:$true] %s1264_s8 }
 0xa41   :  { %v1092_v6 = vmax.f32 %v1089_v28, 0.0 }
 0xa43   :  { %v1093_v29 = vpack.c.bf16 %v1092_v6, %v1091_v3 }
 0xa45   :  { %1170 = vmatmul.bf16.vlgmr.msra.gmra.mxu3 %v1093_v29  ;;  %v1180_v29 = vld [vmem:[#allocation14] sm:$0xf] }
 0xac8   :  { %v1171_v31 = vpop.f32.mrf.mxu3 }
 0xac9   :  { %v1172_v32 = vadd.f32 %v1418_v30, %v1171_v31 }
 0xacb   :  { %v1176_v33 = vadd.f32 %v1172_v32, %v1051_v2 }
 0xacd   :  { %v1182_v34 = vsel %vm192_vm0, %v1176_v33, 0.0 }
 0xace   :  { %1183 = vadd.xlane.f32.xlu1 %v1182_v34 }
 0xad0   :  { %v1173_v35 = vpop.f32.mrf.mxu3 }
 0xad1   :  { %v1174_v36 = vadd.f32 %v1418_v30, %v1173_v35  ;;  %v1179_v30 = vunpack.c.l.bf16 %v1178_v27 }
 0xad3   :  { %v1177_v38 = vadd.f32 %v1174_v36, %v1052_v19 }
 0xad5   :  { %v1185_v39 = vsel %vm192_vm0, %v1177_v38, 0.0 }
 0xad6   :  { %1186 = vadd.xlane.f32.xlu0 %v1185_v39 }
 0xb41   :  { %v1184_v40 = vpop.xlane.xlu1 %1183 }
 0xb42   :  { %v1188_v12 = vmul.f32 %v1184_v40, %v1981_v37 }
 0xb44   :  { %v1190_v41 = vrot.slane %v1188_v12, 4 }
 0xb46   :  { %v1191_v42 = vadd.f32 %v1190_v41, %v1188_v12 }
 0xb48   :  { %v1192_v43 = vrot.slane %v1191_v42, 2 }
 0xb49   :  { %v1187_v44 = vpop.xlane.xlu0 %1186 }
 0xb4a   :  { %v1193_v18 = vadd.f32 %v1192_v43, %v1191_v42  ;;  %v1189_v45 = vmul.f32 %v1187_v44, %v1981_v37 }
 0xb4c   :  { %v1194_v47 = vrot.slane %v1193_v18, 1  ;;  %v1196_v48 = vrot.slane %v1189_v45, 4 }
 0xb4e   :  { %v1195_v50 = vadd.f32 %v1194_v47, %v1193_v18  ;;  %v1197_v51 = vadd.f32 %v1196_v48, %v1189_v45 }
 0xb50   :  { %v1198_v53 = vrot.slane %v1197_v51, 2  ;;  %v1202_v54 = vmul.f32 %v1195_v50, %v1984_v46 }
 0xb52   :  { %v1199_v55 = vadd.f32 %v1198_v53, %v1197_v51  ;;  %v1204_v56 = vsub.f32 %v1176_v33, %v1202_v54  ;;  %v1181_v33 = vunpack.c.l.bf16 %v1180_v29 }
 0xb54   :  { %v1200_v57 = vrot.slane %v1199_v55, 1  ;;  %v1206_v59 = vmul.f32 %v1204_v56, %v1204_v56 }
 0xb56   :  { %v1201_v60 = vadd.f32 %v1200_v57, %v1199_v55  ;;  %v1208_v61 = vsel %vm192_vm0, %v1206_v59, 0.0 }
 0xb57   :  { %1209 = vadd.xlane.f32.xlu1 %v1208_v61 }
 0xb58   :  { %v1203_v62 = vmul.f32 %v1201_v60, %v1984_v46 }
 0xb5a   :  { %v1205_v63 = vsub.f32 %v1177_v38, %v1203_v62 }
 0xb5c   :  { %v1207_v26 = vmul.f32 %v1205_v63, %v1205_v63 }
 0xb5e   :  { %v1211_v0 = vsel %vm192_vm0, %v1207_v26, 0.0 }
 0xb5f   :  { %1212 = vadd.xlane.f32.xlu0 %v1211_v0 }
 0xbca   :  { %v1210_v58 = vpop.xlane.xlu1 %1209 }
 0xbcb   :  { %v1214_v1 = vmul.f32 %v1210_v58, %v1981_v37 }
 0xbcd   :  { %v1216_v4 = vrot.slane %v1214_v1, 4 }
 0xbcf   :  { %v1217_v5 = vadd.f32 %v1216_v4, %v1214_v1 }
 0xbd1   :  { %v1218_v7 = vrot.slane %v1217_v5, 2 }
 0xbd2   :  { %v1213_v8 = vpop.xlane.xlu0 %1212 }
 0xbd3   :  { %v1219_v9 = vadd.f32 %v1218_v7, %v1217_v5  ;;  %v1215_v10 = vmul.f32 %v1213_v8, %v1981_v37 }
 0xbd5   :  { %v1220_v11 = vrot.slane %v1219_v9, 1  ;;  %v1222_v13 = vrot.slane %v1215_v10, 4 }
 0xbd7   :  { %v1221_v15 = vadd.f32 %v1220_v11, %v1219_v9  ;;  %v1223_v16 = vadd.f32 %v1222_v13, %v1215_v10 }
 0xbd9   :  { %v1228_v14 = vmul.f32 %v1221_v15, %v1984_v46  ;;  %v1224_v17 = vrot.slane %v1223_v16, 2 }
 0xbdb   :  { %v1230_v2 = vadd.f32 1e-05, %v1228_v14  ;;  %v1225_v19 = vadd.f32 %v1224_v17, %v1223_v16 }
 0xbdd   :  { %1459 = vrsqrt.f32 %v1230_v2  ;;  %v1226_v20 = vrot.slane %v1225_v19, 1  ;;  %vm1238_vm12 = vweird.f32 %v1230_v2 }
 0xbdf   :  { %v1227_v49 = vadd.f32 %v1226_v20, %v1225_v19 }
 0xbe1   :  { %v1229_v21 = vmul.f32 %v1227_v49, %v1984_v46 }
 0xbe3   :  { %v1460_v22 = vpop.eup %1459  ;;  %v1231_v23 = vadd.f32 1e-05, %v1229_v21 }
 0xbe4   :  { %v1233_v52 = vmul.f32 %v1460_v22, %v1230_v2  ;;  %vm1239_vm11 = vweird.f32 %v1460_v22 }
 0xbe5   :  { %1461 = vrsqrt.f32 %v1231_v23  ;;  %vm1240_vm13 = vmor %vm1238_vm12, %vm1239_vm11  ;;  %vm1248_vm15 = vweird.f32 %v1231_v23 }
 0xbe6   :  { %v1234_v25 = vmul.f32 %v1460_v22, %v1233_v52 }
 0xbe8   :  { %v1235_v37 = vmul.f32 0.5, %v1234_v25 }
 0xbea   :  { %v1236_v24 = vsub.f32 1.5, %v1235_v37 }
 0xbeb   :  { %v1462_v28 = vpop.eup %1461 }
 0xbec   :  { %v1237_v3 = vmul.f32 %v1460_v22, %v1236_v24  ;;  %v1243_v6 = vmul.f32 %v1462_v28, %v1231_v23  ;;  %vm1249_vm14 = vweird.f32 %v1462_v28 }
 0xbed   :  { %vm1250_vm1 = vmor %vm1248_vm15, %vm1249_vm14 }
 0xbee   :  { %v1241_v46 = vsel %vm1240_vm13, %v1460_v22, %v1237_v3  ;;  %v1244_v31 = vmul.f32 %v1462_v28, %v1243_v6 }
 0xbef   :  { %v1252_v32 = vmul.f32 %v1241_v46, %v1204_v56 }
 0xbf0   :  { %v1245_v34 = vmul.f32 0.5, %v1244_v31 }
 0xbf1   :  { %v1254_v35 = vmul.f32 %v1252_v32, %v1179_v30 }
 0xbf2   :  { %v1246_v36 = vsub.f32 1.5, %v1245_v34 }
 0xbf3   :  { %v1256_v38 = vadd.f32 %v1254_v35, %v1181_v33 }
 0xbf4   :  { %v1247_v39 = vmul.f32 %v1462_v28, %v1246_v36 }
 0xbf5   :  { %1258 = vst.msk [vmem:[#allocation16] sm:$0xff] %vm192_vm0, %v1256_v38 }
 0xbf6   :  { %v1251_v40 = vsel %vm1250_vm1, %v1462_v28, %v1247_v39 }
 0xbf7   :  { %v1253_v12 = vmul.f32 %v1251_v40, %v1205_v63 }
 0xbf9   :  { %v1255_v41 = vmul.f32 %v1253_v12, %v1179_v30 }
 0xbfb   :  { %v1257_v42 = vadd.f32 %v1255_v41, %v1181_v33 }
 0xbfd   :  { %1259 = vst.msk [vmem:[#allocation16 + $0x8] sm:$0xff] %vm192_vm0, %v1257_v42 }
 0xbfe   :  { %1272 = dma.vmem_to_hbm [thread:$0]  %s1265_s8, 256, %s1267_s12, [#allocation4], %s1707_s28, %s1707_s28, %s1708_s29  }
 0xbff   :  { %1689 = dma.done.wait [#allocation4], 256  }
 0xc00   :  { %1690 = vsyncadd [#allocation4], 4294967040 }
 0xc01   :  { %1277 = vsyncpa [#allocation3], 1 }
 0xc02   :  { %1278 = vsyncpa [#allocation6], 1 }
 0xc03   :  { %1279 = vsyncpa [#allocation9], 1 }
 0xc04   :  { %1280 = vsyncpa [#allocation12], 1 }
 0xc05   :  { %1281 = vsyncpa [#allocation15], 1 }
 0xc06   :  { %1282 = vsyncpa [#allocation4], 1 }

</bundles_post_ra>
